<compile_context>
chip_gen: v5e
topology: v5e:2x2
jax: 0.10.0
libtpu: 0.0.40
codegen_flags: <defaults>
</compile_context>

<pallas_src>
import functools

import jax
import jax.numpy as jnp
from jax import lax
from jax.experimental import pallas as pl
from jax.experimental.pallas import tpu as pltpu


def _round_up(x, m):
    return ((x + m - 1) // m) * m


# ----------------------------- RoI max pooling ------------------------------
def _roi_pool_kernel(ridx_ref, rois_ref, x_ref, out_ref, *, spatial_scale, roi_size):
    """Legacy (Caffe/torchvision) ROIPool of one RoI against its (1, H, W, C) block.

    rois_ref: flat (R*4,) boxes in (x1, y1, x2, y2) order (already reordered the
    way the PyTorch module does with indices_and_rois[:, [0, 2, 1, 4, 3]]).
    """
    r = pl.program_id(0)
    H, W, C = x_ref.shape[1], x_ref.shape[2], x_ref.shape[3]
    S = roi_size

    base = r * 4
    x1 = rois_ref[base + 0]
    y1 = rois_ref[base + 1]
    x2 = rois_ref[base + 2]
    y2 = rois_ref[base + 3]

    # round(coord * spatial_scale); width/height clamped to >= 1 (legacy ROIPool).
    roi_start_w = jnp.floor(x1 * spatial_scale + 0.5).astype(jnp.int32)
    roi_start_h = jnp.floor(y1 * spatial_scale + 0.5).astype(jnp.int32)
    roi_end_w = jnp.floor(x2 * spatial_scale + 0.5).astype(jnp.int32)
    roi_end_h = jnp.floor(y2 * spatial_scale + 0.5).astype(jnp.int32)
    roi_w = jnp.maximum(roi_end_w - roi_start_w + 1, 1).astype(jnp.float32)
    roi_h = jnp.maximum(roi_end_h - roi_start_h + 1, 1).astype(jnp.float32)
    bin_h = roi_h / float(S)
    bin_w = roi_w / float(S)

    def bounds(p, bsz, start, limit):
        lo = jnp.clip(jnp.floor(p * bsz).astype(jnp.int32) + start, 0, limit)
        hi = jnp.clip(jnp.ceil((p + 1.0) * bsz).astype(jnp.int32) + start, 0, limit)
        return lo, hi

    xb = x_ref[0].astype(jnp.float32)                      # (H, W, C), C in lanes
    neg = jnp.float32(-jnp.inf)
    w_iota = lax.broadcasted_iota(jnp.int32, (1, W, 1), 1)
    h_iota = lax.broadcasted_iota(jnp.int32, (1, H, 1), 1)

    # Stage 1: masked max over W, one output column (pw) at a time.
    # Live temp per step is (H, W, C) -- same size as the input block.
    cols = []
    for pw in range(S):
        ws, we = bounds(float(pw), bin_w, roi_start_w, W)
        mw = (w_iota >= ws) & (w_iota < we)                # (1, W, 1)
        col = jnp.max(jnp.where(mw, xb, neg), axis=1)      # (H, C)
        cols.append(jnp.where(we <= ws, 0.0, col))         # empty w-bin -> 0
    t = jnp.stack(cols, axis=0)                            # (S_pw, H, C)

    # Stage 2: masked max over H, one output row (ph) at a time.
    rows = []
    for ph in range(S):
        hs, he = bounds(float(ph), bin_h, roi_start_h, H)
        mh = (h_iota >= hs) & (h_iota < he)                # (1, H, 1)
        row = jnp.max(jnp.where(mh, t, neg), axis=1)       # (S_pw, C)
        rows.append(jnp.where(he <= hs, 0.0, row))         # empty h-bin -> 0
    pooled = jnp.concatenate(rows, axis=0)                 # (S*S, C), order (ph, pw, c)
    out_ref[...] = pooled[None].astype(out_ref.dtype)


def roi_pool(x_nhwc, roi_indices, rois_flat, roi_size, spatial_scale):
    N, H, W, C = x_nhwc.shape
    R = roi_indices.shape[0]
    S = int(roi_size)
    kernel = functools.partial(
        _roi_pool_kernel, spatial_scale=float(spatial_scale), roi_size=S
    )
    grid_spec = pltpu.PrefetchScalarGridSpec(
        num_scalar_prefetch=2,
        grid=(R,),
        in_specs=[
            # Same ridx[r] across consecutive steps (RoIs are pre-sorted by image)
            # -> Pallas skips the feature-map DMA for repeated block indices.
            pl.BlockSpec((1, H, W, C), lambda r, ridx, rois: (ridx[r], 0, 0, 0)),
        ],
        out_specs=pl.BlockSpec((1, S * S, C), lambda r, ridx, rois: (r, 0, 0)),
    )
    return pl.pallas_call(
        kernel,
        out_shape=jax.ShapeDtypeStruct((R, S * S, C), x_nhwc.dtype),
        grid_spec=grid_spec,
        compiler_params=pltpu.CompilerParams(dimension_semantics=("parallel",)),
    )(roi_indices, rois_flat, x_nhwc)


# --------------------------- Tiled linear (FC) kernel ------------------------
def _linear_kernel(x_ref, w_ref, b_ref, o_ref, acc_ref, *, relu):
    @pl.when(pl.program_id(2) == 0)
    def _():
        acc_ref[...] = jnp.zeros_like(acc_ref)

    acc_ref[...] += jnp.dot(x_ref[...], w_ref[...], preferred_element_type=jnp.float32)

    @pl.when(pl.program_id(2) == pl.num_programs(2) - 1)
    def _():
        out = acc_ref[...] + b_ref[...]
        if relu:
            out = jnp.maximum(out, 0.0)
        o_ref[...] = out.astype(o_ref.dtype)


def pallas_linear(x, w, b, *, relu, out_dtype, tm_pref=128, tn_pref=512, tk_pref=512):
    """out = x @ w + b (optional ReLU).

    w: (Kp, Np) and b: (1, Np) are pre-padded to multiples of 128 (done once at
    init). x is padded here to (Mp, Kp); caller slices the logical rows/cols.
    """
    M, K = x.shape
    Kp, Np = w.shape
    assert Kp % 128 == 0 and Np % 128 == 0 and Kp >= K

    if M <= tm_pref:
        tm = _round_up(M, 8)
        Mp = tm
    else:
        tm = tm_pref
        Mp = _round_up(M, tm)
    tk = next(c for c in (tk_pref, 256, 128) if Kp % c == 0)
    tn = next(c for c in (tn_pref, 256, 128) if Np % c == 0)

    if (Mp, Kp) != (M, K):
        x = jnp.pad(x, ((0, Mp - M), (0, Kp - K)))

    grid = (Mp // tm, Np // tn, Kp // tk)
    kernel = functools.partial(_linear_kernel, relu=relu)
    return pl.pallas_call(
        kernel,
        out_shape=jax.ShapeDtypeStruct((Mp, Np), out_dtype),
        grid_spec=pltpu.PrefetchScalarGridSpec(
            num_scalar_prefetch=0,
            grid=grid,
            in_specs=[
                pl.BlockSpec((tm, tk), lambda i, j, k: (i, k)),
                pl.BlockSpec((tk, tn), lambda i, j, k: (k, j)),
                pl.BlockSpec((1, tn), lambda i, j, k: (0, j)),
            ],
            out_specs=pl.BlockSpec((tm, tn), lambda i, j, k: (i, j)),
            scratch_shapes=[pltpu.VMEM((tm, tn), jnp.float32)],
        ),
        compiler_params=pltpu.CompilerParams(
            dimension_semantics=("parallel", "parallel", "arbitrary")
        ),
    )(x, w, b)


# ------------------------------- Module wrapper ------------------------------
class VGG16RoIHeadPallas:
    """JAX/Pallas re-implementation of VGG16roIHead.forward."""

    def __init__(self, n_class, roi_size, spatial_scale, in_channels, hidden, key):
        self.n_class = n_class
        self.roi_size = int(roi_size)
        self.spatial_scale = float(spatial_scale)
        C, S = in_channels, self.roi_size
        in_dim = C * S * S

        k1, k2, k3, k4 = jax.random.split(key, 4)
        # PyTorch-layout parameters (out, in). fc6/fc7 stand in for the ported VGG
        # classifier (dropout removed, as in the reference repo).
        w_fc6 = 0.01 * jax.random.normal(k1, (hidden, in_dim), jnp.float32)
        b_fc6 = jnp.zeros((hidden,), jnp.float32)
        w_fc7 = 0.01 * jax.random.normal(k2, (hidden, hidden), jnp.float32)
        b_fc7 = jnp.zeros((hidden,), jnp.float32)
        # normal_init(cls_loc, 0, 0.001); normal_init(score, 0, 0.01); biases zero.
        w_cls_loc = 0.001 * jax.random.normal(k3, (n_class * 4, hidden), jnp.float32)
        b_cls_loc = jnp.zeros((n_class * 4,), jnp.float32)
        w_score = 0.01 * jax.random.normal(k4, (n_class, hidden), jnp.float32)
        b_score = jnp.zeros((n_class,), jnp.float32)

        # Kernel layouts: (in, out), bf16, padded to 128-lane multiples.
        Kp = _round_up(in_dim, 128)
        Hp = _round_up(hidden, 128)
        n_out = n_class * 4 + n_class
        Op = _round_up(n_out, 128)
        self._n_out = n_out

        # w_fc6 rows permuted from PyTorch (c, ph, pw) flatten order to the pooled
        # kernel output's (ph, pw, c) order.
        w6 = jnp.transpose(w_fc6.reshape(hidden, C, S, S), (0, 2, 3, 1))
        w6 = w6.reshape(hidden, in_dim).T                                  # (in, out)
        self.w6 = jnp.pad(w6, ((0, Kp - in_dim), (0, Hp - hidden))).astype(jnp.bfloat16)
        self.b6 = jnp.pad(b_fc6, (0, Hp - hidden))[None, :]

        self.w7 = jnp.pad(w_fc7.T, ((0, Hp - hidden), (0, Hp - hidden))).astype(jnp.bfloat16)
        self.b7 = jnp.pad(b_fc7, (0, Hp - hidden))[None, :]

        # cls_loc and score fused into one lane-dense (padded-to-128) head matmul.
        wh = jnp.concatenate([w_cls_loc.T, w_score.T], axis=1)            # (hidden, 5*n_class)
        bh = jnp.concatenate([b_cls_loc, b_score])
        self.wh = jnp.pad(wh, ((0, Hp - hidden), (0, Op - n_out))).astype(jnp.bfloat16)
        self.bh = jnp.pad(bh, (0, Op - n_out))[None, :]

    def __call__(self, x, rois, roi_indices):
        rois = rois.astype(jnp.float32)
        roi_indices = roi_indices.astype(jnp.int32)
        # rois come in as (ymin, xmin, ymax, xmax); the PyTorch module reorders
        # cat([idx, rois])[:, [0, 2, 1, 4, 3]] -> (idx, x1, y1, x2, y2) for ROIPool.
        rois_xyxy = jnp.stack([rois[:, 1], rois[:, 0], rois[:, 3], rois[:, 2]], axis=1)

        # Sort RoIs by image index so consecutive grid steps reuse the same
        # DMA'd feature block; restore original order on the outputs.
        order = jnp.argsort(roi_indices)
        inv = jnp.argsort(order)

        # Channels-last so C is the lane dimension inside the pooling kernel.
        # TODO(synk): have the backbone emit NHWC directly to avoid this relayout.
        x_nhwc = jnp.transpose(x, (0, 2, 3, 1))

        pool = roi_pool(
            x_nhwc,
            roi_indices[order],
            rois_xyxy[order].reshape(-1),   # flat (R*4,) -> compact SMEM prefetch
            self.roi_size,
            self.spatial_scale,
        )
        R = pool.shape[0]
        pool_flat = pool.reshape(R, -1).astype(jnp.bfloat16)   # (R, S*S*C), (ph,pw,c)

        h = pallas_linear(pool_flat, self.w6, self.b6, relu=True, out_dtype=jnp.bfloat16)
        h = pallas_linear(h, self.w7, self.b7, relu=True, out_dtype=jnp.bfloat16)
        out = pallas_linear(h, self.wh, self.bh, relu=False, out_dtype=jnp.float32)

        n4 = self.n_class * 4
        out = out[:R]
        roi_cls_locs = out[:, :n4][inv]
        roi_scores = out[:, n4:n4 + self.n_class][inv]
        return roi_cls_locs, roi_scores


if __name__ == "__main__":
    key = jax.random.PRNGKey(0)
    N, C, H, W = 2, 4, 16, 16
    n_class, roi_size, spatial_scale = 5, 7, 0.5
    hidden = 32
    R = 8

    k_x, k_y1, k_x1, k_h, k_w, k_idx, k_p = jax.random.split(key, 7)
    x = jax.random.normal(k_x, (N, C, H, W), jnp.float32)

    img_h, img_w = H / spatial_scale, W / spatial_scale
    y1 = jax.random.uniform(k_y1, (R,), minval=0.0, maxval=img_h * 0.6)
    x1 = jax.random.uniform(k_x1, (R,), minval=0.0, maxval=img_w * 0.6)
    y2 = y1 + jax.random.uniform(k_h, (R,), minval=2.0, maxval=img_h * 0.4)
    x2 = x1 + jax.random.uniform(k_w, (R,), minval=2.0, maxval=img_w * 0.4)
    rois = jnp.stack([y1, x1, y2, x2], axis=1)  # (ymin, xmin, ymax, xmax)
    roi_indices = jax.random.randint(k_idx, (R,), 0, N, dtype=jnp.int32)

    head = VGG16RoIHeadPallas(n_class, roi_size, spatial_scale, C, hidden, k_p)
    roi_cls_locs, roi_scores = head(x, rois, roi_indices)
    jax.block_until_ready((roi_cls_locs, roi_scores))

    assert roi_cls_locs.shape == (R, n_class * 4)
    assert roi_scores.shape == (R, n_class)
    assert bool(jnp.all(jnp.isfinite(roi_cls_locs))) and bool(jnp.all(jnp.isfinite(roi_scores)))
    print("KERNEL_OK")
</pallas_src>

<mosaic_0001>
module attributes {stable_mosaic.version = 11 : i64} {
  func.func @_roi_pool_kernel(%arg0: i32, %arg1: memref<8xi32, #tpu.memory_space<smem>>, %arg2: memref<32xf32, #tpu.memory_space<smem>>, %arg3: memref<1x16x16x4xf32, #tpu.memory_space<vmem>>, %arg4: memref<1x49x4xf32, #tpu.memory_space<vmem>>) attributes {dimension_semantics = [#tpu.dimension_semantics<parallel>], iteration_bounds = array<i64: 8>, scalar_prefetch = 2 : i64, scratch_operands = 0 : i64, tpu.core_type = #tpu.core_type<tc>, window_params = [{transform_indices = @transform_0, window_bounds = array<i64: 1, 16, 16, 4>}, {transform_indices = @transform_1, window_bounds = array<i64: 1, 49, 4>}]} {
    %c4_i32 = arith.constant 4 : i32
    %0 = arith.muli %arg0, %c4_i32 : i32
    %c0_i32 = arith.constant 0 : i32
    %1 = arith.addi %0, %c0_i32 : i32
    %2 = arith.index_cast %1 : i32 to index
    %3 = memref.load %arg2[%2] : memref<32xf32, #tpu.memory_space<smem>>
    %c1_i32 = arith.constant 1 : i32
    %4 = arith.addi %0, %c1_i32 : i32
    %5 = arith.index_cast %4 : i32 to index
    %6 = memref.load %arg2[%5] : memref<32xf32, #tpu.memory_space<smem>>
    %c2_i32 = arith.constant 2 : i32
    %7 = arith.addi %0, %c2_i32 : i32
    %8 = arith.index_cast %7 : i32 to index
    %9 = memref.load %arg2[%8] : memref<32xf32, #tpu.memory_space<smem>>
    %c3_i32 = arith.constant 3 : i32
    %10 = arith.addi %0, %c3_i32 : i32
    %11 = arith.index_cast %10 : i32 to index
    %12 = memref.load %arg2[%11] : memref<32xf32, #tpu.memory_space<smem>>
    %cst = arith.constant 5.000000e-01 : f32
    %13 = arith.mulf %3, %cst : f32
    %cst_0 = arith.constant 5.000000e-01 : f32
    %14 = arith.addf %13, %cst_0 : f32
    %15 = math.floor %14 : f32
    %16 = arith.fptosi %15 : f32 to i32
    %cst_1 = arith.constant 5.000000e-01 : f32
    %17 = arith.mulf %6, %cst_1 : f32
    %cst_2 = arith.constant 5.000000e-01 : f32
    %18 = arith.addf %17, %cst_2 : f32
    %19 = math.floor %18 : f32
    %20 = arith.fptosi %19 : f32 to i32
    %cst_3 = arith.constant 5.000000e-01 : f32
    %21 = arith.mulf %9, %cst_3 : f32
    %cst_4 = arith.constant 5.000000e-01 : f32
    %22 = arith.addf %21, %cst_4 : f32
    %23 = math.floor %22 : f32
    %24 = arith.fptosi %23 : f32 to i32
    %cst_5 = arith.constant 5.000000e-01 : f32
    %25 = arith.mulf %12, %cst_5 : f32
    %cst_6 = arith.constant 5.000000e-01 : f32
    %26 = arith.addf %25, %cst_6 : f32
    %27 = math.floor %26 : f32
    %28 = arith.fptosi %27 : f32 to i32
    %29 = arith.subi %24, %16 : i32
    %c1_i32_7 = arith.constant 1 : i32
    %30 = arith.addi %29, %c1_i32_7 : i32
    %c1_i32_8 = arith.constant 1 : i32
    %31 = arith.maxsi %30, %c1_i32_8 : i32
    %32 = arith.sitofp %31 : i32 to f32
    %33 = arith.subi %28, %20 : i32
    %c1_i32_9 = arith.constant 1 : i32
    %34 = arith.addi %33, %c1_i32_9 : i32
    %c1_i32_10 = arith.constant 1 : i32
    %35 = arith.maxsi %34, %c1_i32_10 : i32
    %36 = arith.sitofp %35 : i32 to f32
    %cst_11 = arith.constant 7.000000e+00 : f32
    %37 = arith.divf %36, %cst_11 : f32
    %cst_12 = arith.constant 7.000000e+00 : f32
    %38 = arith.divf %32, %cst_12 : f32
    %c0 = arith.constant 0 : index
    %c0_13 = arith.constant 0 : index
    %c0_14 = arith.constant 0 : index
    %c0_15 = arith.constant 0 : index
    %39 = vector.load %arg3[%c0, %c0_13, %c0_14, %c0_15] : memref<1x16x16x4xf32, #tpu.memory_space<vmem>>, vector<1x16x16x4xf32>
    %40 = vector.shape_cast %39 : vector<1x16x16x4xf32> to vector<16x16x4xf32>
    %41 = tpu.iota {dimensions = array<i32: 1>} : vector<1x16x1xi32>
    %42 = tpu.iota {dimensions = array<i32: 1>} : vector<1x16x1xi32>
    %cst_16 = arith.constant 0.000000e+00 : f32
    %43 = arith.mulf %cst_16, %38 : f32
    %44 = math.floor %43 : f32
    %45 = arith.fptosi %44 : f32 to i32
    %46 = arith.addi %45, %16 : i32
    %c0_i32_17 = arith.constant 0 : i32
    %c16_i32 = arith.constant 16 : i32
    %47 = arith.maxsi %c0_i32_17, %46 : i32
    %48 = arith.minsi %c16_i32, %47 : i32
    %cst_18 = arith.constant 1.000000e+00 : f32
    %49 = arith.mulf %cst_18, %38 : f32
    %50 = math.ceil %49 : f32
    %51 = arith.fptosi %50 : f32 to i32
    %52 = arith.addi %51, %16 : i32
    %c0_i32_19 = arith.constant 0 : i32
    %c16_i32_20 = arith.constant 16 : i32
    %53 = arith.maxsi %c0_i32_19, %52 : i32
    %54 = arith.minsi %c16_i32_20, %53 : i32
    %55 = vector.broadcast %48 : i32 to vector<1x16x1xi32>
    %56 = arith.cmpi sge, %41, %55 : vector<1x16x1xi32>
    %57 = vector.broadcast %54 : i32 to vector<1x16x1xi32>
    %58 = arith.cmpi slt, %41, %57 : vector<1x16x1xi32>
    %59 = arith.andi %56, %58 : vector<1x16x1xi1>
    %cst_21 = arith.constant 0xFF800000 : f32
    %60 = vector.shape_cast %59 : vector<1x16x1xi1> to vector<1x16x1xi1>
    %61 = vector.broadcast %60 : vector<1x16x1xi1> to vector<16x16x4xi1>
    %62 = vector.broadcast %cst_21 : f32 to vector<16x16x4xf32>
    %63 = arith.select %61, %40, %62 : vector<16x16x4xi1>, vector<16x16x4xf32>
    %cst_22 = arith.constant dense<0xFF800000> : vector<16x4xf32>
    %64 = vector.multi_reduction <maximumf>, %63, %cst_22 [1] : vector<16x16x4xf32> to vector<16x4xf32>
    %65 = arith.cmpi sle, %54, %48 : i32
    %cst_23 = arith.constant 0.000000e+00 : f32
    %66 = vector.broadcast %cst_23 : f32 to vector<16x4xf32>
    %67 = arith.select %65, %66, %64 : vector<16x4xf32>
    %cst_24 = arith.constant 1.000000e+00 : f32
    %68 = arith.mulf %cst_24, %38 : f32
    %69 = math.floor %68 : f32
    %70 = arith.fptosi %69 : f32 to i32
    %71 = arith.addi %70, %16 : i32
    %c0_i32_25 = arith.constant 0 : i32
    %c16_i32_26 = arith.constant 16 : i32
    %72 = arith.maxsi %c0_i32_25, %71 : i32
    %73 = arith.minsi %c16_i32_26, %72 : i32
    %cst_27 = arith.constant 2.000000e+00 : f32
    %74 = arith.mulf %cst_27, %38 : f32
    %75 = math.ceil %74 : f32
    %76 = arith.fptosi %75 : f32 to i32
    %77 = arith.addi %76, %16 : i32
    %c0_i32_28 = arith.constant 0 : i32
    %c16_i32_29 = arith.constant 16 : i32
    %78 = arith.maxsi %c0_i32_28, %77 : i32
    %79 = arith.minsi %c16_i32_29, %78 : i32
    %80 = vector.broadcast %73 : i32 to vector<1x16x1xi32>
    %81 = arith.cmpi sge, %41, %80 : vector<1x16x1xi32>
    %82 = vector.broadcast %79 : i32 to vector<1x16x1xi32>
    %83 = arith.cmpi slt, %41, %82 : vector<1x16x1xi32>
    %84 = arith.andi %81, %83 : vector<1x16x1xi1>
    %cst_30 = arith.constant 0xFF800000 : f32
    %85 = vector.shape_cast %84 : vector<1x16x1xi1> to vector<1x16x1xi1>
    %86 = vector.broadcast %85 : vector<1x16x1xi1> to vector<16x16x4xi1>
    %87 = vector.broadcast %cst_30 : f32 to vector<16x16x4xf32>
    %88 = arith.select %86, %40, %87 : vector<16x16x4xi1>, vector<16x16x4xf32>
    %cst_31 = arith.constant dense<0xFF800000> : vector<16x4xf32>
    %89 = vector.multi_reduction <maximumf>, %88, %cst_31 [1] : vector<16x16x4xf32> to vector<16x4xf32>
    %90 = arith.cmpi sle, %79, %73 : i32
    %cst_32 = arith.constant 0.000000e+00 : f32
    %91 = vector.broadcast %cst_32 : f32 to vector<16x4xf32>
    %92 = arith.select %90, %91, %89 : vector<16x4xf32>
    %cst_33 = arith.constant 2.000000e+00 : f32
    %93 = arith.mulf %cst_33, %38 : f32
    %94 = math.floor %93 : f32
    %95 = arith.fptosi %94 : f32 to i32
    %96 = arith.addi %95, %16 : i32
    %c0_i32_34 = arith.constant 0 : i32
    %c16_i32_35 = arith.constant 16 : i32
    %97 = arith.maxsi %c0_i32_34, %96 : i32
    %98 = arith.minsi %c16_i32_35, %97 : i32
    %cst_36 = arith.constant 3.000000e+00 : f32
    %99 = arith.mulf %cst_36, %38 : f32
    %100 = math.ceil %99 : f32
    %101 = arith.fptosi %100 : f32 to i32
    %102 = arith.addi %101, %16 : i32
    %c0_i32_37 = arith.constant 0 : i32
    %c16_i32_38 = arith.constant 16 : i32
    %103 = arith.maxsi %c0_i32_37, %102 : i32
    %104 = arith.minsi %c16_i32_38, %103 : i32
    %105 = vector.broadcast %98 : i32 to vector<1x16x1xi32>
    %106 = arith.cmpi sge, %41, %105 : vector<1x16x1xi32>
    %107 = vector.broadcast %104 : i32 to vector<1x16x1xi32>
    %108 = arith.cmpi slt, %41, %107 : vector<1x16x1xi32>
    %109 = arith.andi %106, %108 : vector<1x16x1xi1>
    %cst_39 = arith.constant 0xFF800000 : f32
    %110 = vector.shape_cast %109 : vector<1x16x1xi1> to vector<1x16x1xi1>
    %111 = vector.broadcast %110 : vector<1x16x1xi1> to vector<16x16x4xi1>
    %112 = vector.broadcast %cst_39 : f32 to vector<16x16x4xf32>
    %113 = arith.select %111, %40, %112 : vector<16x16x4xi1>, vector<16x16x4xf32>
    %cst_40 = arith.constant dense<0xFF800000> : vector<16x4xf32>
    %114 = vector.multi_reduction <maximumf>, %113, %cst_40 [1] : vector<16x16x4xf32> to vector<16x4xf32>
    %115 = arith.cmpi sle, %104, %98 : i32
    %cst_41 = arith.constant 0.000000e+00 : f32
    %116 = vector.broadcast %cst_41 : f32 to vector<16x4xf32>
    %117 = arith.select %115, %116, %114 : vector<16x4xf32>
    %cst_42 = arith.constant 3.000000e+00 : f32
    %118 = arith.mulf %cst_42, %38 : f32
    %119 = math.floor %118 : f32
    %120 = arith.fptosi %119 : f32 to i32
    %121 = arith.addi %120, %16 : i32
    %c0_i32_43 = arith.constant 0 : i32
    %c16_i32_44 = arith.constant 16 : i32
    %122 = arith.maxsi %c0_i32_43, %121 : i32
    %123 = arith.minsi %c16_i32_44, %122 : i32
    %cst_45 = arith.constant 4.000000e+00 : f32
    %124 = arith.mulf %cst_45, %38 : f32
    %125 = math.ceil %124 : f32
    %126 = arith.fptosi %125 : f32 to i32
    %127 = arith.addi %126, %16 : i32
    %c0_i32_46 = arith.constant 0 : i32
    %c16_i32_47 = arith.constant 16 : i32
    %128 = arith.maxsi %c0_i32_46, %127 : i32
    %129 = arith.minsi %c16_i32_47, %128 : i32
    %130 = vector.broadcast %123 : i32 to vector<1x16x1xi32>
    %131 = arith.cmpi sge, %41, %130 : vector<1x16x1xi32>
    %132 = vector.broadcast %129 : i32 to vector<1x16x1xi32>
    %133 = arith.cmpi slt, %41, %132 : vector<1x16x1xi32>
    %134 = arith.andi %131, %133 : vector<1x16x1xi1>
    %cst_48 = arith.constant 0xFF800000 : f32
    %135 = vector.shape_cast %134 : vector<1x16x1xi1> to vector<1x16x1xi1>
    %136 = vector.broadcast %135 : vector<1x16x1xi1> to vector<16x16x4xi1>
    %137 = vector.broadcast %cst_48 : f32 to vector<16x16x4xf32>
    %138 = arith.select %136, %40, %137 : vector<16x16x4xi1>, vector<16x16x4xf32>
    %cst_49 = arith.constant dense<0xFF800000> : vector<16x4xf32>
    %139 = vector.multi_reduction <maximumf>, %138, %cst_49 [1] : vector<16x16x4xf32> to vector<16x4xf32>
    %140 = arith.cmpi sle, %129, %123 : i32
    %cst_50 = arith.constant 0.000000e+00 : f32
    %141 = vector.broadcast %cst_50 : f32 to vector<16x4xf32>
    %142 = arith.select %140, %141, %139 : vector<16x4xf32>
    %cst_51 = arith.constant 4.000000e+00 : f32
    %143 = arith.mulf %cst_51, %38 : f32
    %144 = math.floor %143 : f32
    %145 = arith.fptosi %144 : f32 to i32
    %146 = arith.addi %145, %16 : i32
    %c0_i32_52 = arith.constant 0 : i32
    %c16_i32_53 = arith.constant 16 : i32
    %147 = arith.maxsi %c0_i32_52, %146 : i32
    %148 = arith.minsi %c16_i32_53, %147 : i32
    %cst_54 = arith.constant 5.000000e+00 : f32
    %149 = arith.mulf %cst_54, %38 : f32
    %150 = math.ceil %149 : f32
    %151 = arith.fptosi %150 : f32 to i32
    %152 = arith.addi %151, %16 : i32
    %c0_i32_55 = arith.constant 0 : i32
    %c16_i32_56 = arith.constant 16 : i32
    %153 = arith.maxsi %c0_i32_55, %152 : i32
    %154 = arith.minsi %c16_i32_56, %153 : i32
    %155 = vector.broadcast %148 : i32 to vector<1x16x1xi32>
    %156 = arith.cmpi sge, %41, %155 : vector<1x16x1xi32>
    %157 = vector.broadcast %154 : i32 to vector<1x16x1xi32>
    %158 = arith.cmpi slt, %41, %157 : vector<1x16x1xi32>
    %159 = arith.andi %156, %158 : vector<1x16x1xi1>
    %cst_57 = arith.constant 0xFF800000 : f32
    %160 = vector.shape_cast %159 : vector<1x16x1xi1> to vector<1x16x1xi1>
    %161 = vector.broadcast %160 : vector<1x16x1xi1> to vector<16x16x4xi1>
    %162 = vector.broadcast %cst_57 : f32 to vector<16x16x4xf32>
    %163 = arith.select %161, %40, %162 : vector<16x16x4xi1>, vector<16x16x4xf32>
    %cst_58 = arith.constant dense<0xFF800000> : vector<16x4xf32>
    %164 = vector.multi_reduction <maximumf>, %163, %cst_58 [1] : vector<16x16x4xf32> to vector<16x4xf32>
    %165 = arith.cmpi sle, %154, %148 : i32
    %cst_59 = arith.constant 0.000000e+00 : f32
    %166 = vector.broadcast %cst_59 : f32 to vector<16x4xf32>
    %167 = arith.select %165, %166, %164 : vector<16x4xf32>
    %cst_60 = arith.constant 5.000000e+00 : f32
    %168 = arith.mulf %cst_60, %38 : f32
    %169 = math.floor %168 : f32
    %170 = arith.fptosi %169 : f32 to i32
    %171 = arith.addi %170, %16 : i32
    %c0_i32_61 = arith.constant 0 : i32
    %c16_i32_62 = arith.constant 16 : i32
    %172 = arith.maxsi %c0_i32_61, %171 : i32
    %173 = arith.minsi %c16_i32_62, %172 : i32
    %cst_63 = arith.constant 6.000000e+00 : f32
    %174 = arith.mulf %cst_63, %38 : f32
    %175 = math.ceil %174 : f32
    %176 = arith.fptosi %175 : f32 to i32
    %177 = arith.addi %176, %16 : i32
    %c0_i32_64 = arith.constant 0 : i32
    %c16_i32_65 = arith.constant 16 : i32
    %178 = arith.maxsi %c0_i32_64, %177 : i32
    %179 = arith.minsi %c16_i32_65, %178 : i32
    %180 = vector.broadcast %173 : i32 to vector<1x16x1xi32>
    %181 = arith.cmpi sge, %41, %180 : vector<1x16x1xi32>
    %182 = vector.broadcast %179 : i32 to vector<1x16x1xi32>
    %183 = arith.cmpi slt, %41, %182 : vector<1x16x1xi32>
    %184 = arith.andi %181, %183 : vector<1x16x1xi1>
    %cst_66 = arith.constant 0xFF800000 : f32
    %185 = vector.shape_cast %184 : vector<1x16x1xi1> to vector<1x16x1xi1>
    %186 = vector.broadcast %185 : vector<1x16x1xi1> to vector<16x16x4xi1>
    %187 = vector.broadcast %cst_66 : f32 to vector<16x16x4xf32>
    %188 = arith.select %186, %40, %187 : vector<16x16x4xi1>, vector<16x16x4xf32>
    %cst_67 = arith.constant dense<0xFF800000> : vector<16x4xf32>
    %189 = vector.multi_reduction <maximumf>, %188, %cst_67 [1] : vector<16x16x4xf32> to vector<16x4xf32>
    %190 = arith.cmpi sle, %179, %173 : i32
    %cst_68 = arith.constant 0.000000e+00 : f32
    %191 = vector.broadcast %cst_68 : f32 to vector<16x4xf32>
    %192 = arith.select %190, %191, %189 : vector<16x4xf32>
    %cst_69 = arith.constant 6.000000e+00 : f32
    %193 = arith.mulf %cst_69, %38 : f32
    %194 = math.floor %193 : f32
    %195 = arith.fptosi %194 : f32 to i32
    %196 = arith.addi %195, %16 : i32
    %c0_i32_70 = arith.constant 0 : i32
    %c16_i32_71 = arith.constant 16 : i32
    %197 = arith.maxsi %c0_i32_70, %196 : i32
    %198 = arith.minsi %c16_i32_71, %197 : i32
    %cst_72 = arith.constant 7.000000e+00 : f32
    %199 = arith.mulf %cst_72, %38 : f32
    %200 = math.ceil %199 : f32
    %201 = arith.fptosi %200 : f32 to i32
    %202 = arith.addi %201, %16 : i32
    %c0_i32_73 = arith.constant 0 : i32
    %c16_i32_74 = arith.constant 16 : i32
    %203 = arith.maxsi %c0_i32_73, %202 : i32
    %204 = arith.minsi %c16_i32_74, %203 : i32
    %205 = vector.broadcast %198 : i32 to vector<1x16x1xi32>
    %206 = arith.cmpi sge, %41, %205 : vector<1x16x1xi32>
    %207 = vector.broadcast %204 : i32 to vector<1x16x1xi32>
    %208 = arith.cmpi slt, %41, %207 : vector<1x16x1xi32>
    %209 = arith.andi %206, %208 : vector<1x16x1xi1>
    %cst_75 = arith.constant 0xFF800000 : f32
    %210 = vector.shape_cast %209 : vector<1x16x1xi1> to vector<1x16x1xi1>
    %211 = vector.broadcast %210 : vector<1x16x1xi1> to vector<16x16x4xi1>
    %212 = vector.broadcast %cst_75 : f32 to vector<16x16x4xf32>
    %213 = arith.select %211, %40, %212 : vector<16x16x4xi1>, vector<16x16x4xf32>
    %cst_76 = arith.constant dense<0xFF800000> : vector<16x4xf32>
    %214 = vector.multi_reduction <maximumf>, %213, %cst_76 [1] : vector<16x16x4xf32> to vector<16x4xf32>
    %215 = arith.cmpi sle, %204, %198 : i32
    %cst_77 = arith.constant 0.000000e+00 : f32
    %216 = vector.broadcast %cst_77 : f32 to vector<16x4xf32>
    %217 = arith.select %215, %216, %214 : vector<16x4xf32>
    %218 = vector.shape_cast %67 : vector<16x4xf32> to vector<1x16x4xf32>
    %219 = vector.shape_cast %92 : vector<16x4xf32> to vector<1x16x4xf32>
    %220 = vector.shape_cast %117 : vector<16x4xf32> to vector<1x16x4xf32>
    %221 = vector.shape_cast %142 : vector<16x4xf32> to vector<1x16x4xf32>
    %222 = vector.shape_cast %167 : vector<16x4xf32> to vector<1x16x4xf32>
    %223 = vector.shape_cast %192 : vector<16x4xf32> to vector<1x16x4xf32>
    %224 = vector.shape_cast %217 : vector<16x4xf32> to vector<1x16x4xf32>
    %225 = tpu.concatenate %218, %219, %220, %221, %222, %223, %224 in 0 : vector<1x16x4xf32>, vector<1x16x4xf32>, vector<1x16x4xf32>, vector<1x16x4xf32>, vector<1x16x4xf32>, vector<1x16x4xf32>, vector<1x16x4xf32> -> vector<7x16x4xf32>
    %cst_78 = arith.constant 0.000000e+00 : f32
    %226 = arith.mulf %cst_78, %37 : f32
    %227 = math.floor %226 : f32
    %228 = arith.fptosi %227 : f32 to i32
    %229 = arith.addi %228, %20 : i32
    %c0_i32_79 = arith.constant 0 : i32
    %c16_i32_80 = arith.constant 16 : i32
    %230 = arith.maxsi %c0_i32_79, %229 : i32
    %231 = arith.minsi %c16_i32_80, %230 : i32
    %cst_81 = arith.constant 1.000000e+00 : f32
    %232 = arith.mulf %cst_81, %37 : f32
    %233 = math.ceil %232 : f32
    %234 = arith.fptosi %233 : f32 to i32
    %235 = arith.addi %234, %20 : i32
    %c0_i32_82 = arith.constant 0 : i32
    %c16_i32_83 = arith.constant 16 : i32
    %236 = arith.maxsi %c0_i32_82, %235 : i32
    %237 = arith.minsi %c16_i32_83, %236 : i32
    %238 = vector.broadcast %231 : i32 to vector<1x16x1xi32>
    %239 = arith.cmpi sge, %42, %238 : vector<1x16x1xi32>
    %240 = vector.broadcast %237 : i32 to vector<1x16x1xi32>
    %241 = arith.cmpi slt, %42, %240 : vector<1x16x1xi32>
    %242 = arith.andi %239, %241 : vector<1x16x1xi1>
    %cst_84 = arith.constant 0xFF800000 : f32
    %243 = vector.shape_cast %242 : vector<1x16x1xi1> to vector<1x16x1xi1>
    %244 = vector.broadcast %243 : vector<1x16x1xi1> to vector<7x16x4xi1>
    %245 = vector.broadcast %cst_84 : f32 to vector<7x16x4xf32>
    %246 = arith.select %244, %225, %245 : vector<7x16x4xi1>, vector<7x16x4xf32>
    %cst_85 = arith.constant dense<0xFF800000> : vector<7x4xf32>
    %247 = vector.multi_reduction <maximumf>, %246, %cst_85 [1] : vector<7x16x4xf32> to vector<7x4xf32>
    %248 = arith.cmpi sle, %237, %231 : i32
    %cst_86 = arith.constant 0.000000e+00 : f32
    %249 = vector.broadcast %cst_86 : f32 to vector<7x4xf32>
    %250 = arith.select %248, %249, %247 : vector<7x4xf32>
    %cst_87 = arith.constant 1.000000e+00 : f32
    %251 = arith.mulf %cst_87, %37 : f32
    %252 = math.floor %251 : f32
    %253 = arith.fptosi %252 : f32 to i32
    %254 = arith.addi %253, %20 : i32
    %c0_i32_88 = arith.constant 0 : i32
    %c16_i32_89 = arith.constant 16 : i32
    %255 = arith.maxsi %c0_i32_88, %254 : i32
    %256 = arith.minsi %c16_i32_89, %255 : i32
    %cst_90 = arith.constant 2.000000e+00 : f32
    %257 = arith.mulf %cst_90, %37 : f32
    %258 = math.ceil %257 : f32
    %259 = arith.fptosi %258 : f32 to i32
    %260 = arith.addi %259, %20 : i32
    %c0_i32_91 = arith.constant 0 : i32
    %c16_i32_92 = arith.constant 16 : i32
    %261 = arith.maxsi %c0_i32_91, %260 : i32
    %262 = arith.minsi %c16_i32_92, %261 : i32
    %263 = vector.broadcast %256 : i32 to vector<1x16x1xi32>
    %264 = arith.cmpi sge, %42, %263 : vector<1x16x1xi32>
    %265 = vector.broadcast %262 : i32 to vector<1x16x1xi32>
    %266 = arith.cmpi slt, %42, %265 : vector<1x16x1xi32>
    %267 = arith.andi %264, %266 : vector<1x16x1xi1>
    %cst_93 = arith.constant 0xFF800000 : f32
    %268 = vector.shape_cast %267 : vector<1x16x1xi1> to vector<1x16x1xi1>
    %269 = vector.broadcast %268 : vector<1x16x1xi1> to vector<7x16x4xi1>
    %270 = vector.broadcast %cst_93 : f32 to vector<7x16x4xf32>
    %271 = arith.select %269, %225, %270 : vector<7x16x4xi1>, vector<7x16x4xf32>
    %cst_94 = arith.constant dense<0xFF800000> : vector<7x4xf32>
    %272 = vector.multi_reduction <maximumf>, %271, %cst_94 [1] : vector<7x16x4xf32> to vector<7x4xf32>
    %273 = arith.cmpi sle, %262, %256 : i32
    %cst_95 = arith.constant 0.000000e+00 : f32
    %274 = vector.broadcast %cst_95 : f32 to vector<7x4xf32>
    %275 = arith.select %273, %274, %272 : vector<7x4xf32>
    %cst_96 = arith.constant 2.000000e+00 : f32
    %276 = arith.mulf %cst_96, %37 : f32
    %277 = math.floor %276 : f32
    %278 = arith.fptosi %277 : f32 to i32
    %279 = arith.addi %278, %20 : i32
    %c0_i32_97 = arith.constant 0 : i32
    %c16_i32_98 = arith.constant 16 : i32
    %280 = arith.maxsi %c0_i32_97, %279 : i32
    %281 = arith.minsi %c16_i32_98, %280 : i32
    %cst_99 = arith.constant 3.000000e+00 : f32
    %282 = arith.mulf %cst_99, %37 : f32
    %283 = math.ceil %282 : f32
    %284 = arith.fptosi %283 : f32 to i32
    %285 = arith.addi %284, %20 : i32
    %c0_i32_100 = arith.constant 0 : i32
    %c16_i32_101 = arith.constant 16 : i32
    %286 = arith.maxsi %c0_i32_100, %285 : i32
    %287 = arith.minsi %c16_i32_101, %286 : i32
    %288 = vector.broadcast %281 : i32 to vector<1x16x1xi32>
    %289 = arith.cmpi sge, %42, %288 : vector<1x16x1xi32>
    %290 = vector.broadcast %287 : i32 to vector<1x16x1xi32>
    %291 = arith.cmpi slt, %42, %290 : vector<1x16x1xi32>
    %292 = arith.andi %289, %291 : vector<1x16x1xi1>
    %cst_102 = arith.constant 0xFF800000 : f32
    %293 = vector.shape_cast %292 : vector<1x16x1xi1> to vector<1x16x1xi1>
    %294 = vector.broadcast %293 : vector<1x16x1xi1> to vector<7x16x4xi1>
    %295 = vector.broadcast %cst_102 : f32 to vector<7x16x4xf32>
    %296 = arith.select %294, %225, %295 : vector<7x16x4xi1>, vector<7x16x4xf32>
    %cst_103 = arith.constant dense<0xFF800000> : vector<7x4xf32>
    %297 = vector.multi_reduction <maximumf>, %296, %cst_103 [1] : vector<7x16x4xf32> to vector<7x4xf32>
    %298 = arith.cmpi sle, %287, %281 : i32
    %cst_104 = arith.constant 0.000000e+00 : f32
    %299 = vector.broadcast %cst_104 : f32 to vector<7x4xf32>
    %300 = arith.select %298, %299, %297 : vector<7x4xf32>
    %cst_105 = arith.constant 3.000000e+00 : f32
    %301 = arith.mulf %cst_105, %37 : f32
    %302 = math.floor %301 : f32
    %303 = arith.fptosi %302 : f32 to i32
    %304 = arith.addi %303, %20 : i32
    %c0_i32_106 = arith.constant 0 : i32
    %c16_i32_107 = arith.constant 16 : i32
    %305 = arith.maxsi %c0_i32_106, %304 : i32
    %306 = arith.minsi %c16_i32_107, %305 : i32
    %cst_108 = arith.constant 4.000000e+00 : f32
    %307 = arith.mulf %cst_108, %37 : f32
    %308 = math.ceil %307 : f32
    %309 = arith.fptosi %308 : f32 to i32
    %310 = arith.addi %309, %20 : i32
    %c0_i32_109 = arith.constant 0 : i32
    %c16_i32_110 = arith.constant 16 : i32
    %311 = arith.maxsi %c0_i32_109, %310 : i32
    %312 = arith.minsi %c16_i32_110, %311 : i32
    %313 = vector.broadcast %306 : i32 to vector<1x16x1xi32>
    %314 = arith.cmpi sge, %42, %313 : vector<1x16x1xi32>
    %315 = vector.broadcast %312 : i32 to vector<1x16x1xi32>
    %316 = arith.cmpi slt, %42, %315 : vector<1x16x1xi32>
    %317 = arith.andi %314, %316 : vector<1x16x1xi1>
    %cst_111 = arith.constant 0xFF800000 : f32
    %318 = vector.shape_cast %317 : vector<1x16x1xi1> to vector<1x16x1xi1>
    %319 = vector.broadcast %318 : vector<1x16x1xi1> to vector<7x16x4xi1>
    %320 = vector.broadcast %cst_111 : f32 to vector<7x16x4xf32>
    %321 = arith.select %319, %225, %320 : vector<7x16x4xi1>, vector<7x16x4xf32>
    %cst_112 = arith.constant dense<0xFF800000> : vector<7x4xf32>
    %322 = vector.multi_reduction <maximumf>, %321, %cst_112 [1] : vector<7x16x4xf32> to vector<7x4xf32>
    %323 = arith.cmpi sle, %312, %306 : i32
    %cst_113 = arith.constant 0.000000e+00 : f32
    %324 = vector.broadcast %cst_113 : f32 to vector<7x4xf32>
    %325 = arith.select %323, %324, %322 : vector<7x4xf32>
    %cst_114 = arith.constant 4.000000e+00 : f32
    %326 = arith.mulf %cst_114, %37 : f32
    %327 = math.floor %326 : f32
    %328 = arith.fptosi %327 : f32 to i32
    %329 = arith.addi %328, %20 : i32
    %c0_i32_115 = arith.constant 0 : i32
    %c16_i32_116 = arith.constant 16 : i32
    %330 = arith.maxsi %c0_i32_115, %329 : i32
    %331 = arith.minsi %c16_i32_116, %330 : i32
    %cst_117 = arith.constant 5.000000e+00 : f32
    %332 = arith.mulf %cst_117, %37 : f32
    %333 = math.ceil %332 : f32
    %334 = arith.fptosi %333 : f32 to i32
    %335 = arith.addi %334, %20 : i32
    %c0_i32_118 = arith.constant 0 : i32
    %c16_i32_119 = arith.constant 16 : i32
    %336 = arith.maxsi %c0_i32_118, %335 : i32
    %337 = arith.minsi %c16_i32_119, %336 : i32
    %338 = vector.broadcast %331 : i32 to vector<1x16x1xi32>
    %339 = arith.cmpi sge, %42, %338 : vector<1x16x1xi32>
    %340 = vector.broadcast %337 : i32 to vector<1x16x1xi32>
    %341 = arith.cmpi slt, %42, %340 : vector<1x16x1xi32>
    %342 = arith.andi %339, %341 : vector<1x16x1xi1>
    %cst_120 = arith.constant 0xFF800000 : f32
    %343 = vector.shape_cast %342 : vector<1x16x1xi1> to vector<1x16x1xi1>
    %344 = vector.broadcast %343 : vector<1x16x1xi1> to vector<7x16x4xi1>
    %345 = vector.broadcast %cst_120 : f32 to vector<7x16x4xf32>
    %346 = arith.select %344, %225, %345 : vector<7x16x4xi1>, vector<7x16x4xf32>
    %cst_121 = arith.constant dense<0xFF800000> : vector<7x4xf32>
    %347 = vector.multi_reduction <maximumf>, %346, %cst_121 [1] : vector<7x16x4xf32> to vector<7x4xf32>
    %348 = arith.cmpi sle, %337, %331 : i32
    %cst_122 = arith.constant 0.000000e+00 : f32
    %349 = vector.broadcast %cst_122 : f32 to vector<7x4xf32>
    %350 = arith.select %348, %349, %347 : vector<7x4xf32>
    %cst_123 = arith.constant 5.000000e+00 : f32
    %351 = arith.mulf %cst_123, %37 : f32
    %352 = math.floor %351 : f32
    %353 = arith.fptosi %352 : f32 to i32
    %354 = arith.addi %353, %20 : i32
    %c0_i32_124 = arith.constant 0 : i32
    %c16_i32_125 = arith.constant 16 : i32
    %355 = arith.maxsi %c0_i32_124, %354 : i32
    %356 = arith.minsi %c16_i32_125, %355 : i32
    %cst_126 = arith.constant 6.000000e+00 : f32
    %357 = arith.mulf %cst_126, %37 : f32
    %358 = math.ceil %357 : f32
    %359 = arith.fptosi %358 : f32 to i32
    %360 = arith.addi %359, %20 : i32
    %c0_i32_127 = arith.constant 0 : i32
    %c16_i32_128 = arith.constant 16 : i32
    %361 = arith.maxsi %c0_i32_127, %360 : i32
    %362 = arith.minsi %c16_i32_128, %361 : i32
    %363 = vector.broadcast %356 : i32 to vector<1x16x1xi32>
    %364 = arith.cmpi sge, %42, %363 : vector<1x16x1xi32>
    %365 = vector.broadcast %362 : i32 to vector<1x16x1xi32>
    %366 = arith.cmpi slt, %42, %365 : vector<1x16x1xi32>
    %367 = arith.andi %364, %366 : vector<1x16x1xi1>
    %cst_129 = arith.constant 0xFF800000 : f32
    %368 = vector.shape_cast %367 : vector<1x16x1xi1> to vector<1x16x1xi1>
    %369 = vector.broadcast %368 : vector<1x16x1xi1> to vector<7x16x4xi1>
    %370 = vector.broadcast %cst_129 : f32 to vector<7x16x4xf32>
    %371 = arith.select %369, %225, %370 : vector<7x16x4xi1>, vector<7x16x4xf32>
    %cst_130 = arith.constant dense<0xFF800000> : vector<7x4xf32>
    %372 = vector.multi_reduction <maximumf>, %371, %cst_130 [1] : vector<7x16x4xf32> to vector<7x4xf32>
    %373 = arith.cmpi sle, %362, %356 : i32
    %cst_131 = arith.constant 0.000000e+00 : f32
    %374 = vector.broadcast %cst_131 : f32 to vector<7x4xf32>
    %375 = arith.select %373, %374, %372 : vector<7x4xf32>
    %cst_132 = arith.constant 6.000000e+00 : f32
    %376 = arith.mulf %cst_132, %37 : f32
    %377 = math.floor %376 : f32
    %378 = arith.fptosi %377 : f32 to i32
    %379 = arith.addi %378, %20 : i32
    %c0_i32_133 = arith.constant 0 : i32
    %c16_i32_134 = arith.constant 16 : i32
    %380 = arith.maxsi %c0_i32_133, %379 : i32
    %381 = arith.minsi %c16_i32_134, %380 : i32
    %cst_135 = arith.constant 7.000000e+00 : f32
    %382 = arith.mulf %cst_135, %37 : f32
    %383 = math.ceil %382 : f32
    %384 = arith.fptosi %383 : f32 to i32
    %385 = arith.addi %384, %20 : i32
    %c0_i32_136 = arith.constant 0 : i32
    %c16_i32_137 = arith.constant 16 : i32
    %386 = arith.maxsi %c0_i32_136, %385 : i32
    %387 = arith.minsi %c16_i32_137, %386 : i32
    %388 = vector.broadcast %381 : i32 to vector<1x16x1xi32>
    %389 = arith.cmpi sge, %42, %388 : vector<1x16x1xi32>
    %390 = vector.broadcast %387 : i32 to vector<1x16x1xi32>
    %391 = arith.cmpi slt, %42, %390 : vector<1x16x1xi32>
    %392 = arith.andi %389, %391 : vector<1x16x1xi1>
    %cst_138 = arith.constant 0xFF800000 : f32
    %393 = vector.shape_cast %392 : vector<1x16x1xi1> to vector<1x16x1xi1>
    %394 = vector.broadcast %393 : vector<1x16x1xi1> to vector<7x16x4xi1>
    %395 = vector.broadcast %cst_138 : f32 to vector<7x16x4xf32>
    %396 = arith.select %394, %225, %395 : vector<7x16x4xi1>, vector<7x16x4xf32>
    %cst_139 = arith.constant dense<0xFF800000> : vector<7x4xf32>
    %397 = vector.multi_reduction <maximumf>, %396, %cst_139 [1] : vector<7x16x4xf32> to vector<7x4xf32>
    %398 = arith.cmpi sle, %387, %381 : i32
    %cst_140 = arith.constant 0.000000e+00 : f32
    %399 = vector.broadcast %cst_140 : f32 to vector<7x4xf32>
    %400 = arith.select %398, %399, %397 : vector<7x4xf32>
    %401 = tpu.concatenate %250, %275, %300, %325, %350, %375, %400 in 0 : vector<7x4xf32>, vector<7x4xf32>, vector<7x4xf32>, vector<7x4xf32>, vector<7x4xf32>, vector<7x4xf32>, vector<7x4xf32> -> vector<49x4xf32>
    %402 = vector.shape_cast %401 : vector<49x4xf32> to vector<1x49x4xf32>
    %c0_141 = arith.constant 0 : index
    %c0_142 = arith.constant 0 : index
    %c0_143 = arith.constant 0 : index
    %403 = vector.load %arg4[%c0_141, %c0_142, %c0_143] : memref<1x49x4xf32, #tpu.memory_space<vmem>>, vector<1x49x4xf32>
    tpu.vector_store %arg4[%c0_141, %c0_142, %c0_143], %402 {strides = array<i32>} : memref<1x49x4xf32, #tpu.memory_space<vmem>>, vector<1x49x4xf32>,
    return
  }
  func.func @transform_0(%arg0: i32, %arg1: memref<8xi32, #tpu.memory_space<smem>>, %arg2: memref<32xf32, #tpu.memory_space<smem>>) -> (i32, i32, i32, i32) {
    %0 = arith.index_cast %arg0 : i32 to index
    %1 = memref.load %arg1[%0] : memref<8xi32, #tpu.memory_space<smem>>
    %c0_i32 = arith.constant 0 : i32
    %c0_i32_0 = arith.constant 0 : i32
    %c0_i32_1 = arith.constant 0 : i32
    %c0_i32_2 = arith.constant 0 : i32
    return %1, %c0_i32, %c0_i32_0, %c0_i32_1 : i32, i32, i32, i32
  }
  func.func @transform_1(%arg0: i32, %arg1: memref<8xi32, #tpu.memory_space<smem>>, %arg2: memref<32xf32, #tpu.memory_space<smem>>) -> (i32, i32, i32) {
    %c0_i32 = arith.constant 0 : i32
    %c0_i32_0 = arith.constant 0 : i32
    %c0_i32_1 = arith.constant 0 : i32
    return %arg0, %c0_i32, %c0_i32_0 : i32, i32, i32
  }
}

</mosaic_0001>

<bundles_post_ra>
// kernel: tpu_custom_call.1
= control target key start
LH: loop header
LB: loop body
LE: loop exit
PB: predicated region body
PF: predicated region fallthrough
CT: control target
= control target key end

     0   :  { %s3481_s18 = smov [#allocation3]   ;;  %s3482_s19 = smov [#allocation4]   ;;  %s7803_s0 = inlined_call_operand.vmem [shape: s32[8], index: 0, kind: input, shape index: {}]   ;;  %s7804_s2 = inlined_call_operand.vmem [shape: f32[2,16,16,4], index: 2, kind: input, shape index: {}]   ;;  %s7805_s3 = inlined_call_operand.vmem [shape: f32[8,49,4], index: 3, kind: output, shape index: {}]   ;;  %s7806_s1 = inlined_call_operand.vmem [shape: f32[32], index: 1, kind: input, shape index: {}]  }
   0x1   :  { %s9_s14 = sshll.u32 %s7803_s0, 4  ;;  %s14_s17 = sshll.u32 %s7806_s1, 4  ;;  %s10_s14 = int_to_ptr.vmem [resolvable:$true] %s9_s14  ;;  %s15_s17 = int_to_ptr.vmem [resolvable:$true] %s14_s17 }
   0x2   :  { %12 = dma.vmem_to_smem %s10_s14, 16, %s3481_s18, [#allocation2] }
   0x3   :  { %17 = dma.vmem_to_smem %s15_s17, 16, %s3482_s19, [#allocation2] }
   0x4   :  { %3475 = dma.done.wait [#allocation2], 32 }
   0x5   :  { %3476 = vsyncadd [#allocation2], 4294967264 }
   0x6   :  { %20 = sfence }
   0x7   :  { %s3510_s20 = smov 0  }
   0x8 LB: > { %s3516_s0 = sadd.s32 4294967295, %s3479_s20   ;;  %p3099_p0 = scmp.ge.s32.totalorder %s3479_s20, 1  ;;  %s3479_s20 = sphi %s3510_s20, %s26_s20  }
   0x9   : > { %p106_p1 = scmp.lt.s32.totalorder %s3479_s20, 9 }
   0xb   : > { %p107_p2 = pnand %p3099_p0, %p106_p1 }
   0xd   : > { %110 = sbr.rel (%p107_p2) target bundleno = 688 (0x2b0), region = 24 }
  0x12   : > { %v3483_v0 = vmov 7.0   ;;  %s3521_s1 = sshll.u32 %s3516_s0, 2  ;;  %s127_s7 = sld [smem:[#allocation3 + %s3516_s0]]  ;;  %v223_v7 = vlaneseq  ;;  %vm285_vm7 = vcmask 31744  }
  0x13   : > { %3381 = vrcp.f32 %v3483_v0  ;;  %s143_s21 = sadd.s32 2, %s3521_s1  ;;  %s140_s22 = sld [smem:[#allocation4 + %s3521_s1]] }
  0x14   : > { %s144_s23 = sld [smem:[#allocation4 + %s143_s21]]  ;;  %v3538_v8 = vshrl.u32 %v223_v7, 7 }
  0x16   : > { %v3545_v9 = vadd.s32 8, %v3538_v8 }
  0x18   : > { %p128_p4 = scmp.lt.s32.totalorder %s127_s7, 1  ;;  %7971 = vst [vmem:[#allocation6_spill] sm:$0xff] %v3545_v9 }
  0x19   : > { %v3382_v1 = vpop.eup %3381  ;;  %s147_s24 = smul.f32 0.5, %s140_s22 }
  0x1a   : > { %v174_v2 = vmul.f32 7.0, %v3382_v1  ;;  %vm178_vm0 = vweird.f32 %v3382_v1  ;;  %s155_s25 = smul.f32 0.5, %s144_s23  ;;  %s8572_s7 = smov (!%p128_p4, %s127_s7), 1 }
  0x1b   : > { %s148_s26 = sadd.f32 0.5, %s147_s24  ;;  %s3246_s17 = sshll.u32 %s8572_s7, 8 }
  0x1c   : > { %v175_v3 = vsub.f32 1.0, %v174_v2  ;;  %s156_s27 = sadd.f32 0.5, %s155_s25  ;;  %s3552_s22 = scalar_lea.vmem %s7804_s2, %s3246_s17 }
  0x1d   : > { %s149_s28 = sfloor.f32 %s148_s26  ;;  %v3558_v12 = vld [vmem:[%s3552_s22] sm:$0xff]  ;;  %v3561_v13 = vld [vmem:[%s3552_s22 + $0x8] sm:$0xff]  ;;  %v3569_v15 = vld [vmem:[%s3552_s22 + $0x10] sm:$0xff] }
  0x1e   : > { %v176_v4 = vmul.f32 %v3382_v1, %v175_v3  ;;  %s157_s29 = sfloor.f32 %s156_s27  ;;  %s3525_s30 = scvt.f32.s32 %s149_s28  ;;  %v3572_v16 = vld [vmem:[%s3552_s22 + $0x18] sm:$0xff]  ;;  %v3579_v18 = vld [vmem:[%s3552_s22 + $0x20] sm:$0xff]  ;;  %v3582_v19 = vld [vmem:[%s3552_s22 + $0x28] sm:$0xff] }
  0x1f   : > { %s3309_s4 = scvt.f32.s32 %s157_s29  ;;  %v3597_v24 = vld [vmem:[%s3552_s22 + $0x30] sm:$0xff]  ;;  %v3600_v25 = vld [vmem:[%s3552_s22 + $0x38] sm:$0xff]  ;;  %v3609_v28 = vld [vmem:[%s3552_s22 + $0x40] sm:$0xff] }
  0x20   : > { %v177_v5 = vadd.f32 %v3382_v1, %v176_v4  ;;  %v3612_v29 = vld [vmem:[%s3552_s22 + $0x48] sm:$0xff]  ;;  %v3615_v30 = vld [vmem:[%s3552_s22 + $0x50] sm:$0xff]  ;;  %v3622_v35 = vld [vmem:[%s3552_s22 + $0x58] sm:$0xff] }
  0x21   : > { %s163_s5 = ssub.s32 %s3309_s4, %s3525_s30  ;;  %v3633_v40 = vld [vmem:[%s3552_s22 + $0x60] sm:$0xff]  ;;  %v3636_v41 = vld [vmem:[%s3552_s22 + $0x68] sm:$0xff]  ;;  %v3645_v46 = vld [vmem:[%s3552_s22 + $0x70] sm:$0xff] }
  0x22   : > { %v179_v6 = vsel %vm178_vm0, %v3382_v1, %v177_v5  ;;  %s164_s6 = sadd.s32 1, %s163_s5  ;;  %v3648_v47 = vld [vmem:[%s3552_s22 + $0x78] sm:$0xff]  ;;  %v3654_v49 = vld [vmem:[%s3552_s22 + $0x80] sm:$0xff]  ;;  %v3657_v50 = vld [vmem:[%s3552_s22 + $0x88] sm:$0xff] }
  0x23   : > { %3312 = vpush %v179_v6  ;;  %p165_p3 = scmp.gt.s32.totalorder %s164_s6, 1  ;;  %v3660_v51 = vld [vmem:[%s3552_s22 + $0x90] sm:$0xff]  ;;  %v3668_v56 = vld [vmem:[%s3552_s22 + $0x98] sm:$0xff]  ;;  %v3671_v57 = vld [vmem:[%s3552_s22 + $0xa0] sm:$0xff] }
  0x24   : > { %7976 = vst [vmem:[#allocation7_spill] sm:$0xff] %v3668_v56  ;;  %v3682_v62 = vld [vmem:[%s3552_s22 + $0xa8] sm:$0xff]  ;;  %v3685_v63 = vld [vmem:[%s3552_s22 + $0xb0] sm:$0xff]  ;;  %v3694_v4 = vld [vmem:[%s3552_s22 + $0xb8] sm:$0xff] }
  0x25   : > { %s8570_s6 = smov (!%p165_p3, %s164_s6), 1  ;;  %7977 = vst [vmem:[#allocation8_spill] sm:$0xff] %v3671_v57  ;;  %v3697_v5 = vld [vmem:[%s3552_s22 + $0xc0] sm:$0xff] }
  0x26   : > { %s167_s8 = scvt.s32.f32 %s8570_s6  ;;  %7978 = vst [vmem:[#allocation9_spill] sm:$0xff] %v3682_v62 }
  0x27   : > { %7979 = vst [vmem:[#allocation10_spill] sm:$0xff] %v3685_v63 }
  0x28   : > { %7980 = vst [vmem:[#allocation11_spill] sm:$0xff] %v3694_v4 }
  0x29   : > { %7981 = vst [vmem:[#allocation12_spill] sm:$0xff] %v3697_v5 }
  0x54   : > { %s3529_s9 = spop %3312 }
  0x55   : > { %s3532_s10 = smul.f32 %s3529_s9, %s167_s8 }
  0x57   : > { %s226_s11 = smul.f32 0.0, %s3532_s10  ;;  %s234_s12 = sceil.f32 %s3532_s10 }
  0x58   : > { %s3317_s13 = scvt.f32.s32 %s234_s12  ;;  %s457_s23 = smul.f32 2.0, %s3532_s10 }
  0x59   : > { %s227_s14 = sfloor.f32 %s226_s11  ;;  %s450_s25 = sfloor.f32 %s3532_s10 }
  0x5a   : > { %s3315_s15 = scvt.f32.s32 %s227_s14  ;;  %s236_s16 = sadd.s32 %s3317_s13, %s3525_s30 }
  0x5b   : > { %p237_p5 = scmp.gt.s32.totalorder %s236_s16, 0  ;;  %p3109_p6 = scmp.lt.s32.totalorder %s236_s16, 16 }
  0x5c   : > { %s229_s18 = sadd.s32 %s3315_s15, %s3525_s30  ;;  %s3781_s24 = sceil.f32 %s457_s23 }
  0x5d   : > { %p230_p7 = scmp.gt.s32.totalorder %s229_s18, 0  ;;  %p3104_p8 = scmp.lt.s32.totalorder %s229_s18, 16 }
  0x5e   : > { %s8574_s16 = smov (!%p237_p5, %s236_s16), 0  ;;  %s3321_s26 = scvt.f32.s32 %s3781_s24 }
  0x5f   : > { %s8576_s18 = smov (!%p230_p7, %s229_s18), 0  ;;  %s8578_s16 = smov (!%p3109_p6, %s8574_s16), 16 }
  0x60   : > { %s8580_s18 = smov (!%p3104_p8, %s8576_s18), 16  ;;  %v244_v11 = vstv %s8578_s16  ;;  %s3319_s27 = scvt.f32.s32 %s450_s25 }
  0x61   : > { %v241_v10 = vstv %s8580_s18  ;;  %vm245_vm3 = vcmp.lt.s32.totalorder %v3538_v8, %v244_v11  ;;  %vm246_vm4 = vcmp.lt.s32.totalorder %v3545_v9, %v244_v11  ;;  %s3801_s28 = sadd.s32 %s3321_s26, %s3525_s30  ;;  %p430_p11 = scmp.le.s32.totalorder %s8578_s16, %s8580_s18 }
  0x62   : > { %vm242_vm1 = vcmp.ge.s32.totalorder %v3538_v8, %v241_v10  ;;  %vm243_vm2 = vcmp.ge.s32.totalorder %v3545_v9, %v241_v10  ;;  %s3805_s29 = sadd.s32 %s3319_s27, %s3525_s30  ;;  %p461_p9 = scmp.gt.s32.totalorder %s3801_s28, 0 }
  0x63   : > { %vm3564_vm5 = vmand %vm242_vm1, %vm245_vm3  ;;  %p453_p10 = scmp.gt.s32.totalorder %s3805_s29, 0  ;;  %p3114_p12 = scmp.lt.s32.totalorder %s3805_s29, 16 }
  0x64   : > { %vm3574_vm6 = vmand %vm243_vm2, %vm246_vm4  ;;  %v253_v20 = vsel %vm3564_vm5, %v3558_v12, -inf  ;;  %v255_v22 = vsel %vm3564_vm5, %v3569_v15, -inf  ;;  %v257_v26 = vsel %vm3564_vm5, %v3579_v18, -inf  ;;  %v259_v36 = vsel %vm3564_vm5, %v3597_v24, -inf  ;;  %s462_s4 = scalar_select %p461_p9, %s3801_s28, 0 }
  0x65   : > { %v254_v21 = vsel %vm3574_vm6, %v3561_v13, -inf  ;;  %v256_v23 = vsel %vm3574_vm6, %v3572_v16, -inf  ;;  %v258_v27 = vsel %vm3574_vm6, %v3582_v19, -inf  ;;  %v286_v31 = vsel %vm285_vm7, %v253_v20, -inf  ;;  %v3709_v20 = vld [vmem:[%s3552_s22 + $0xc8] sm:$0xff]  ;;  %s454_s5 = scalar_select %p453_p10, %s3805_s29, 0 }
  0x66   : > { %v287_v32 = vsel %vm285_vm7, %v254_v21, -inf  ;;  %v295_v33 = vsel %vm285_vm7, %v255_v22, -inf  ;;  %v296_v34 = vsel %vm285_vm7, %v256_v23, -inf  ;;  %v260_v37 = vsel %vm3574_vm6, %v3600_v25, -inf  ;;  %7982 = vst [vmem:[#allocation13_spill] sm:$0xff] %v3709_v20  ;;  %v3712_v21 = vld [vmem:[%s3552_s22 + $0xd0] sm:$0xff]  ;;  %s4056_s8 = sfloor.f32 %s457_s23 }
  0x67   : > { %v304_v38 = vsel %vm285_vm7, %v257_v26, -inf  ;;  %v305_v39 = vsel %vm285_vm7, %v258_v27, -inf  ;;  %v261_v42 = vsel %vm3564_vm5, %v3609_v28, -inf  ;;  %v262_v43 = vsel %vm3574_vm6, %v3612_v29, -inf  ;;  %7983 = vst [vmem:[#allocation14_spill] sm:$0xff] %v3712_v21  ;;  %v3715_v22 = vld [vmem:[%s3552_s22 + $0xd8] sm:$0xff]  ;;  %s3323_s11 = scvt.f32.s32 %s4056_s8 }
  0x68   : > { %v288_v44 = vmax.f32 %v286_v31, %v287_v32  ;;  %v297_v45 = vmax.f32 %v295_v33, %v296_v34  ;;  %v263_v48 = vsel %vm3564_vm5, %v3615_v30, -inf  ;;  %v264_v52 = vsel %vm3574_vm6, %v3622_v35, -inf  ;;  %7984 = vst [vmem:[#allocation15_spill] sm:$0xff] %v3715_v22  ;;  %v3724_v32 = vld [vmem:[%s3552_s22 + $0xe0] sm:$0xff]  ;;  %p3119_p13 = scmp.lt.s32.totalorder %s3801_s28, 16  ;;  %s8584_s5 = smov (!%p3114_p12, %s454_s5), 16 }
  0x69   : > { %v306_v53 = vmax.f32 %v304_v38, %v305_v39  ;;  %v313_v54 = vsel %vm285_vm7, %v259_v36, -inf  ;;  %v314_v55 = vsel %vm285_vm7, %v260_v37, -inf  ;;  %v265_v58 = vsel %vm3564_vm5, %v3633_v40, -inf  ;;  %7985 = vst [vmem:[#allocation16_spill] sm:$0xff] %v3724_v32  ;;  %s3831_s6 = scalar_select %p430_p11, 1, 0 }
  0x6a   : > { %v266_v59 = vsel %vm3574_vm6, %v3636_v41, -inf  ;;  %v322_v60 = vsel %vm285_vm7, %v261_v42, -inf  ;;  %v323_v61 = vsel %vm285_vm7, %v262_v43, -inf  ;;  %v267_v0 = vsel %vm3564_vm5, %v3645_v46, -inf  ;;  %s8582_s4 = smov (!%p3119_p13, %s462_s4), 16  ;;  %s680_s7 = smul.f32 3.0, %s3532_s10 }
  0x6b   : > { %v268_v1 = vsel %vm3574_vm6, %v3648_v47, -inf  ;;  %v289_v2 = vrot.slane %v288_v44, 4  ;;  %v298_v3 = vrot.slane %v297_v45, 4  ;;  %v269_v6 = vsel %vm3564_vm5, %v3654_v49, -inf  ;;  %s4080_s14 = sadd.s32 %s3323_s11, %s3525_s30  ;;  %p653_p2 = scmp.le.s32.totalorder %s8582_s4, %s8584_s5 }
  0x6c   : > { %v270_v7 = vsel %vm3574_vm6, %v3657_v50, -inf  ;;  %v271_v10 = vsel %vm3564_vm5, %v3660_v51, -inf  ;;  %v315_v11 = vmax.f32 %v313_v54, %v314_v55  ;;  %v272_v23 = vsel %vm3574_vm6, %v3668_v56, -inf  ;;  %v3741_v54 = vld [vmem:[%s3552_s22 + $0xe8] sm:$0xff]  ;;  %v3744_v55 = vld [vmem:[%s3552_s22 + $0xf0] sm:$0xff]  ;;  %s4069_s12 = sceil.f32 %s680_s7  ;;  %p676_p0 = scmp.gt.s32.totalorder %s4080_s14, 0 }
  0x6d   : > { %v273_v26 = vsel %vm3564_vm5, %v3671_v57, -inf  ;;  %v307_v27 = vrot.slane %v306_v53, 4  ;;  %v324_v31 = vmax.f32 %v322_v60, %v323_v61  ;;  %v274_v33 = vsel %vm3574_vm6, %v3682_v62, -inf  ;;  %7986 = vst [vmem:[#allocation17_spill] sm:$0xff] %v3741_v54  ;;  %s3325_s13 = scvt.f32.s32 %s4069_s12  ;;  %p3124_p3 = scmp.lt.s32.totalorder %s4080_s14, 16 }
  0x6e   : > { %v275_v34 = vsel %vm3564_vm5, %v3685_v63, -inf  ;;  %v331_v36 = vsel %vm285_vm7, %v263_v48, -inf  ;;  %v332_v37 = vsel %vm285_vm7, %v264_v52, -inf  ;;  %v276_v38 = vsel %vm3574_vm6, %v3694_v4, -inf  ;;  %7987 = vst [vmem:[#allocation18_spill] sm:$0xff] %v3744_v55  ;;  %s677_s16 = scalar_select %p676_p0, %s4080_s14, 0 }
  0x6f   : > { %v277_v39 = vsel %vm3564_vm5, %v3697_v5, -inf  ;;  %v290_v42 = vmax.f32 %v288_v44, %v289_v2  ;;  %v299_v43 = vmax.f32 %v297_v45, %v298_v3  ;;  %v278_v48 = vsel %vm3574_vm6, %v3709_v20, -inf  ;;  %v3756_v44 = vld [vmem:[%s3552_s22 + $0xf8] sm:$0xff]  ;;  %s4089_s15 = sadd.s32 %s3325_s13, %s3525_s30  ;;  %s903_s19 = smul.f32 4.0, %s3532_s10 }
  0x70   : > { %v279_v52 = vsel %vm3564_vm5, %v3712_v21, -inf  ;;  %v280_v60 = vsel %vm3574_vm6, %v3715_v22, -inf  ;;  %v316_v61 = vrot.slane %v315_v11, 4  ;;  %v281_v45 = vsel %vm3564_vm5, %v3724_v32, -inf  ;;  %p684_p1 = scmp.gt.s32.totalorder %s4089_s15, 0  ;;  %s8586_s16 = smov (!%p3124_p3, %s677_s16), 16 }
  0x71   : > { %v308_v2 = vmax.f32 %v306_v53, %v307_v27  ;;  %v325_v3 = vrot.slane %v324_v31, 4  ;;  %v333_v5 = vmax.f32 %v331_v36, %v332_v37  ;;  %v340_v20 = vsel %vm285_vm7, %v265_v58, -inf  ;;  %p3129_p4 = scmp.lt.s32.totalorder %s4089_s15, 16  ;;  %s4350_s21 = sfloor.f32 %s680_s7 }
  0x72   : > { %v341_v4 = vsel %vm285_vm7, %v266_v59, -inf  ;;  %v349_v21 = vsel %vm285_vm7, %v267_v0, -inf  ;;  %v350_v63 = vsel %vm285_vm7, %v268_v1, -inf  ;;  %v282_v22 = vsel %vm3574_vm6, %v3741_v54, -inf  ;;  %s685_s17 = scalar_select %p684_p1, %s4089_s15, 0 }
  0x73   : > { %v283_v53 = vsel %vm3564_vm5, %v3744_v55, -inf  ;;  %v291_v27 = vrot.slane %v290_v42, 2  ;;  %v300_v36 = vrot.slane %v299_v43, 2  ;;  %v284_v58 = vsel %vm3574_vm6, %v3756_v44, -inf  ;;  %s4121_s18 = scalar_select %p653_p2, 1, 0 }
  0x74   : > { %v317_v59 = vmax.f32 %v315_v11, %v316_v61  ;;  %v358_v0 = vsel %vm285_vm7, %v269_v6, -inf  ;;  %v359_v1 = vsel %vm285_vm7, %v270_v7, -inf  ;;  %v334_v37 = vrot.slane %v333_v5, 4  ;;  %s8588_s17 = smov (!%p3129_p4, %s685_s17), 16  ;;  %s4355_s23 = sceil.f32 %s903_s19 }
  0x75   : > { %v342_v32 = vmax.f32 %v340_v20, %v341_v4  ;;  %v351_v54 = vmax.f32 %v349_v21, %v350_v63  ;;  %v360_v62 = vmax.f32 %v358_v0, %v359_v1  ;;  %v309_v57 = vrot.slane %v308_v2, 2  ;;  %s3327_s24 = scvt.f32.s32 %s4350_s21  ;;  %s3329_s25 = scvt.f32.s32 %s4355_s23 }
  0x76   : > { %v326_v14 = vmax.f32 %v324_v31, %v325_v3  ;;  %v367_v55 = vsel %vm285_vm7, %v271_v10, -inf  ;;  %v368_v56 = vsel %vm285_vm7, %v272_v23, -inf  ;;  %v3783_v11 = vmax.f32 %v290_v42, %v291_v27  ;;  %p876_p7 = scmp.le.s32.totalorder %s8588_s17, %s8586_s16 }
  0x77   : > { %v3785_v61 = vmax.f32 %v299_v43, %v300_v36  ;;  %v369_v6 = vmax.f32 %v367_v55, %v368_v56  ;;  %v376_v7 = vsel %vm285_vm7, %v273_v26, -inf  ;;  %v377_v63 = vsel %vm285_vm7, %v274_v33, -inf  ;;  %s4375_s26 = sadd.s32 %s3327_s24, %s3525_s30  ;;  %s4379_s27 = sadd.s32 %s3329_s25, %s3525_s30 }
  0x78   : > { %v385_v4 = vsel %vm285_vm7, %v275_v34, -inf  ;;  %v386_v10 = vsel %vm285_vm7, %v276_v38, -inf  ;;  %v394_v20 = vsel %vm285_vm7, %v277_v39, -inf  ;;  %v318_v21 = vrot.slane %v317_v59, 2  ;;  %p899_p5 = scmp.gt.s32.totalorder %s4375_s26, 0  ;;  %p907_p6 = scmp.gt.s32.totalorder %s4379_s27, 0 }
  0x79   : > { %v343_v23 = vrot.slane %v342_v32, 4  ;;  %v352_v31 = vrot.slane %v351_v54, 4  ;;  %v361_v3 = vrot.slane %v360_v62, 4  ;;  %v370_v42 = vrot.slane %v369_v6, 4  ;;  %p3134_p8 = scmp.lt.s32.totalorder %s4375_s26, 16  ;;  %p3139_p9 = scmp.lt.s32.totalorder %s4379_s27, 16 }
  0x7a   : > { %v378_v43 = vmax.f32 %v376_v7, %v377_v63  ;;  %v387_v56 = vmax.f32 %v385_v4, %v386_v10  ;;  %v395_v26 = vsel %vm285_vm7, %v278_v48, -inf  ;;  %v3795_v55 = vmax.f32 %v308_v2, %v309_v57  ;;  %s900_s28 = scalar_select %p899_p5, %s4375_s26, 0 }
  0x7b   : > { %v335_v33 = vmax.f32 %v333_v5, %v334_v37  ;;  %v396_v34 = vmax.f32 %v394_v20, %v395_v26  ;;  %v403_v38 = vsel %vm285_vm7, %v279_v52, -inf  ;;  %v404_v36 = vsel %vm285_vm7, %v280_v60, -inf  ;;  %s908_s29 = scalar_select %p907_p6, %s4379_s27, 0 }
  0x7c   : > { %v379_v39 = vrot.slane %v378_v43, 4  ;;  %v388_v27 = vrot.slane %v387_v56, 4  ;;  %v412_v0 = vsel %vm285_vm7, %v281_v45, -inf  ;;  %v327_v1 = vrot.slane %v326_v14, 2  ;;  %s8590_s28 = smov (!%p3134_p8, %s900_s28), 16 }
  0x7d   : > { %v344_v7 = vmax.f32 %v342_v32, %v343_v23  ;;  %v353_v63 = vmax.f32 %v351_v54, %v352_v31  ;;  %v397_v4 = vrot.slane %v396_v34, 4  ;;  %v362_v57 = vmax.f32 %v360_v62, %v361_v3  ;;  %s8592_s29 = smov (!%p3139_p9, %s908_s29), 16 }
  0x7e   : > { %v371_v48 = vmax.f32 %v369_v6, %v370_v42  ;;  %v405_v5 = vmax.f32 %v403_v38, %v404_v36  ;;  %v413_v2 = vsel %vm285_vm7, %v282_v22, -inf  ;;  %v293_v52 = vrot.slane %v3783_v11, 1  ;;  %p1099_p12 = scmp.le.s32.totalorder %s8592_s29, %s8590_s28 }
  0x7f   : > { %v336_v60 = vrot.slane %v335_v33, 2  ;;  %v380_v37 = vmax.f32 %v378_v43, %v379_v39  ;;  %v414_v45 = vmax.f32 %v412_v0, %v413_v2  ;;  %v319_v10 = vmax.f32 %v317_v59, %v318_v21 }
  0x80   : > { %v389_v32 = vmax.f32 %v387_v56, %v388_v27  ;;  %v406_v54 = vrot.slane %v405_v5, 4  ;;  %v421_v20 = vsel %vm285_vm7, %v283_v53, -inf  ;;  %v345_v62 = vrot.slane %v344_v7, 2 }
  0x81   : > { %v354_v6 = vrot.slane %v353_v63, 2  ;;  %v398_v23 = vmax.f32 %v396_v34, %v397_v4  ;;  %v415_v22 = vrot.slane %v414_v45, 4  ;;  %v363_v31 = vrot.slane %v362_v57, 2 }
  0x82   : > { %v372_v3 = vrot.slane %v371_v48, 2  ;;  %v407_v42 = vmax.f32 %v405_v5, %v406_v54  ;;  %v422_v59 = vsel %vm285_vm7, %v284_v58, -inf  ;;  %v328_v53 = vmax.f32 %v326_v14, %v327_v1 }
  0x83   : > { %v337_v21 = vmax.f32 %v335_v33, %v336_v60  ;;  %v381_v43 = vrot.slane %v380_v37, 2  ;;  %v423_v56 = vmax.f32 %v421_v20, %v422_v59  ;;  %v302_v26 = vrot.slane %v3785_v61, 1 }
  0x84   : > { %v311_v34 = vrot.slane %v3795_v55, 1  ;;  %v390_v38 = vrot.slane %v389_v32, 2  ;;  %v416_v39 = vmax.f32 %v414_v45, %v415_v22  ;;  %v346_v17 = vmax.f32 %v344_v7, %v345_v62 }
  0x85   : > { %v355_v27 = vmax.f32 %v353_v63, %v354_v6  ;;  %v399_v58 = vrot.slane %v398_v23, 2  ;;  %v424_v14 = vrot.slane %v423_v56, 4  ;;  %v320_v33 = vrot.slane %v319_v10, 1 }
  0x86   : > { %v364_v36 = vmax.f32 %v362_v57, %v363_v31  ;;  %v373_v0 = vmax.f32 %v371_v48, %v372_v3  ;;  %v408_v1 = vrot.slane %v407_v42, 2  ;;  %v329_v4 = vrot.slane %v328_v53, 1 }
  0x87   : > { %v338_v5 = vrot.slane %v337_v21, 1  ;;  %v382_v2 = vmax.f32 %v380_v37, %v381_v43  ;;  %v425_v60 = vmax.f32 %v423_v56, %v424_v14  ;;  %v3834_v7 = vmax.f32 %v3783_v11, %v293_v52 }
  0x88   : > { %v3837_v63 = vmax.f32 %v3785_v61, %v302_v26  ;;  %v391_v45 = vmax.f32 %v389_v32, %v390_v38  ;;  %v417_v57 = vrot.slane %v416_v39, 2  ;;  %v3842_v48 = vmax.f32 %v3795_v55, %v311_v34 }
  0x89   : > { %7988 = vst [vmem:[#allocation19_spill] sm:$0xff] %v3834_v7  ;;  %v347_v37 = vrot.slane %v346_v17, 1  ;;  %v356_v54 = vrot.slane %v355_v27, 1  ;;  %v400_v20 = vmax.f32 %v398_v23, %v399_v58  ;;  %v3848_v11 = vmax.f32 %v319_v10, %v320_v33  ;;  %v8012_v33 = vld [vmem:[#allocation8_spill] sm:$0xff] }
  0x8a   : > { %7989 = vst [vmem:[#allocation20_spill] sm:$0xff] %v3837_v63  ;;  %v365_v61 = vrot.slane %v364_v36, 1  ;;  %v374_v52 = vrot.slane %v373_v0, 1  ;;  %v409_v32 = vmax.f32 %v407_v42, %v408_v1  ;;  %v3850_v62 = vmax.f32 %v328_v53, %v329_v4 }
  0x8b   : > { %7990 = vst [vmem:[#allocation21_spill] sm:$0xff] %v3842_v48  ;;  %v3852_v6 = vmax.f32 %v337_v21, %v338_v5  ;;  %v383_v22 = vrot.slane %v382_v2, 1  ;;  %v426_v55 = vrot.slane %v425_v60, 2  ;;  %v392_v31 = vrot.slane %v391_v45, 1 }
  0x8c   : > { %7991 = vst [vmem:[#allocation22_spill] sm:$0xff] %v3848_v11  ;;  %v418_v3 = vmax.f32 %v416_v39, %v417_v57  ;;  %v432_v59 = vstv %s3831_s6  ;;  %v468_v43 = vstv %s8582_s4  ;;  %v3856_v23 = vmax.f32 %v346_v17, %v347_v37  ;;  %s4408_s4 = scalar_select %p876_p7, 1, 0 }
  0x8d   : > { %7992 = vst [vmem:[#allocation23_spill] sm:$0xff] %v3850_v62  ;;  %v3858_v56 = vmax.f32 %v355_v27, %v356_v54  ;;  %v401_v26 = vrot.slane %v400_v20, 1  ;;  %v465_v10 = vstv %s8584_s5  ;;  %v3861_v34 = vmax.f32 %v364_v36, %v365_v61  ;;  %v8018_v62 = vld [vmem:[#allocation14_spill] sm:$0xff]  ;;  %s1126_s5 = smul.f32 5.0, %s3532_s10  ;;  %s4735_s6 = sfloor.f32 %s903_s19 }
  0x8e   : > { %7993 = vst [vmem:[#allocation24_spill] sm:$0xff] %v3852_v6  ;;  %v3863_v38 = vmax.f32 %v373_v0, %v374_v52  ;;  %v410_v42 = vrot.slane %v409_v32, 1  ;;  %vm469_vm8 = vcmp.lt.s32.totalorder %v3538_v8, %v468_v43  ;;  %v3866_v53 = vmax.f32 %v382_v2, %v383_v22  ;;  %s3331_s8 = scvt.f32.s32 %s4735_s6 }
  0x8f   : > { %7994 = vst [vmem:[#allocation25_spill] sm:$0xff] %v3856_v23  ;;  %v427_v21 = vmax.f32 %v425_v60, %v426_v55  ;;  %vm3868_vm9 = vcmp.eq.s32.totalorder %v432_v59, 1  ;;  %v7999_v39 = vmov 0  ;;  %vm470_vm10 = vcmp.lt.s32.totalorder %v3545_v9, %v468_v43  ;;  %s4743_s7 = sceil.f32 %s1126_s5 }
  0x90   : > { %7995 = vst [vmem:[#allocation26_spill] sm:$0xff] %v3858_v56  ;;  %v8000_v39 = vsel %vm3868_vm9, 4294967295, %v7999_v39  ;;  %v3873_v17 = vmax.f32 %v391_v45, %v392_v31  ;;  %v419_v27 = vrot.slane %v418_v3, 1  ;;  %vm466_vm11 = vcmp.ge.s32.totalorder %v3538_v8, %v465_v10  ;;  %v8016_v56 = vld [vmem:[#allocation12_spill] sm:$0xff]  ;;  %s3333_s11 = scvt.f32.s32 %s4743_s7  ;;  %s4761_s12 = sadd.s32 %s3331_s8, %s3525_s30 }
  0x91   : > { %7996 = vst [vmem:[#allocation27_spill] sm:$0xff] %v3861_v34  ;;  %v3879_v14 = vmax.f32 %v400_v20, %v401_v26  ;;  %vm467_vm12 = vcmp.ge.s32.totalorder %v3545_v9, %v465_v10  ;;  %vm3888_vm13 = vmand %vm466_vm11, %vm469_vm8  ;;  %v3892_v1 = vmax.f32 %v409_v32, %v410_v42  ;;  %v428_v45 = vrot.slane %v427_v21, 1  ;;  %p1122_p10 = scmp.gt.s32.totalorder %s4761_s12, 0  ;;  %p3144_p13 = scmp.lt.s32.totalorder %s4761_s12, 16 }
  0x92   : > { %7997 = vst [vmem:[#allocation28_spill] sm:$0xff] %v3863_v38  ;;  %vm3903_vm14 = vmand %vm467_vm12, %vm470_vm10  ;;  %v3916_v20 = vmax.f32 %v418_v3, %v419_v27  ;;  %v477_v55 = vsel %vm3888_vm13, %v3558_v12, -inf  ;;  %v479_v3 = vsel %vm3888_vm13, %v3569_v15, -inf  ;;  %v481_v26 = vsel %vm3888_vm13, %v3579_v18, -inf  ;;  %s4767_s13 = sadd.s32 %s3333_s11, %s3525_s30  ;;  %s145_s7 = sadd.s32 3, %s3521_s1 }
  0x93   : > { %7998 = vst [vmem:[#allocation29_spill] sm:$0xff] %v3866_v53  ;;  %v478_v31 = vsel %vm3903_vm14, %v3561_v13, -inf  ;;  %v480_v43 = vsel %vm3903_vm14, %v3572_v16, -inf  ;;  %v482_v10 = vsel %vm3903_vm14, %v3582_v19, -inf  ;;  %v3951_v42 = vmax.f32 %v427_v21, %v428_v45  ;;  %p1130_p11 = scmp.gt.s32.totalorder %s4767_s13, 0  ;;  %p3149_p0 = scmp.lt.s32.totalorder %s4767_s13, 16 }
  0x94   : > { %8001 = vst [vmem:[#allocation30_spill] sm:$0xff] %v8000_v39  ;;  %v483_v27 = vsel %vm3888_vm13, %v3597_v24, -inf  ;;  %v484_v59 = vsel %vm3903_vm14, %v3600_v25, -inf  ;;  %v485_v54 = vsel %vm3888_vm13, %v3609_v28, -inf  ;;  %v486_v22 = vsel %vm3903_vm14, %v3612_v29, -inf  ;;  %v8019_v39 = vld [vmem:[#allocation15_spill] sm:$0xff] }
  0x95   : > { %8002 = vst [vmem:[#allocation31_spill] sm:$0xff] %v3873_v17  ;;  %v509_v32 = vsel %vm285_vm7, %v477_v55, -inf  ;;  %v510_v21 = vsel %vm285_vm7, %v478_v31, -inf  ;;  %v518_v45 = vsel %vm285_vm7, %v479_v3, -inf  ;;  %v519_v61 = vsel %vm285_vm7, %v480_v43, -inf  ;;  %v8011_v43 = vld [vmem:[#allocation7_spill] sm:$0xff] }
  0x96   : > { %8003 = vst [vmem:[#allocation32_spill] sm:$0xff] %v3879_v14  ;;  %v511_v52 = vmax.f32 %v509_v32, %v510_v21  ;;  %v527_v37 = vsel %vm285_vm7, %v481_v26, -inf  ;;  %v528_v57 = vsel %vm285_vm7, %v482_v10, -inf  ;;  %v520_v2 = vmax.f32 %v518_v45, %v519_v61  ;;  %v8014_v14 = vld [vmem:[#allocation10_spill] sm:$0xff]  ;;  %s1123_s14 = scalar_select %p1122_p10, %s4761_s12, 0 }
  0x97   : > { %8006 = vst [vmem:[#allocation33_spill] sm:$0xff] %v3892_v1  ;;  %v529_v5 = vmax.f32 %v527_v37, %v528_v57  ;;  %v536_v4 = vsel %vm285_vm7, %v483_v27, -inf  ;;  %v537_v58 = vsel %vm285_vm7, %v484_v59, -inf  ;;  %v545_v3 = vsel %vm285_vm7, %v485_v54, -inf  ;;  %v8013_v1 = vld [vmem:[#allocation9_spill] sm:$0xff]  ;;  %s1131_s15 = scalar_select %p1130_p11, %s4767_s13, 0 }
  0x98   : > { %8009 = vst [vmem:[#allocation34_spill] sm:$0xff] %v3916_v20  ;;  %v512_v31 = vrot.slane %v511_v52, 4  ;;  %v546_v32 = vsel %vm285_vm7, %v486_v22, -inf  ;;  %v487_v57 = vsel %vm3888_vm13, %v3615_v30, -inf  ;;  %v488_v37 = vsel %vm3903_vm14, %v3622_v35, -inf  ;;  %s8594_s14 = smov (!%p3144_p13, %s1123_s14), 16 }
  0x99   : > { %8010 = vst [vmem:[#allocation35_spill] sm:$0xff] %v3951_v42  ;;  %v538_v61 = vmax.f32 %v536_v4, %v537_v58  ;;  %v489_v59 = vsel %vm3888_vm13, %v3633_v40, -inf  ;;  %v490_v54 = vsel %vm3903_vm14, %v3636_v41, -inf  ;;  %v521_v22 = vrot.slane %v520_v2, 4  ;;  %s8596_s15 = smov (!%p3149_p0, %s1131_s15), 16  ;;  %s5377_s11 = sld [smem:[#allocation4 + %s145_s7]] }
  0x9a   : > { %v530_v26 = vrot.slane %v529_v5, 4  ;;  %v491_v10 = vsel %vm3888_vm13, %v3645_v46, -inf  ;;  %v492_v27 = vsel %vm3903_vm14, %v3648_v47, -inf  ;;  %v493_v58 = vsel %vm3888_vm13, %v3654_v49, -inf  ;;  %p1322_p1 = scmp.le.s32.totalorder %s8596_s15, %s8594_s14 }
  0x9b   : > { %v547_v4 = vmax.f32 %v545_v3, %v546_v32  ;;  %v494_v21 = vsel %vm3903_vm14, %v3657_v50, -inf  ;;  %v495_v45 = vsel %vm3888_vm13, %v3660_v51, -inf  ;;  %v496_v55 = vsel %vm3903_vm14, %v8011_v43, -inf }
  0x9c   : > { %v513_v36 = vmax.f32 %v511_v52, %v512_v31  ;;  %v497_v42 = vsel %vm3888_vm13, %v8012_v33, -inf  ;;  %v539_v20 = vrot.slane %v538_v61, 4  ;;  %v554_v3 = vsel %vm285_vm7, %v487_v57, -inf  ;;  %v8015_v52 = vld [vmem:[#allocation11_spill] sm:$0xff]  ;;  %s5094_s26 = scalar_select %p1322_p1, 1, 0 }
  0x9d   : > { %v555_v32 = vsel %vm285_vm7, %v488_v37, -inf  ;;  %v498_v34 = vsel %vm3903_vm14, %v8013_v1, -inf  ;;  %v499_v17 = vsel %vm3888_vm13, %v8014_v14, -inf  ;;  %v522_v53 = vmax.f32 %v520_v2, %v521_v22  ;;  %v8017_v37 = vld [vmem:[#allocation13_spill] sm:$0xff] }
  0x9e   : > { %v531_v38 = vmax.f32 %v529_v5, %v530_v26  ;;  %v500_v31 = vsel %vm3903_vm14, %v8015_v52, -inf  ;;  %v501_v57 = vsel %vm3888_vm13, %v8016_v56, -inf  ;;  %v502_v23 = vsel %vm3903_vm14, %v8017_v37, -inf  ;;  %v8020_v56 = vld [vmem:[#allocation16_spill] sm:$0xff] }
  0x9f   : > { %v548_v6 = vrot.slane %v547_v4, 4  ;;  %v503_v11 = vsel %vm3888_vm13, %v8018_v62, -inf  ;;  %v514_v2 = vrot.slane %v513_v36, 2  ;;  %v556_v5 = vmax.f32 %v554_v3, %v555_v32  ;;  %v8021_v3 = vld [vmem:[#allocation17_spill] sm:$0xff] }
  0xa0   : > { %v563_v22 = vsel %vm285_vm7, %v489_v59, -inf  ;;  %v540_v26 = vmax.f32 %v538_v61, %v539_v20  ;;  %v564_v7 = vsel %vm285_vm7, %v490_v54, -inf  ;;  %v572_v48 = vsel %vm285_vm7, %v491_v10, -inf  ;;  %v8022_v61 = vld [vmem:[#allocation18_spill] sm:$0xff] }
  0xa1   : > { %v573_v63 = vsel %vm285_vm7, %v492_v27, -inf  ;;  %v504_v37 = vsel %vm3903_vm14, %v8019_v39, -inf  ;;  %v505_v62 = vsel %vm3888_vm13, %v8020_v56, -inf  ;;  %v523_v52 = vrot.slane %v522_v53, 2 }
  0xa2   : > { %v532_v14 = vrot.slane %v531_v38, 2  ;;  %v506_v20 = vsel %vm3903_vm14, %v8021_v3, -inf  ;;  %v507_v59 = vsel %vm3888_vm13, %v8022_v61, -inf  ;;  %v549_v10 = vmax.f32 %v547_v4, %v548_v6 }
  0xa3   : > { %v557_v27 = vrot.slane %v556_v5, 4  ;;  %v565_v32 = vmax.f32 %v563_v22, %v564_v7  ;;  %v574_v56 = vmax.f32 %v572_v48, %v573_v63  ;;  %v581_v39 = vsel %vm285_vm7, %v493_v58, -inf }
  0xa4   : > { %v515_v3 = vmax.f32 %v513_v36, %v514_v2  ;;  %v541_v1 = vrot.slane %v540_v26, 2  ;;  %v582_v0 = vsel %vm285_vm7, %v494_v21, -inf  ;;  %v590_v61 = vsel %vm285_vm7, %v495_v45, -inf }
  0xa5   : > { %v4061_v33 = vmax.f32 %v522_v53, %v523_v52  ;;  %v4063_v54 = vmax.f32 %v531_v38, %v532_v14  ;;  %v583_v6 = vmax.f32 %v581_v39, %v582_v0  ;;  %v591_v4 = vsel %vm285_vm7, %v496_v55, -inf }
  0xa6   : > { %v550_v7 = vrot.slane %v549_v10, 2  ;;  %v592_v63 = vmax.f32 %v590_v61, %v591_v4  ;;  %v599_v48 = vsel %vm285_vm7, %v497_v42, -inf  ;;  %v600_v36 = vsel %vm285_vm7, %v498_v34, -inf }
  0xa7   : > { %v566_v58 = vrot.slane %v565_v32, 4  ;;  %v575_v53 = vrot.slane %v574_v56, 4  ;;  %v584_v21 = vrot.slane %v583_v6, 4  ;;  %v601_v38 = vmax.f32 %v599_v48, %v600_v36 }
  0xa8   : > { %v593_v14 = vrot.slane %v592_v63, 4  ;;  %v608_v39 = vsel %vm285_vm7, %v499_v17, -inf  ;;  %v609_v55 = vsel %vm285_vm7, %v500_v31, -inf  ;;  %v617_v45 = vsel %vm285_vm7, %v501_v57, -inf }
  0xa9   : > { %v516_v52 = vrot.slane %v515_v3, 1  ;;  %v4077_v2 = vmax.f32 %v540_v26, %v541_v1  ;;  %v558_v22 = vmax.f32 %v556_v5, %v557_v27  ;;  %v602_v42 = vrot.slane %v601_v38, 4 }
  0xaa   : > { %v525_v34 = vrot.slane %v4061_v33, 1  ;;  %v610_v61 = vmax.f32 %v608_v39, %v609_v55  ;;  %v618_v0 = vsel %vm285_vm7, %v502_v23, -inf  ;;  %v626_v17 = vsel %vm285_vm7, %v503_v11, -inf }
  0xab   : > { %v534_v31 = vrot.slane %v4063_v54, 1  ;;  %v567_v57 = vmax.f32 %v565_v32, %v566_v58  ;;  %v576_v4 = vmax.f32 %v574_v56, %v575_v53  ;;  %v619_v48 = vmax.f32 %v617_v45, %v618_v0 }
  0xac   : > { %v585_v1 = vmax.f32 %v583_v6, %v584_v21  ;;  %v594_v26 = vmax.f32 %v592_v63, %v593_v14  ;;  %v611_v5 = vrot.slane %v610_v61, 4  ;;  %v627_v27 = vsel %vm285_vm7, %v504_v37, -inf }
  0xad   : > { %v603_v36 = vmax.f32 %v601_v38, %v602_v42  ;;  %v620_v39 = vrot.slane %v619_v48, 4  ;;  %v628_v23 = vmax.f32 %v626_v17, %v627_v27  ;;  %v635_v11 = vsel %vm285_vm7, %v505_v62, -inf }
  0xae   : > { %v551_v55 = vmax.f32 %v549_v10, %v550_v7  ;;  %v559_v32 = vrot.slane %v558_v22, 2  ;;  %v612_v56 = vmax.f32 %v610_v61, %v611_v5  ;;  %v636_v6 = vsel %vm285_vm7, %v506_v20, -inf }
  0xaf   : > { %v568_v63 = vrot.slane %v567_v57, 2  ;;  %v621_v58 = vmax.f32 %v619_v48, %v620_v39  ;;  %v629_v53 = vrot.slane %v628_v23, 4  ;;  %v644_v37 = vsel %vm285_vm7, %v507_v59, -inf }
  0xb0   : > { %v577_v21 = vrot.slane %v576_v4, 2  ;;  %v586_v38 = vrot.slane %v585_v1, 2  ;;  %v637_v14 = vmax.f32 %v635_v11, %v636_v6  ;;  %v8023_v62 = vsel %vm3903_vm14, %v3756_v44, -inf }
  0xb1   : > { %v645_v10 = vsel %vm285_vm7, %v8023_v62, -inf  ;;  %v4103_v20 = vmax.f32 %v515_v3, %v516_v52  ;;  %v595_v7 = vrot.slane %v594_v26, 2  ;;  %v604_v45 = vrot.slane %v603_v36, 2 }
  0xb2   : > { %v630_v59 = vmax.f32 %v628_v23, %v629_v53  ;;  %v613_v42 = vrot.slane %v612_v56, 2  ;;  %v622_v61 = vrot.slane %v621_v58, 2  ;;  %v638_v0 = vrot.slane %v637_v14, 4 }
  0xb3   : > { %8024 = vst [vmem:[#allocation7_spill] sm:$0xff] %v4103_v20  ;;  %v646_v17 = vmax.f32 %v644_v37, %v645_v10  ;;  %v543_v60 = vrot.slane %v4077_v2, 1  ;;  %v560_v48 = vmax.f32 %v558_v22, %v559_v32  ;;  %v569_v5 = vmax.f32 %v567_v57, %v568_v63  ;;  %v4694_v20 = vld [vmem:[%s3552_s22 + $0xd0] sm:$0xff] }
  0xb4   : > { %v631_v27 = vrot.slane %v630_v59, 2  ;;  %v578_v3 = vmax.f32 %v576_v4, %v577_v21  ;;  %v587_v52 = vmax.f32 %v585_v1, %v586_v38  ;;  %v639_v39 = vmax.f32 %v637_v14, %v638_v0  ;;  %8092 = vst [vmem:[#allocation65_spill] sm:$0xff] %v4694_v20 }
  0xb5   : > { %v647_v23 = vrot.slane %v646_v17, 4  ;;  %v4115_v11 = vmax.f32 %v4061_v33, %v525_v34  ;;  %v552_v6 = vrot.slane %v551_v55, 1  ;;  %v596_v53 = vmax.f32 %v594_v26, %v595_v7 }
  0xb6   : > { %v605_v37 = vmax.f32 %v603_v36, %v604_v45  ;;  %v614_v22 = vmax.f32 %v612_v56, %v613_v42  ;;  %v623_v57 = vmax.f32 %v621_v58, %v622_v61  ;;  %v640_v32 = vrot.slane %v639_v39, 2 }
  0xb7   : > { %8025 = vst [vmem:[#allocation36_spill] sm:$0xff] %v4115_v11  ;;  %v648_v63 = vmax.f32 %v646_v17, %v647_v23  ;;  %v4124_v4 = vmax.f32 %v4063_v54, %v534_v31  ;;  %v561_v1 = vrot.slane %v560_v48, 1  ;;  %v570_v21 = vrot.slane %v569_v5, 1  ;;  %v4715_v11 = vld [vmem:[%s3552_s22 + $0xe8] sm:$0xff] }
  0xb8   : > { %v632_v38 = vmax.f32 %v630_v59, %v631_v27  ;;  %v579_v33 = vrot.slane %v578_v3, 1  ;;  %v588_v34 = vrot.slane %v587_v52, 1  ;;  %v641_v26 = vmax.f32 %v639_v39, %v640_v32  ;;  %v4594_v32 = vld [vmem:[%s3552_s22 + $0x60] sm:$0xff]  ;;  %8095 = vst [vmem:[#allocation68_spill] sm:$0xff] %v4715_v11 }
  0xb9   : > { %8026 = vst [vmem:[#allocation37_spill] sm:$0xff] %v4124_v4  ;;  %v649_v36 = vrot.slane %v648_v63, 2  ;;  %v4129_v56 = vmax.f32 %v4077_v2, %v543_v60  ;;  %v4131_v58 = vmax.f32 %v551_v55, %v552_v6  ;;  %v597_v14 = vrot.slane %v596_v53, 1 }
  0xba   : > { %v606_v54 = vrot.slane %v605_v37, 1  ;;  %v615_v31 = vrot.slane %v614_v22, 1  ;;  %v624_v62 = vrot.slane %v623_v57, 1  ;;  %v655_v7 = vstv %s4121_s18  ;;  %s5044_s18 = sfloor.f32 %s1126_s5 }
  0xbb   : > { %8027 = vst [vmem:[#allocation38_spill] sm:$0xff] %v4129_v56  ;;  %v650_v10 = vmax.f32 %v648_v63, %v649_v36  ;;  %v633_v45 = vrot.slane %v632_v38, 1  ;;  %v642_v59 = vrot.slane %v641_v26, 1  ;;  %v688_v42 = vstv %s8586_s16  ;;  %v4701_v56 = vld [vmem:[%s3552_s22 + $0xd8] sm:$0xff]  ;;  %s4801_s16 = scalar_select %p1099_p12, 1, 0 }
  0xbc   : > { %8028 = vst [vmem:[#allocation39_spill] sm:$0xff] %v4131_v58  ;;  %v691_v61 = vstv %s8588_s17  ;;  %v4136_v0 = vmax.f32 %v560_v48, %v561_v1  ;;  %v4138_v17 = vmax.f32 %v569_v5, %v570_v21  ;;  %v4140_v27 = vmax.f32 %v578_v3, %v579_v33  ;;  %v8059_v21 = vld [vmem:[#allocation18_spill] sm:$0xff]  ;;  %s1349_s17 = smul.f32 6.0, %s3532_s10  ;;  %s3335_s21 = scvt.f32.s32 %s5044_s18 }
  0xbd   : > { %v4142_v2 = vmax.f32 %v587_v52, %v588_v34  ;;  %v4144_v55 = vmax.f32 %v596_v53, %v597_v14  ;;  %v651_v60 = vrot.slane %v650_v10, 1  ;;  %vm689_vm15 = vcmp.ge.s32.totalorder %v3538_v8, %v688_v42  ;;  %8093 = vst [vmem:[#allocation66_spill] sm:$0xff] %v4701_v56 }
  0xbe   : > { %8029 = vst [vmem:[#allocation40_spill] sm:$0xff] %v4136_v0  ;;  %vm692_vm0 = vcmp.lt.s32.totalorder %v3538_v8, %v691_v61  ;;  %v4148_v39 = vmax.f32 %v605_v37, %v606_v54  ;;  %vm4150_vm1 = vcmp.eq.s32.totalorder %v655_v7, 1  ;;  %v8035_v23 = vmov 0  ;;  %s5055_s19 = sceil.f32 %s1349_s17  ;;  %s5073_s24 = sadd.s32 %s3335_s21, %s3525_s30 }
  0xbf   : > { %8030 = vst [vmem:[#allocation41_spill] sm:$0xff] %v4138_v17  ;;  %v8036_v23 = vsel %vm4150_vm1, 4294967295, %v8035_v23  ;;  %vm4155_vm2 = vcmp.ge.s32.totalorder %v3545_v9, %v688_v42  ;;  %vm693_vm3 = vcmp.lt.s32.totalorder %v3545_v9, %v691_v61  ;;  %v4160_v5 = vmax.f32 %v614_v22, %v615_v31  ;;  %vm4180_vm4 = vmand %vm689_vm15, %vm692_vm0  ;;  %v4688_v17 = vld [vmem:[%s3552_s22 + $0xc8] sm:$0xff]  ;;  %s3337_s23 = scvt.f32.s32 %s5055_s19  ;;  %p1345_p2 = scmp.gt.s32.totalorder %s5073_s24, 0 }
  0xc0   : > { %8031 = vst [vmem:[#allocation42_spill] sm:$0xff] %v4140_v27  ;;  %v4162_v3 = vmax.f32 %v623_v57, %v624_v62  ;;  %v4164_v52 = vmax.f32 %v632_v38, %v633_v45  ;;  %v4166_v6 = vmax.f32 %v641_v26, %v642_v59  ;;  %v4184_v63 = vmax.f32 %v650_v10, %v651_v60  ;;  %vm4197_vm5 = vmand %vm4155_vm2, %vm693_vm3  ;;  %v8058_v38 = vld [vmem:[#allocation17_spill] sm:$0xff]  ;;  %p3154_p4 = scmp.lt.s32.totalorder %s5073_s24, 16  ;;  %s5338_s5 = sfloor.f32 %s1349_s17 }
  0xc1   : > { %8032 = vst [vmem:[#allocation43_spill] sm:$0xff] %v4142_v2  ;;  %v700_v7 = vsel %vm4180_vm4, %v3558_v12, -inf  ;;  %v701_v45 = vsel %vm4197_vm5, %v3561_v13, -inf  ;;  %v702_v59 = vsel %vm4180_vm4, %v3569_v15, -inf  ;;  %v704_v42 = vsel %vm4180_vm4, %v3579_v18, -inf  ;;  %v4682_v2 = vld [vmem:[%s3552_s22 + $0xc0] sm:$0xff]  ;;  %s5077_s25 = sadd.s32 %s3337_s23, %s3525_s30 }
  0xc2   : > { %8033 = vst [vmem:[#allocation44_spill] sm:$0xff] %v4144_v55  ;;  %v703_v12 = vsel %vm4197_vm5, %v3572_v16, -inf  ;;  %v705_v13 = vsel %vm4197_vm5, %v3582_v19, -inf  ;;  %v706_v15 = vsel %vm4180_vm4, %v3597_v24, -inf  ;;  %v707_v18 = vsel %vm4197_vm5, %v3600_v25, -inf  ;;  %p1353_p3 = scmp.gt.s32.totalorder %s5077_s25, 0 }
  0xc3   : > { %8034 = vst [vmem:[#allocation45_spill] sm:$0xff] %v4148_v39  ;;  %v708_v60 = vsel %vm4180_vm4, %v3609_v28, -inf  ;;  %v709_v16 = vsel %vm4197_vm5, %v3612_v29, -inf  ;;  %v710_v19 = vsel %vm4180_vm4, %v3615_v30, -inf  ;;  %v711_v24 = vsel %vm4197_vm5, %v3622_v35, -inf  ;;  %s1346_s27 = scalar_select %p1345_p2, %s5073_s24, 0 }
  0xc4   : > { %8037 = vst [vmem:[#allocation46_spill] sm:$0xff] %v8036_v23  ;;  %v732_v48 = vsel %vm285_vm7, %v700_v7, -inf  ;;  %v733_v25 = vsel %vm285_vm7, %v701_v45, -inf  ;;  %v741_v61 = vsel %vm285_vm7, %v702_v59, -inf  ;;  %v742_v28 = vsel %vm285_vm7, %v703_v12, -inf  ;;  %p3159_p5 = scmp.lt.s32.totalorder %s5077_s25, 16 }
  0xc5   : > { %8040 = vst [vmem:[#allocation47_spill] sm:$0xff] %v4160_v5  ;;  %v734_v10 = vmax.f32 %v732_v48, %v733_v25  ;;  %v750_v62 = vsel %vm285_vm7, %v704_v42, -inf  ;;  %v751_v29 = vsel %vm285_vm7, %v705_v13, -inf  ;;  %v743_v31 = vmax.f32 %v741_v61, %v742_v28  ;;  %v8050_v28 = vld [vmem:[#allocation9_spill] sm:$0xff]  ;;  %s8598_s27 = smov (!%p3154_p4, %s1346_s27), 16 }
  0xc6   : > { %8041 = vst [vmem:[#allocation48_spill] sm:$0xff] %v4162_v3  ;;  %v752_v26 = vmax.f32 %v750_v62, %v751_v29  ;;  %v759_v30 = vsel %vm285_vm7, %v706_v15, -inf  ;;  %v760_v54 = vsel %vm285_vm7, %v707_v18, -inf  ;;  %v768_v7 = vsel %vm285_vm7, %v708_v60, -inf  ;;  %v8051_v29 = vld [vmem:[#allocation10_spill] sm:$0xff] }
  0xc7   : > { %8042 = vst [vmem:[#allocation49_spill] sm:$0xff] %v4164_v52  ;;  %v735_v35 = vrot.slane %v734_v10, 4  ;;  %v761_v14 = vmax.f32 %v759_v30, %v760_v54  ;;  %v769_v45 = vsel %vm285_vm7, %v709_v16, -inf  ;;  %v712_v59 = vsel %vm4180_vm4, %v3633_v40, -inf }
  0xc8   : > { %8043 = vst [vmem:[#allocation50_spill] sm:$0xff] %v4166_v6  ;;  %v744_v12 = vrot.slane %v743_v31, 4  ;;  %v753_v42 = vrot.slane %v752_v26, 4  ;;  %v770_v48 = vmax.f32 %v768_v7, %v769_v45  ;;  %v713_v62 = vsel %vm4197_vm5, %v3636_v41, -inf }
  0xc9   : > { %8046 = vst [vmem:[#allocation51_spill] sm:$0xff] %v4184_v63  ;;  %v736_v61 = vmax.f32 %v734_v10, %v735_v35  ;;  %v777_v13 = vsel %vm285_vm7, %v710_v19, -inf  ;;  %v778_v54 = vsel %vm285_vm7, %v711_v24, -inf  ;;  %v714_v15 = vsel %vm4180_vm4, %v3645_v46, -inf }
  0xca   : > { %v715_v40 = vsel %vm4197_vm5, %v3648_v47, -inf  ;;  %v716_v18 = vsel %vm4180_vm4, %v3654_v49, -inf  ;;  %v762_v60 = vrot.slane %v761_v14, 4  ;;  %v717_v41 = vsel %vm4197_vm5, %v3657_v50, -inf  ;;  %v8049_v47 = vld [vmem:[#allocation8_spill] sm:$0xff]  ;;  %8090 = vst [vmem:[#allocation63_spill] sm:$0xff] %v4682_v2 }
  0xcb   : > { %v718_v10 = vsel %vm4180_vm4, %v3660_v51, -inf  ;;  %v745_v16 = vmax.f32 %v743_v31, %v744_v12  ;;  %v754_v19 = vmax.f32 %v752_v26, %v753_v42  ;;  %v719_v46 = vsel %vm4197_vm5, %v8011_v43, -inf  ;;  %v8052_v31 = vld [vmem:[#allocation11_spill] sm:$0xff]  ;;  %v8053_v43 = vld [vmem:[#allocation12_spill] sm:$0xff]  ;;  %8091 = vst [vmem:[#allocation64_spill] sm:$0xff] %v4688_v17 }
  0xcc   : > { %v720_v24 = vsel %vm4180_vm4, %v8049_v47, -inf  ;;  %v771_v49 = vrot.slane %v770_v48, 4  ;;  %v779_v25 = vmax.f32 %v777_v13, %v778_v54  ;;  %v721_v50 = vsel %vm4197_vm5, %v8050_v28, -inf  ;;  %v8054_v28 = vld [vmem:[#allocation13_spill] sm:$0xff] }
  0xcd   : > { %v722_v51 = vsel %vm4180_vm4, %v8051_v29, -inf  ;;  %v723_v26 = vsel %vm4197_vm5, %v8052_v31, -inf  ;;  %v737_v30 = vrot.slane %v736_v61, 2  ;;  %v724_v35 = vsel %vm4180_vm4, %v8053_v43, -inf  ;;  %v8055_v31 = vld [vmem:[#allocation14_spill] sm:$0xff] }
  0xce   : > { %v763_v7 = vmax.f32 %v761_v14, %v762_v60  ;;  %v786_v45 = vsel %vm285_vm7, %v712_v59, -inf  ;;  %v787_v12 = vsel %vm285_vm7, %v713_v62, -inf  ;;  %v746_v42 = vrot.slane %v745_v16, 2  ;;  %v8056_v60 = vld [vmem:[#allocation15_spill] sm:$0xff]  ;;  %v8057_v62 = vld [vmem:[#allocation16_spill] sm:$0xff] }
  0xcf   : > { %v755_v13 = vrot.slane %v754_v19, 2  ;;  %v795_v54 = vsel %vm285_vm7, %v714_v15, -inf  ;;  %v796_v47 = vsel %vm285_vm7, %v715_v40, -inf  ;;  %v725_v29 = vsel %vm4197_vm5, %v8054_v28, -inf }
  0xd0   : > { %v726_v43 = vsel %vm4180_vm4, %v8055_v31, -inf  ;;  %v772_v36 = vmax.f32 %v770_v48, %v771_v49  ;;  %v780_v14 = vrot.slane %v779_v25, 4  ;;  %v727_v59 = vsel %vm4197_vm5, %v8056_v60, -inf }
  0xd1   : > { %v728_v15 = vsel %vm4180_vm4, %v8057_v62, -inf  ;;  %v738_v40 = vmax.f32 %v736_v61, %v737_v30  ;;  %v788_v34 = vmax.f32 %v786_v45, %v787_v12  ;;  %v729_v28 = vsel %vm4197_vm5, %v8058_v38, -inf }
  0xd2   : > { %v730_v48 = vsel %vm4180_vm4, %v8059_v21, -inf  ;;  %v731_v49 = vsel %vm4197_vm5, %v3756_v44, -inf  ;;  %v797_v31 = vmax.f32 %v795_v54, %v796_v47  ;;  %v4341_v60 = vmax.f32 %v745_v16, %v746_v42 }
  0xd3   : > { %v4343_v62 = vmax.f32 %v754_v19, %v755_v13  ;;  %v764_v61 = vrot.slane %v763_v7, 2  ;;  %v804_v30 = vsel %vm285_vm7, %v716_v18, -inf  ;;  %v773_v45 = vrot.slane %v772_v36, 2 }
  0xd4   : > { %v781_v12 = vmax.f32 %v779_v25, %v780_v14  ;;  %v805_v38 = vsel %vm285_vm7, %v717_v41, -inf  ;;  %v813_v57 = vsel %vm285_vm7, %v718_v10, -inf  ;;  %v739_v21 = vrot.slane %v738_v40, 1 }
  0xd5   : > { %v789_v53 = vrot.slane %v788_v34, 4  ;;  %v806_v54 = vmax.f32 %v804_v30, %v805_v38  ;;  %v814_v16 = vsel %vm285_vm7, %v719_v46, -inf  ;;  %v798_v18 = vrot.slane %v797_v31, 4 }
  0xd6   : > { %v815_v19 = vmax.f32 %v813_v57, %v814_v16  ;;  %v822_v25 = vsel %vm285_vm7, %v720_v24, -inf  ;;  %v823_v41 = vsel %vm285_vm7, %v721_v50, -inf  ;;  %v748_v10 = vrot.slane %v4341_v60, 1 }
  0xd7   : > { %v4360_v42 = vmax.f32 %v763_v7, %v764_v61  ;;  %v807_v13 = vrot.slane %v806_v54, 4  ;;  %v824_v47 = vmax.f32 %v822_v25, %v823_v41  ;;  %v831_v46 = vsel %vm285_vm7, %v722_v51, -inf }
  0xd8   : > { %v816_v14 = vrot.slane %v815_v19, 4  ;;  %v832_v30 = vsel %vm285_vm7, %v723_v26, -inf  ;;  %v840_v38 = vsel %vm285_vm7, %v724_v35, -inf  ;;  %v757_v24 = vrot.slane %v4343_v62, 1 }
  0xd9   : > { %v4368_v57 = vmax.f32 %v772_v36, %v773_v45  ;;  %v790_v50 = vmax.f32 %v788_v34, %v789_v53  ;;  %v825_v7 = vrot.slane %v824_v47, 4  ;;  %v799_v61 = vmax.f32 %v797_v31, %v798_v18 }
  0xda   : > { %v833_v16 = vmax.f32 %v831_v46, %v832_v30  ;;  %v841_v25 = vsel %vm285_vm7, %v725_v29, -inf  ;;  %v849_v41 = vsel %vm285_vm7, %v726_v43, -inf  ;;  %v4372_v51 = vmax.f32 %v738_v40, %v739_v21 }
  0xdb   : > { %v782_v1 = vrot.slane %v781_v12, 2  ;;  %v808_v26 = vmax.f32 %v806_v54, %v807_v13  ;;  %v842_v22 = vmax.f32 %v840_v38, %v841_v25  ;;  %v817_v35 = vmax.f32 %v815_v19, %v816_v14 }
  0xdc   : > { %8060 = vst [vmem:[#allocation8_spill] sm:$0xff] %v4372_v51  ;;  %v826_v36 = vmax.f32 %v824_v47, %v825_v7  ;;  %v834_v45 = vrot.slane %v833_v16, 4  ;;  %v850_v53 = vsel %vm285_vm7, %v727_v59, -inf  ;;  %v766_v34 = vrot.slane %v4360_v42, 1 }
  0xdd   : > { %v843_v29 = vrot.slane %v842_v22, 4  ;;  %v851_v43 = vmax.f32 %v849_v41, %v850_v53  ;;  %v858_v40 = vsel %vm285_vm7, %v728_v15, -inf  ;;  %v791_v31 = vrot.slane %v790_v50, 2 }
  0xde   : > { %v800_v21 = vrot.slane %v799_v61, 2  ;;  %v835_v54 = vmax.f32 %v833_v16, %v834_v45  ;;  %v859_v18 = vsel %vm285_vm7, %v729_v28, -inf  ;;  %v809_v19 = vrot.slane %v808_v26, 2 }
  0xdf   : > { %v844_v59 = vmax.f32 %v842_v22, %v843_v29  ;;  %v852_v13 = vrot.slane %v851_v43, 4  ;;  %v867_v47 = vsel %vm285_vm7, %v730_v48, -inf  ;;  %v818_v14 = vrot.slane %v817_v35, 2 }
  0xe0   : > { %v827_v46 = vrot.slane %v826_v36, 2  ;;  %v860_v30 = vmax.f32 %v858_v40, %v859_v18  ;;  %v868_v15 = vsel %vm285_vm7, %v731_v49, -inf  ;;  %v783_v28 = vmax.f32 %v781_v12, %v782_v1 }
  0xe1   : > { %v836_v22 = vrot.slane %v835_v54, 2  ;;  %v845_v38 = vrot.slane %v844_v59, 2  ;;  %v853_v7 = vmax.f32 %v851_v43, %v852_v13  ;;  %v4396_v48 = vmax.f32 %v4341_v60, %v748_v10 }
  0xe2   : > { %v792_v16 = vmax.f32 %v790_v50, %v791_v31  ;;  %v861_v25 = vrot.slane %v860_v30, 4  ;;  %v869_v33 = vmax.f32 %v867_v47, %v868_v15  ;;  %v775_v44 = vrot.slane %v4368_v57, 1 }
  0xe3   : > { %8061 = vst [vmem:[#allocation9_spill] sm:$0xff] %v4396_v48  ;;  %v801_v49 = vmax.f32 %v799_v61, %v800_v21  ;;  %v810_v41 = vmax.f32 %v808_v26, %v809_v19  ;;  %v854_v1 = vrot.slane %v853_v7, 2  ;;  %v819_v12 = vmax.f32 %v817_v35, %v818_v14 }
  0xe4   : > { %v828_v45 = vmax.f32 %v826_v36, %v827_v46  ;;  %v862_v53 = vmax.f32 %v860_v30, %v861_v25  ;;  %v870_v29 = vrot.slane %v869_v33, 4  ;;  %v4411_v60 = vmax.f32 %v4343_v62, %v757_v24 }
  0xe5   : > { %v784_v10 = vrot.slane %v783_v28, 1  ;;  %v837_v50 = vmax.f32 %v835_v54, %v836_v22  ;;  %v846_v43 = vmax.f32 %v844_v59, %v845_v38  ;;  %v793_v61 = vrot.slane %v792_v16, 1 }
  0xe6   : > { %8062 = vst [vmem:[#allocation10_spill] sm:$0xff] %v4411_v60  ;;  %v855_v26 = vmax.f32 %v853_v7, %v854_v1  ;;  %v863_v40 = vrot.slane %v862_v53, 2  ;;  %v871_v31 = vmax.f32 %v869_v33, %v870_v29  ;;  %v4419_v35 = vmax.f32 %v4360_v42, %v766_v34 }
  0xe7   : > { %v4422_v36 = vmax.f32 %v4368_v57, %v775_v44  ;;  %v802_v62 = vrot.slane %v801_v49, 1  ;;  %v811_v24 = vrot.slane %v810_v41, 1  ;;  %v820_v21 = vrot.slane %v819_v12, 1 }
  0xe8   : > { %8063 = vst [vmem:[#allocation11_spill] sm:$0xff] %v4419_v35  ;;  %v829_v54 = vrot.slane %v828_v45, 1  ;;  %v864_v18 = vmax.f32 %v862_v53, %v863_v40  ;;  %v872_v19 = vrot.slane %v871_v31, 2  ;;  %v4426_v59 = vmax.f32 %v783_v28, %v784_v10  ;;  %v4570_v40 = vld [vmem:[%s3552_s22 + $0x40] sm:$0xff]  ;;  %v4588_v53 = vld [vmem:[%s3552_s22 + $0x58] sm:$0xff] }
  0xe9   : > { %8064 = vst [vmem:[#allocation12_spill] sm:$0xff] %v4422_v36  ;;  %v838_v13 = vrot.slane %v837_v50, 1  ;;  %v847_v47 = vrot.slane %v846_v43, 1  ;;  %v878_v14 = vstv %s4408_s4  ;;  %v4429_v42 = vmax.f32 %v792_v16, %v793_v61  ;;  %s141_s4 = sadd.s32 1, %s3521_s1  ;;  %s3339_s1 = scvt.f32.s32 %s5338_s5 }
  0xea   : > { %8065 = vst [vmem:[#allocation13_spill] sm:$0xff] %v4426_v59  ;;  %v856_v34 = vrot.slane %v855_v26, 1  ;;  %v865_v57 = vrot.slane %v864_v18, 1  ;;  %v873_v46 = vmax.f32 %v871_v31, %v872_v19  ;;  %v4431_v30 = vmax.f32 %v801_v49, %v802_v62  ;;  %v4552_v19 = vld [vmem:[%s3552_s22 + $0x18] sm:$0xff] }
  0xeb   : > { %8066 = vst [vmem:[#allocation14_spill] sm:$0xff] %v4429_v42  ;;  %v4433_v15 = vmax.f32 %v810_v41, %v811_v24  ;;  %v911_v22 = vstv %s8590_s28  ;;  %v914_v38 = vstv %s8592_s29  ;;  %v4437_v7 = vmax.f32 %v819_v12, %v820_v21  ;;  %v4564_v24 = vld [vmem:[%s3552_s22 + $0x38] sm:$0xff]  ;;  %v4582_v12 = vld [vmem:[%s3552_s22 + $0x50] sm:$0xff]  ;;  %s1354_s28 = scalar_select %p1353_p3, %s5077_s25, 0 }
  0xec   : > { %8067 = vst [vmem:[#allocation15_spill] sm:$0xff] %v4431_v30  ;;  %v4439_v25 = vmax.f32 %v828_v45, %v829_v54  ;;  %v874_v28 = vrot.slane %v873_v46, 1  ;;  %vm4441_vm6 = vcmp.eq.s32.totalorder %v878_v14, 1  ;;  %v8071_v33 = vmov 0  ;;  %v4558_v54 = vld [vmem:[%s3552_s22 + $0x28] sm:$0xff]  ;;  %s1572_s29 = smul.f32 7.0, %s3532_s10  ;;  %s5386_s12 = sadd.s32 %s3339_s1, %s3525_s30 }
  0xed   : > { %8068 = vst [vmem:[#allocation16_spill] sm:$0xff] %v4433_v15  ;;  %v8072_v33 = vsel %vm4441_vm6, 4294967295, %v8071_v33  ;;  %v4445_v16 = vmax.f32 %v837_v50, %v838_v13  ;;  %v4447_v44 = vmax.f32 %v846_v43, %v847_v47  ;;  %vm912_vm8 = vcmp.ge.s32.totalorder %v3538_v8, %v911_v22  ;;  %v4519_v47 = vld [vmem:[%s3552_s22] sm:$0xff]  ;;  %v4546_v13 = vld [vmem:[%s3552_s22 + $0x8] sm:$0xff]  ;;  %v4606_v15 = vld [vmem:[%s3552_s22 + $0x70] sm:$0xff]  ;;  %s8600_s28 = smov (!%p3159_p5, %s1354_s28), 16 }
  0xee   : > { %8069 = vst [vmem:[#allocation17_spill] sm:$0xff] %v4437_v7  ;;  %vm915_vm10 = vcmp.lt.s32.totalorder %v3538_v8, %v914_v38  ;;  %v4451_v49 = vmax.f32 %v855_v26, %v856_v34  ;;  %v4453_v41 = vmax.f32 %v864_v18, %v865_v57  ;;  %vm4456_vm11 = vcmp.ge.s32.totalorder %v3545_v9, %v911_v22  ;;  %v4525_v34 = vld [vmem:[%s3552_s22 + $0x10] sm:$0xff]  ;;  %v4576_v43 = vld [vmem:[%s3552_s22 + $0x48] sm:$0xff]  ;;  %s5347_s6 = sceil.f32 %s1572_s29  ;;  %s5360_s10 = sld [smem:[#allocation4 + %s141_s4]] }
  0xef   : > { %8070 = vst [vmem:[#allocation18_spill] sm:$0xff] %v4439_v25  ;;  %vm916_vm12 = vcmp.lt.s32.totalorder %v3545_v9, %v914_v38  ;;  %v4473_v10 = vmax.f32 %v873_v46, %v874_v28  ;;  %vm4484_vm13 = vmand %vm912_vm8, %vm915_vm10  ;;  %v4531_v46 = vld [vmem:[%s3552_s22 + $0x20] sm:$0xff]  ;;  %v4537_v38 = vld [vmem:[%s3552_s22 + $0x30] sm:$0xff]  ;;  %s3341_s8 = scvt.f32.s32 %s5347_s6  ;;  %p1545_p6 = scmp.le.s32.totalorder %s8600_s28, %s8598_s27 }
  0xf0   : > { %8073 = vst [vmem:[#allocation52_spill] sm:$0xff] %v8072_v33  ;;  %vm4502_vm14 = vmand %vm4456_vm11, %vm916_vm12  ;;  %v923_v14 = vsel %vm4484_vm13, %v4519_v47, -inf  ;;  %v925_v57 = vsel %vm4484_vm13, %v4525_v34, -inf  ;;  %v927_v22 = vsel %vm4484_vm13, %v4531_v46, -inf  ;;  %v929_v28 = vsel %vm4484_vm13, %v4537_v38, -inf  ;;  %p1568_p7 = scmp.gt.s32.totalorder %s5386_s12, 0 }
  0xf1   : > { %8074 = vst [vmem:[#allocation53_spill] sm:$0xff] %v4445_v16  ;;  %v924_v31 = vsel %vm4502_vm14, %v4546_v13, -inf  ;;  %v926_v18 = vsel %vm4502_vm14, %v4552_v19, -inf  ;;  %v928_v1 = vsel %vm4502_vm14, %v4558_v54, -inf  ;;  %v930_v62 = vsel %vm4502_vm14, %v4564_v24, -inf  ;;  %s5392_s13 = sadd.s32 %s3341_s8, %s3525_s30  ;;  %p3164_p9 = scmp.lt.s32.totalorder %s5386_s12, 16 }
  0xf2   : > { %8075 = vst [vmem:[#allocation54_spill] sm:$0xff] %v4447_v44  ;;  %v931_v61 = vsel %vm4484_vm13, %v4570_v40, -inf  ;;  %v932_v50 = vsel %vm4502_vm14, %v4576_v43, -inf  ;;  %v933_v29 = vsel %vm4484_vm13, %v4582_v12, -inf  ;;  %v934_v45 = vsel %vm4502_vm14, %v4588_v53, -inf  ;;  %v4612_v44 = vld [vmem:[%s3552_s22 + $0x78] sm:$0xff] }
  0xf3   : > { %8076 = vst [vmem:[#allocation55_spill] sm:$0xff] %v4451_v49  ;;  %v935_v37 = vsel %vm4484_vm13, %v4594_v32, -inf  ;;  %v937_v49 = vsel %vm4484_vm13, %v4606_v15, -inf  ;;  %v938_v16 = vsel %vm4502_vm14, %v4612_v44, -inf  ;;  %v955_v25 = vsel %vm285_vm7, %v923_v14, -inf  ;;  %p1576_p8 = scmp.gt.s32.totalorder %s5392_s13, 0 }
  0xf4   : > { %8077 = vst [vmem:[#allocation56_spill] sm:$0xff] %v4453_v41  ;;  %v956_v7 = vsel %vm285_vm7, %v924_v31, -inf  ;;  %v964_v30 = vsel %vm285_vm7, %v925_v57, -inf  ;;  %v965_v59 = vsel %vm285_vm7, %v926_v18, -inf  ;;  %v973_v36 = vsel %vm285_vm7, %v927_v22, -inf  ;;  %p3169_p10 = scmp.lt.s32.totalorder %s5392_s13, 16 }
  0xf5   : > { %8080 = vst [vmem:[#allocation57_spill] sm:$0xff] %v4473_v10  ;;  %v4600_v10 = vld [vmem:[%s3552_s22 + $0x68] sm:$0xff]  ;;  %v957_v42 = vmax.f32 %v955_v25, %v956_v7  ;;  %v974_v51 = vsel %vm285_vm7, %v928_v1, -inf  ;;  %v966_v35 = vmax.f32 %v964_v30, %v965_v59  ;;  %v982_v48 = vsel %vm285_vm7, %v929_v28, -inf  ;;  %v4629_v59 = vld [vmem:[%s3552_s22 + $0x80] sm:$0xff]  ;;  %v4642_v28 = vld [vmem:[%s3552_s22 + $0x90] sm:$0xff] }
  0xf6   : > { %v936_v41 = vsel %vm4502_vm14, %v4600_v10, -inf  ;;  %v975_v60 = vmax.f32 %v973_v36, %v974_v51  ;;  %v983_v33 = vsel %vm285_vm7, %v930_v62, -inf  ;;  %v991_v31 = vsel %vm285_vm7, %v931_v61, -inf  ;;  %v4648_v1 = vld [vmem:[%s3552_s22 + $0x98] sm:$0xff]  ;;  %s5412_s30 = scalar_select %p1545_p6, 1, 0 }
  0xf7   : > { %v958_v14 = vrot.slane %v957_v42, 4  ;;  %v984_v63 = vmax.f32 %v982_v48, %v983_v33  ;;  %v992_v7 = vsel %vm285_vm7, %v932_v50, -inf  ;;  %v967_v25 = vrot.slane %v966_v35, 4  ;;  %v4636_v33 = vld [vmem:[%s3552_s22 + $0x88] sm:$0xff]  ;;  %8085 = vst [vmem:[#allocation58_spill] sm:$0xff] %v4648_v1  ;;  %s1577_s17 = scalar_select %p1576_p8, %s5392_s13, 0 }
  0xf8   : > { %v976_v18 = vrot.slane %v975_v60, 4  ;;  %v993_v57 = vmax.f32 %v991_v31, %v992_v7  ;;  %v1000_v22 = vsel %vm285_vm7, %v933_v29, -inf  ;;  %v939_v51 = vsel %vm4484_vm13, %v4629_v59, -inf }
  0xf9   : > { %v959_v36 = vmax.f32 %v957_v42, %v958_v14  ;;  %v985_v30 = vrot.slane %v984_v63, 4  ;;  %v1001_v48 = vsel %vm285_vm7, %v934_v45, -inf  ;;  %v940_v50 = vsel %vm4502_vm14, %v4636_v33, -inf  ;;  %s8604_s17 = smov (!%p3169_p10, %s1577_s17), 16 }
  0xfa   : > { %v968_v61 = vmax.f32 %v966_v35, %v967_v25  ;;  %v977_v62 = vmax.f32 %v975_v60, %v976_v18  ;;  %v994_v29 = vrot.slane %v993_v57, 4  ;;  %v941_v42 = vsel %vm4484_vm13, %v4642_v28, -inf  ;;  %v4657_v18 = vld [vmem:[%s3552_s22 + $0xa0] sm:$0xff] }
  0xfb   : > { %v942_v45 = vsel %vm4502_vm14, %v4648_v1, -inf  ;;  %v1002_v14 = vmax.f32 %v1000_v22, %v1001_v48  ;;  %v1009_v35 = vsel %vm285_vm7, %v935_v37, -inf  ;;  %v960_v60 = vrot.slane %v959_v36, 2  ;;  %8086 = vst [vmem:[#allocation59_spill] sm:$0xff] %v4657_v18  ;;  %v4664_v37 = vld [vmem:[%s3552_s22 + $0xa8] sm:$0xff] }
  0xfc   : > { %v986_v31 = vmax.f32 %v984_v63, %v985_v30  ;;  %v1010_v7 = vsel %vm285_vm7, %v936_v41, -inf  ;;  %v1018_v25 = vsel %vm285_vm7, %v937_v49, -inf  ;;  %v943_v6 = vsel %vm4484_vm13, %v4657_v18, -inf  ;;  %8087 = vst [vmem:[#allocation60_spill] sm:$0xff] %v4664_v37  ;;  %v4670_v41 = vld [vmem:[%s3552_s22 + $0xb0] sm:$0xff]  ;;  %v4676_v30 = vld [vmem:[%s3552_s22 + $0xb8] sm:$0xff] }
  0xfd   : > { %v969_v52 = vrot.slane %v968_v61, 2  ;;  %v978_v3 = vrot.slane %v977_v62, 2  ;;  %v1019_v22 = vsel %vm285_vm7, %v938_v16, -inf  ;;  %v944_v63 = vsel %vm4502_vm14, %v4664_v37, -inf  ;;  %8088 = vst [vmem:[#allocation61_spill] sm:$0xff] %v4670_v41 }
  0xfe   : > { %v945_v49 = vsel %vm4484_vm13, %v4670_v41, -inf  ;;  %8089 = vst [vmem:[#allocation62_spill] sm:$0xff] %v4676_v30  ;;  %v946_v16 = vsel %vm4502_vm14, %v4676_v30, -inf  ;;  %v995_v48 = vmax.f32 %v993_v57, %v994_v29  ;;  %v947_v5 = vsel %vm4484_vm13, %v4682_v2, -inf }
  0xff   : > { %v1003_v39 = vrot.slane %v1002_v14, 4  ;;  %v1011_v55 = vmax.f32 %v1009_v35, %v1010_v7  ;;  %v1020_v27 = vmax.f32 %v1018_v25, %v1019_v22  ;;  %v948_v0 = vsel %vm4502_vm14, %v4688_v17, -inf  ;;  %v4707_v7 = vld [vmem:[%s3552_s22 + $0xe0] sm:$0xff] }
 0x100   : > { %v949_v57 = vsel %vm4484_vm13, %v4694_v20, -inf  ;;  %v961_v29 = vmax.f32 %v959_v36, %v960_v60  ;;  %v987_v58 = vrot.slane %v986_v31, 2  ;;  %v950_v35 = vsel %vm4502_vm14, %v4701_v56, -inf  ;;  %8094 = vst [vmem:[#allocation67_spill] sm:$0xff] %v4707_v7  ;;  %v4721_v60 = vld [vmem:[%s3552_s22 + $0xf0] sm:$0xff]  ;;  %v4727_v56 = vld [vmem:[%s3552_s22 + $0xf8] sm:$0xff] }
 0x101   : > { %v951_v25 = vsel %vm4484_vm13, %v4707_v7, -inf  ;;  %v970_v22 = vmax.f32 %v968_v61, %v969_v52  ;;  %v4712_v4 = vmax.f32 %v977_v62, %v978_v3  ;;  %v952_v36 = vsel %vm4502_vm14, %v4715_v11, -inf  ;;  %8096 = vst [vmem:[#allocation69_spill] sm:$0xff] %v4721_v60 }
 0x102   : > { %v996_v52 = vrot.slane %v995_v48, 2  ;;  %v1004_v61 = vmax.f32 %v1002_v14, %v1003_v39  ;;  %v1012_v62 = vrot.slane %v1011_v55, 4  ;;  %v1021_v7 = vrot.slane %v1020_v27, 4 }
 0x103   : > { %v1027_v20 = vsel %vm285_vm7, %v939_v51, -inf  ;;  %v962_v11 = vrot.slane %v961_v29, 1  ;;  %v4737_v17 = vmax.f32 %v986_v31, %v987_v58  ;;  %v1028_v23 = vsel %vm285_vm7, %v940_v50, -inf }
 0x104   : > { %v1036_v2 = vsel %vm285_vm7, %v941_v42, -inf  ;;  %v971_v39 = vrot.slane %v970_v22, 1  ;;  %v1029_v3 = vmax.f32 %v1027_v20, %v1028_v23  ;;  %v1037_v51 = vsel %vm285_vm7, %v942_v45, -inf }
 0x105   : > { %v4747_v30 = vmax.f32 %v995_v48, %v996_v52  ;;  %v1038_v41 = vmax.f32 %v1036_v2, %v1037_v51  ;;  %v1045_v58 = vsel %vm285_vm7, %v943_v6, -inf  ;;  %v1046_v31 = vsel %vm285_vm7, %v944_v63, -inf }
 0x106   : > { %v1013_v50 = vmax.f32 %v1011_v55, %v1012_v62  ;;  %v1022_v42 = vmax.f32 %v1020_v27, %v1021_v7  ;;  %v1030_v37 = vrot.slane %v1029_v3, 4  ;;  %v1047_v18 = vmax.f32 %v1045_v58, %v1046_v31 }
 0x107   : > { %v1039_v1 = vrot.slane %v1038_v41, 4  ;;  %v1054_v14 = vsel %vm285_vm7, %v945_v49, -inf  ;;  %v1055_v20 = vsel %vm285_vm7, %v946_v16, -inf  ;;  %v1063_v23 = vsel %vm285_vm7, %v947_v5, -inf }
 0x108   : > { %v4756_v2 = vmax.f32 %v961_v29, %v962_v11  ;;  %v1005_v6 = vrot.slane %v1004_v61, 2  ;;  %v1031_v45 = vmax.f32 %v1029_v3, %v1030_v37  ;;  %v1048_v63 = vrot.slane %v1047_v18, 4 }
 0x109   : > { %v1040_v48 = vmax.f32 %v1038_v41, %v1039_v1  ;;  %v1056_v55 = vmax.f32 %v1054_v14, %v1055_v20  ;;  %v1064_v27 = vsel %vm285_vm7, %v948_v0, -inf  ;;  %v1072_v7 = vsel %vm285_vm7, %v949_v57, -inf }
 0x10a   : > { %8097 = vst [vmem:[#allocation70_spill] sm:$0xff] %v4756_v2  ;;  %v4763_v49 = vmax.f32 %v970_v22, %v971_v39  ;;  %v989_v16 = vrot.slane %v4737_v17, 1  ;;  %v1049_v52 = vmax.f32 %v1047_v18, %v1048_v63  ;;  %v1065_v5 = vmax.f32 %v1063_v23, %v1064_v27  ;;  %v8133_v2 = vld [vmem:[#allocation66_spill] sm:$0xff] }
 0x10b   : > { %v1014_v11 = vrot.slane %v1013_v50, 2  ;;  %v1023_v37 = vrot.slane %v1022_v42, 2  ;;  %v1057_v1 = vrot.slane %v1056_v55, 4  ;;  %v1073_v0 = vsel %vm285_vm7, %v950_v35, -inf }
 0x10c   : > { %8098 = vst [vmem:[#allocation71_spill] sm:$0xff] %v4763_v49  ;;  %v1032_v41 = vrot.slane %v1031_v45, 2  ;;  %v1066_v57 = vrot.slane %v1065_v5, 4  ;;  %v1074_v29 = vmax.f32 %v1072_v7, %v1073_v0  ;;  %v1081_v22 = vsel %vm285_vm7, %v951_v25, -inf }
 0x10d   : > { %v1041_v3 = vrot.slane %v1040_v48, 2  ;;  %v1050_v62 = vrot.slane %v1049_v52, 2  ;;  %v1058_v18 = vmax.f32 %v1056_v55, %v1057_v1  ;;  %v1082_v39 = vsel %vm285_vm7, %v952_v36, -inf }
 0x10e   : > { %v1006_v14 = vmax.f32 %v1004_v61, %v1005_v6  ;;  %v1067_v51 = vmax.f32 %v1065_v5, %v1066_v57  ;;  %v1075_v58 = vrot.slane %v1074_v29, 4  ;;  %v8099_v35 = vsel %vm4484_vm13, %v4721_v60, -inf }
 0x10f   : > { %v1090_v25 = vsel %vm285_vm7, %v8099_v35, -inf  ;;  %v1015_v31 = vmax.f32 %v1013_v50, %v1014_v11  ;;  %v1059_v20 = vrot.slane %v1058_v18, 2  ;;  %v1083_v23 = vmax.f32 %v1081_v22, %v1082_v39 }
 0x110   : > { %v8100_v36 = vsel %vm4502_vm14, %v4727_v56, -inf  ;;  %v1024_v6 = vmax.f32 %v1022_v42, %v1023_v37  ;;  %v1033_v26 = vmax.f32 %v1031_v45, %v1032_v41  ;;  %v1068_v63 = vrot.slane %v1067_v51, 2 }
 0x111   : > { %v1091_v61 = vsel %vm285_vm7, %v8100_v36, -inf  ;;  %v1076_v55 = vmax.f32 %v1074_v29, %v1075_v58  ;;  %v1042_v27 = vmax.f32 %v1040_v48, %v1041_v3  ;;  %v1051_v7 = vmax.f32 %v1049_v52, %v1050_v62 }
 0x112   : > { %v1084_v50 = vrot.slane %v1083_v23, 4  ;;  %v1092_v5 = vmax.f32 %v1090_v25, %v1091_v61  ;;  %v8101_v21 = vrot.slane %v4712_v4, 1  ;;  %v998_v42 = vrot.slane %v4747_v30, 1 }
 0x113   : > { %v1060_v45 = vmax.f32 %v1058_v18, %v1059_v20  ;;  %v1077_v37 = vrot.slane %v1076_v55, 2  ;;  %v1007_v1 = vrot.slane %v1006_v14, 1  ;;  %v1069_v48 = vmax.f32 %v1067_v51, %v1068_v63 }
 0x114   : > { %v4795_v11 = vmax.f32 %v4712_v4, %v8101_v21  ;;  %v1085_v52 = vmax.f32 %v1083_v23, %v1084_v50  ;;  %v1093_v0 = vrot.slane %v1092_v5, 4  ;;  %v1016_v41 = vrot.slane %v1015_v31, 1 }
 0x115   : > { %v1025_v57 = vrot.slane %v1024_v6, 1  ;;  %v1034_v29 = vrot.slane %v1033_v26, 1  ;;  %v1078_v22 = vmax.f32 %v1076_v55, %v1077_v37  ;;  %v1043_v4 = vrot.slane %v1042_v27, 1 }
 0x116   : > { %8102 = vst [vmem:[#allocation72_spill] sm:$0xff] %v4795_v11  ;;  %v1052_v3 = vrot.slane %v1051_v7, 1  ;;  %v1086_v62 = vrot.slane %v1085_v52, 2  ;;  %v1094_v39 = vmax.f32 %v1092_v5, %v1093_v0  ;;  %v4808_v18 = vmax.f32 %v4737_v17, %v989_v16 }
 0x117   : > { %v4811_v51 = vmax.f32 %v4747_v30, %v998_v42  ;;  %v1061_v58 = vrot.slane %v1060_v45, 1  ;;  %v1101_v35 = vstv %s4801_s16  ;;  %v1070_v25 = vrot.slane %v1069_v48, 1  ;;  %s1569_s16 = scalar_select %p1568_p7, %s5386_s12, 0 }
 0x118   : > { %8103 = vst [vmem:[#allocation73_spill] sm:$0xff] %v4808_v18  ;;  %v1079_v20 = vrot.slane %v1078_v22, 1  ;;  %v1087_v23 = vmax.f32 %v1085_v52, %v1086_v62  ;;  %v1095_v36 = vrot.slane %v1094_v39, 2  ;;  %v4816_v61 = vmax.f32 %v1006_v14, %v1007_v1  ;;  %v8125_v52 = vld [vmem:[#allocation58_spill] sm:$0xff]  ;;  %v8134_v18 = vld [vmem:[#allocation67_spill] sm:$0xff] }
 0x119   : > { %8104 = vst [vmem:[#allocation74_spill] sm:$0xff] %v4811_v51  ;;  %v4818_v63 = vmax.f32 %v1015_v31, %v1016_v41  ;;  %v4820_v55 = vmax.f32 %v1024_v6, %v1025_v57  ;;  %v4822_v17 = vmax.f32 %v1033_v26, %v1034_v29  ;;  %v4824_v30 = vmax.f32 %v1042_v27, %v1043_v4  ;;  %s8602_s16 = smov (!%p3164_p9, %s1569_s16), 16 }
 0x11a   : > { %8105 = vst [vmem:[#allocation75_spill] sm:$0xff] %v4816_v61  ;;  %v4826_v16 = vmax.f32 %v1051_v7, %v1052_v3  ;;  %v1088_v50 = vrot.slane %v1087_v23, 1  ;;  %v1096_v5 = vmax.f32 %v1094_v39, %v1095_v36  ;;  %v4828_v21 = vmax.f32 %v1060_v45, %v1061_v58  ;;  %p1768_p12 = scmp.le.s32.totalorder %s8604_s17, %s8602_s16 }
 0x11b   : > { %8106 = vst [vmem:[#allocation76_spill] sm:$0xff] %v4818_v63  ;;  %vm4830_vm15 = vcmp.eq.s32.totalorder %v1101_v35, 1  ;;  %v8112_v42 = vmov 0  ;;  %v1134_v14 = vstv %s8594_s14  ;;  %v1137_v37 = vstv %s8596_s15  ;;  %s151_s14 = smul.f32 0.5, %s5360_s10 }
 0x11c   : > { %8107 = vst [vmem:[#allocation77_spill] sm:$0xff] %v4820_v55  ;;  %v8113_v42 = vsel %vm4830_vm15, 4294967295, %v8112_v42  ;;  %v4836_v31 = vmax.f32 %v1069_v48, %v1070_v25  ;;  %v4838_v6 = vmax.f32 %v1078_v22, %v1079_v20  ;;  %v1097_v26 = vrot.slane %v1096_v5, 1  ;;  %s159_s15 = smul.f32 0.5, %s5377_s11 }
 0x11d   : > { %8108 = vst [vmem:[#allocation78_spill] sm:$0xff] %v4822_v17  ;;  %vm1135_vm0 = vcmp.ge.s32.totalorder %v3538_v8, %v1134_v14  ;;  %v4841_v27 = vmax.f32 %v1087_v23, %v1088_v50  ;;  %vm4844_vm2 = vcmp.ge.s32.totalorder %v3545_v9, %v1134_v14  ;;  %vm1138_vm3 = vcmp.lt.s32.totalorder %v3538_v8, %v1137_v37  ;;  %s5422_s18 = sadd.f32 0.5, %s151_s14 }
 0x11e   : > { %8109 = vst [vmem:[#allocation79_spill] sm:$0xff] %v4824_v30  ;;  %vm1139_vm4 = vcmp.lt.s32.totalorder %v3545_v9, %v1137_v37  ;;  %v4862_v0 = vmax.f32 %v1096_v5, %v1097_v26  ;;  %vm4873_vm5 = vmand %vm1135_vm0, %vm1138_vm3  ;;  %s5426_s19 = sadd.f32 0.5, %s159_s15 }
 0x11f   : > { %8110 = vst [vmem:[#allocation80_spill] sm:$0xff] %v4826_v16  ;;  %vm4891_vm8 = vmand %vm4844_vm2, %vm1139_vm4  ;;  %v1146_v36 = vsel %vm4873_vm5, %v4519_v47, -inf  ;;  %v1148_v50 = vsel %vm4873_vm5, %v4525_v34, -inf  ;;  %v1150_v5 = vsel %vm4873_vm5, %v4531_v46, -inf  ;;  %v1152_v14 = vsel %vm4873_vm5, %v4537_v38, -inf  ;;  %s153_s21 = sfloor.f32 %s5422_s18 }
 0x120   : > { %8111 = vst [vmem:[#allocation81_spill] sm:$0xff] %v4828_v21  ;;  %v1147_v26 = vsel %vm4891_vm8, %v4546_v13, -inf  ;;  %v1149_v7 = vsel %vm4891_vm8, %v4552_v19, -inf  ;;  %v1151_v23 = vsel %vm4891_vm8, %v4558_v54, -inf  ;;  %v1153_v20 = vsel %vm4891_vm8, %v4564_v24, -inf  ;;  %s161_s23 = sfloor.f32 %s5426_s19  ;;  %s5478_s24 = scvt.f32.s32 %s153_s21 }
 0x121   : > { %8114 = vst [vmem:[#allocation82_spill] sm:$0xff] %v8113_v42  ;;  %v1154_v37 = vsel %vm4873_vm5, %v4570_v40, -inf  ;;  %v1155_v25 = vsel %vm4891_vm8, %v4576_v43, -inf  ;;  %v1156_v3 = vsel %vm4873_vm5, %v4582_v12, -inf  ;;  %v1157_v35 = vsel %vm4891_vm8, %v4588_v53, -inf  ;;  %s5480_s25 = scvt.f32.s32 %s161_s23 }
 0x122   : > { %8115 = vst [vmem:[#allocation83_spill] sm:$0xff] %v4836_v31  ;;  %v1158_v39 = vsel %vm4873_vm5, %v4594_v32, -inf  ;;  %v1159_v62 = vsel %vm4891_vm8, %v4600_v10, -inf  ;;  %v1160_v4 = vsel %vm4873_vm5, %v4606_v15, -inf  ;;  %v1161_v29 = vsel %vm4891_vm8, %v4612_v44, -inf }
 0x123   : > { %8116 = vst [vmem:[#allocation84_spill] sm:$0xff] %v4838_v6  ;;  %v1178_v1 = vsel %vm285_vm7, %v1146_v36, -inf  ;;  %v1188_v57 = vsel %vm285_vm7, %v1149_v7, -inf  ;;  %v1196_v31 = vsel %vm285_vm7, %v1150_v5, -inf  ;;  %v1197_v45 = vsel %vm285_vm7, %v1151_v23, -inf }
 0x124   : > { %8117 = vst [vmem:[#allocation85_spill] sm:$0xff] %v4841_v27  ;;  %v1187_v27 = vsel %vm285_vm7, %v1148_v50, -inf  ;;  %v1198_v21 = vmax.f32 %v1196_v31, %v1197_v45  ;;  %v1205_v41 = vsel %vm285_vm7, %v1152_v14, -inf  ;;  %v1206_v16 = vsel %vm285_vm7, %v1153_v20, -inf  ;;  %s5811_s1 = scalar_select %p1768_p12, 1, 0 }
 0x125   : > { %8120 = vst [vmem:[#allocation86_spill] sm:$0xff] %v4862_v0  ;;  %v1179_v0 = vsel %vm285_vm7, %v1147_v26, -inf  ;;  %v1189_v17 = vmax.f32 %v1187_v27, %v1188_v57  ;;  %v1207_v30 = vmax.f32 %v1205_v41, %v1206_v16  ;;  %v1214_v36 = vsel %vm285_vm7, %v1154_v37, -inf }
 0x126   : > { %v1180_v6 = vmax.f32 %v1178_v1, %v1179_v0  ;;  %v1215_v26 = vsel %vm285_vm7, %v1155_v25, -inf  ;;  %v1199_v1 = vrot.slane %v1198_v21, 4  ;;  %v1223_v7 = vsel %vm285_vm7, %v1156_v3, -inf }
 0x127   : > { %v1190_v50 = vrot.slane %v1189_v17, 4  ;;  %v1216_v0 = vmax.f32 %v1214_v36, %v1215_v26  ;;  %v1208_v55 = vrot.slane %v1207_v30, 4  ;;  %v1224_v27 = vsel %vm285_vm7, %v1157_v35, -inf }
 0x128   : > { %v1181_v48 = vrot.slane %v1180_v6, 4  ;;  %v1232_v31 = vsel %vm285_vm7, %v1158_v39, -inf  ;;  %v1200_v57 = vmax.f32 %v1198_v21, %v1199_v1  ;;  %v1225_v23 = vmax.f32 %v1223_v7, %v1224_v27  ;;  %v8127_v21 = vld [vmem:[#allocation60_spill] sm:$0xff] }
 0x129   : > { %v1191_v45 = vmax.f32 %v1189_v17, %v1190_v50  ;;  %v1217_v20 = vrot.slane %v1216_v0, 4  ;;  %v1209_v41 = vmax.f32 %v1207_v30, %v1208_v55  ;;  %v1233_v14 = vsel %vm285_vm7, %v1159_v62, -inf  ;;  %v8128_v30 = vld [vmem:[#allocation61_spill] sm:$0xff]  ;;  %v8129_v62 = vld [vmem:[#allocation62_spill] sm:$0xff] }
 0x12a   : > { %v1182_v5 = vmax.f32 %v1180_v6, %v1181_v48  ;;  %v1241_v25 = vsel %vm285_vm7, %v1160_v4, -inf  ;;  %v1201_v36 = vrot.slane %v1200_v57, 2  ;;  %v1226_v3 = vrot.slane %v1225_v23, 4  ;;  %v8126_v6 = vld [vmem:[#allocation59_spill] sm:$0xff] }
 0x12b   : > { %v1192_v37 = vrot.slane %v1191_v45, 2  ;;  %v1218_v26 = vmax.f32 %v1216_v0, %v1217_v20  ;;  %v1166_v48 = vsel %vm4873_vm5, %v8126_v6, -inf  ;;  %v1234_v39 = vmax.f32 %v1232_v31, %v1233_v14  ;;  %v8130_v0 = vld [vmem:[#allocation63_spill] sm:$0xff]  ;;  %v8131_v31 = vld [vmem:[#allocation64_spill] sm:$0xff] }
 0x12c   : > { %v1183_v16 = vrot.slane %v1182_v5, 2  ;;  %v1242_v17 = vsel %vm285_vm7, %v1161_v29, -inf  ;;  %v1167_v55 = vsel %vm4891_vm8, %v8127_v21, -inf  ;;  %v1168_v4 = vsel %vm4873_vm5, %v8128_v30, -inf }
 0x12d   : > { %v1169_v50 = vsel %vm4891_vm8, %v8129_v62, -inf  ;;  %v1210_v1 = vrot.slane %v1209_v41, 2  ;;  %v1170_v7 = vsel %vm4873_vm5, %v8130_v0, -inf  ;;  %v1202_v29 = vmax.f32 %v1200_v57, %v1201_v36 }
 0x12e   : > { %v1184_v35 = vmax.f32 %v1182_v5, %v1183_v16  ;;  %v1193_v5 = vmax.f32 %v1191_v45, %v1192_v37  ;;  %v1243_v27 = vmax.f32 %v1241_v25, %v1242_v17  ;;  %v1171_v20 = vsel %vm4891_vm8, %v8131_v31, -inf  ;;  %v8132_v16 = vld [vmem:[#allocation65_spill] sm:$0xff]  ;;  %v8135_v37 = vld [vmem:[#allocation68_spill] sm:$0xff] }
 0x12f   : > { %v1172_v14 = vsel %vm4873_vm5, %v8132_v16, -inf  ;;  %v1219_v63 = vrot.slane %v1218_v26, 2  ;;  %v1227_v61 = vmax.f32 %v1225_v23, %v1226_v3  ;;  %v1173_v51 = vsel %vm4891_vm8, %v8133_v2, -inf }
 0x130   : > { %v1174_v45 = vsel %vm4873_vm5, %v8134_v18, -inf  ;;  %v1185_v57 = vrot.slane %v1184_v35, 1  ;;  %v1235_v25 = vrot.slane %v1234_v39, 4  ;;  %v1175_v36 = vsel %vm4891_vm8, %v8135_v37, -inf }
 0x131   : > { %v1176_v23 = vsel %vm4873_vm5, %v4721_v60, -inf  ;;  %v5023_v17 = vmax.f32 %v1209_v41, %v1210_v1  ;;  %v1194_v11 = vrot.slane %v1193_v5, 1  ;;  %v1203_v49 = vrot.slane %v1202_v29, 1 }
 0x132   : > { %v1244_v42 = vrot.slane %v1243_v27, 4  ;;  %v8136_v18 = vsel %vm4873_vm5, %v4629_v59, -inf  ;;  %v5030_v2 = vmax.f32 %v1218_v26, %v1219_v63  ;;  %v1228_v16 = vrot.slane %v1227_v61, 2 }
 0x133   : > { %v1250_v37 = vsel %vm285_vm7, %v8136_v18, -inf  ;;  %v8137_v60 = vsel %vm4891_vm8, %v4636_v33, -inf  ;;  %v8138_v41 = vsel %vm4873_vm5, %v4642_v28, -inf  ;;  %v5046_v18 = vmax.f32 %v1184_v35, %v1185_v57 }
 0x134   : > { %v1251_v3 = vsel %vm285_vm7, %v8137_v60, -inf  ;;  %v1259_v1 = vsel %vm285_vm7, %v8138_v41, -inf  ;;  %v1236_v63 = vmax.f32 %v1234_v39, %v1235_v25  ;;  %v8139_v31 = vsel %vm4891_vm8, %v8125_v52, -inf }
 0x135   : > { %v1252_v26 = vmax.f32 %v1250_v37, %v1251_v3  ;;  %v1260_v60 = vsel %vm285_vm7, %v8139_v31, -inf  ;;  %v1212_v22 = vrot.slane %v5023_v17, 1  ;;  %v1268_v0 = vsel %vm285_vm7, %v1166_v48, -inf }
 0x136   : > { %v1261_v41 = vmax.f32 %v1259_v1, %v1260_v60  ;;  %v1269_v35 = vsel %vm285_vm7, %v1167_v55, -inf  ;;  %v5060_v57 = vmax.f32 %v1193_v5, %v1194_v11  ;;  %v1245_v39 = vmax.f32 %v1243_v27, %v1244_v42 }
 0x137   : > { %v1253_v25 = vrot.slane %v1252_v26, 4  ;;  %v1270_v37 = vmax.f32 %v1268_v0, %v1269_v35  ;;  %v1277_v31 = vsel %vm285_vm7, %v1168_v4, -inf  ;;  %v1278_v62 = vsel %vm285_vm7, %v1169_v50, -inf }
 0x138   : > { %v1262_v3 = vrot.slane %v1261_v41, 4  ;;  %v1286_v30 = vsel %vm285_vm7, %v1170_v7, -inf  ;;  %v5067_v1 = vmax.f32 %v1202_v29, %v1203_v49  ;;  %v1237_v48 = vrot.slane %v1236_v63, 2 }
 0x139   : > { %v1254_v55 = vmax.f32 %v1252_v26, %v1253_v25  ;;  %v1271_v11 = vrot.slane %v1270_v37, 4  ;;  %v1279_v42 = vmax.f32 %v1277_v31, %v1278_v62  ;;  %v1287_v0 = vsel %vm285_vm7, %v1171_v20, -inf }
 0x13a   : > { %v1263_v5 = vmax.f32 %v1261_v41, %v1262_v3  ;;  %v1295_v4 = vsel %vm285_vm7, %v1172_v14, -inf  ;;  %v1221_v27 = vrot.slane %v5030_v2, 1  ;;  %v1246_v50 = vrot.slane %v1245_v39, 2 }
 0x13b   : > { %v1272_v60 = vmax.f32 %v1270_v37, %v1271_v11  ;;  %v1288_v7 = vmax.f32 %v1286_v30, %v1287_v0  ;;  %v1255_v49 = vrot.slane %v1254_v55, 2  ;;  %v1280_v26 = vrot.slane %v1279_v42, 4 }
 0x13c   : > { %v1264_v29 = vrot.slane %v1263_v5, 2  ;;  %v1296_v41 = vsel %vm285_vm7, %v1173_v51, -inf  ;;  %v1304_v14 = vsel %vm285_vm7, %v1174_v45, -inf  ;;  %v1229_v25 = vmax.f32 %v1227_v61, %v1228_v16 }
 0x13d   : > { %v1273_v62 = vrot.slane %v1272_v60, 2  ;;  %v1289_v20 = vrot.slane %v1288_v7, 4  ;;  %v1297_v35 = vmax.f32 %v1295_v4, %v1296_v41  ;;  %v1238_v37 = vmax.f32 %v1236_v63, %v1237_v48 }
 0x13e   : > { %v1281_v30 = vmax.f32 %v1279_v42, %v1280_v26  ;;  %v1305_v3 = vsel %vm285_vm7, %v1175_v36, -inf  ;;  %v1247_v31 = vmax.f32 %v1245_v39, %v1246_v50  ;;  %v1313_v0 = vsel %vm285_vm7, %v1176_v23, -inf }
 0x13f   : > { %v1290_v11 = vmax.f32 %v1288_v7, %v1289_v20  ;;  %v1298_v51 = vrot.slane %v1297_v35, 4  ;;  %v1256_v4 = vmax.f32 %v1254_v55, %v1255_v49  ;;  %v1306_v45 = vmax.f32 %v1304_v14, %v1305_v3 }
 0x140   : > { %v1282_v41 = vrot.slane %v1281_v30, 2  ;;  %v8140_v61 = vsel %vm4891_vm8, %v4727_v56, -inf  ;;  %v1265_v36 = vmax.f32 %v1263_v5, %v1264_v29  ;;  %v1274_v63 = vmax.f32 %v1272_v60, %v1273_v62 }
 0x141   : > { %v1314_v16 = vsel %vm285_vm7, %v8140_v61, -inf  ;;  %v1291_v39 = vrot.slane %v1290_v11, 2  ;;  %v1299_v48 = vmax.f32 %v1297_v35, %v1298_v51  ;;  %v5097_v23 = vmax.f32 %v5023_v17, %v1212_v22 }
 0x142   : > { %v1283_v55 = vmax.f32 %v1281_v30, %v1282_v41  ;;  %v1307_v42 = vrot.slane %v1306_v45, 4  ;;  %v1315_v58 = vmax.f32 %v1313_v0, %v1314_v16  ;;  %v1230_v50 = vrot.slane %v1229_v25, 1 }
 0x143   : > { %v1239_v7 = vrot.slane %v1238_v37, 1  ;;  %v1292_v5 = vmax.f32 %v1290_v11, %v1291_v39  ;;  %v1300_v60 = vrot.slane %v1299_v48, 2  ;;  %v1248_v49 = vrot.slane %v1247_v31, 1 }
 0x144   : > { %v1257_v29 = vrot.slane %v1256_v4, 1  ;;  %v1308_v26 = vmax.f32 %v1306_v45, %v1307_v42  ;;  %v1316_v62 = vrot.slane %v1315_v58, 4  ;;  %v1266_v17 = vrot.slane %v1265_v36, 1 }
 0x145   : > { %v1275_v22 = vrot.slane %v1274_v63, 1  ;;  %v1301_v20 = vmax.f32 %v1299_v48, %v1300_v60  ;;  %v1324_v35 = vstv %s5094_s26  ;;  %v5109_v14 = vmax.f32 %v5030_v2, %v1221_v27  ;;  %s168_s26 = ssub.s32 %s5480_s25, %s5478_s24 }
 0x146   : > { %v1284_v30 = vrot.slane %v1283_v55, 1  ;;  %v1309_v3 = vrot.slane %v1308_v26, 2  ;;  %v1317_v51 = vmax.f32 %v1315_v58, %v1316_v62  ;;  %v5113_v11 = vmax.f32 %v1229_v25, %v1230_v50 }
 0x147   : > { %v5115_v0 = vmax.f32 %v1238_v37, %v1239_v7  ;;  %v1293_v41 = vrot.slane %v1292_v5, 1  ;;  %v1302_v45 = vrot.slane %v1301_v20, 1  ;;  %v5119_v61 = vmax.f32 %v1247_v31, %v1248_v49 }
 0x148   : > { %v1310_v16 = vmax.f32 %v1308_v26, %v1309_v3  ;;  %v1318_v2 = vrot.slane %v1317_v51, 2  ;;  %vm5121_vm10 = vcmp.eq.s32.totalorder %v1324_v35, 1  ;;  %v5125_v39 = vmax.f32 %v1256_v4, %v1257_v29  ;;  %v8147_v35 = vld [vmem:[#allocation61_spill] sm:$0xff] }
 0x149   : > { %v5127_v25 = vmax.f32 %v1265_v36, %v1266_v17  ;;  %v5129_v37 = vmax.f32 %v1274_v63, %v1275_v22  ;;  %v5134_v42 = vmax.f32 %v1283_v55, %v1284_v30  ;;  %v5139_v7 = vmax.f32 %v1292_v5, %v1293_v41 }
 0x14a   : > { %v1311_v31 = vrot.slane %v1310_v16, 1  ;;  %v1319_v58 = vmax.f32 %v1317_v51, %v1318_v2  ;;  %v5141_v4 = vmax.f32 %v1301_v20, %v1302_v45  ;;  %v1357_v36 = vstv %s8598_s27  ;;  %v8148_v45 = vld [vmem:[#allocation62_spill] sm:$0xff]  ;;  %s5566_s27 = sadd.s32 1, %s168_s26 }
 0x14b   : > { %v1360_v60 = vstv %s8600_s28  ;;  %vm1358_vm11 = vcmp.ge.s32.totalorder %v3538_v8, %v1357_v36  ;;  %vm1359_vm12 = vcmp.ge.s32.totalorder %v3545_v9, %v1357_v36  ;;  %p170_p11 = scmp.gt.s32.totalorder %s5566_s27, 1 }
 0x14c   : > { %v5145_v63 = vmax.f32 %v1310_v16, %v1311_v31  ;;  %v1320_v49 = vrot.slane %v1319_v58, 1  ;;  %vm1361_vm13 = vcmp.lt.s32.totalorder %v3538_v8, %v1360_v60  ;;  %vm1362_vm14 = vcmp.lt.s32.totalorder %v3545_v9, %v1360_v60 }
 0x14d   : > { %vm5168_vm0 = vmand %vm1358_vm11, %vm1361_vm13  ;;  %s8606_s27 = smov (!%p170_p11, %s5566_s27), 1 }
 0x14e   : > { %v5157_v29 = vmax.f32 %v1319_v58, %v1320_v49  ;;  %vm5184_vm2 = vmand %vm1359_vm12, %vm1362_vm14  ;;  %v1369_v31 = vsel %vm5168_vm0, %v4519_v47, -inf  ;;  %v1371_v58 = vsel %vm5168_vm0, %v4525_v34, -inf  ;;  %v1373_v36 = vsel %vm5168_vm0, %v4531_v46, -inf  ;;  %s172_s28 = scvt.s32.f32 %s8606_s27 }
 0x14f   : > { %v1375_v60 = vsel %vm5168_vm0, %v4537_v38, -inf  ;;  %v1370_v47 = vsel %vm5184_vm2, %v4546_v13, -inf  ;;  %v1372_v34 = vsel %vm5184_vm2, %v4552_v19, -inf  ;;  %v1374_v46 = vsel %vm5184_vm2, %v4558_v54, -inf }
 0x150   : > { %v1376_v38 = vsel %vm5184_vm2, %v4564_v24, -inf  ;;  %v1377_v49 = vsel %vm5168_vm0, %v4570_v40, -inf  ;;  %v1378_v13 = vsel %vm5184_vm2, %v4576_v43, -inf  ;;  %v1379_v19 = vsel %vm5168_vm0, %v4582_v12, -inf  ;;  %s5689_s29 = smul.f32 %s3529_s9, %s172_s28 }
 0x151   : > { %v1380_v54 = vsel %vm5184_vm2, %v4588_v53, -inf  ;;  %v1381_v24 = vsel %vm5168_vm0, %v4594_v32, -inf  ;;  %v1382_v40 = vsel %vm5184_vm2, %v4600_v10, -inf  ;;  %v1383_v43 = vsel %vm5168_vm0, %v4606_v15, -inf }
 0x152   : > { %v1384_v12 = vsel %vm5184_vm2, %v4612_v44, -inf  ;;  %v1385_v53 = vsel %vm5168_vm0, %v4629_v59, -inf  ;;  %v1386_v32 = vsel %vm5184_vm2, %v4636_v33, -inf  ;;  %v1387_v10 = vsel %vm5168_vm0, %v4642_v28, -inf  ;;  %s1788_s9 = smul.f32 0.0, %s5689_s29  ;;  %s2232_s14 = sfloor.f32 %s5689_s29 }
 0x153   : > { %v1401_v3 = vsel %vm285_vm7, %v1369_v31, -inf  ;;  %v1402_v30 = vsel %vm285_vm7, %v1370_v47, -inf  ;;  %v1410_v20 = vsel %vm285_vm7, %v1371_v58, -inf  ;;  %v1411_v62 = vsel %vm285_vm7, %v1372_v34, -inf  ;;  %s2239_s12 = smul.f32 2.0, %s5689_s29  ;;  %s3347_s15 = scvt.f32.s32 %s2232_s14 }
 0x154   : > { %v1403_v17 = vmax.f32 %v1401_v3, %v1402_v30  ;;  %v1419_v26 = vsel %vm285_vm7, %v1373_v36, -inf  ;;  %v1420_v48 = vsel %vm285_vm7, %v1374_v46, -inf  ;;  %v1412_v5 = vmax.f32 %v1410_v20, %v1411_v62  ;;  %s5754_s4 = sfloor.f32 %s1788_s9  ;;  %s2354_s19 = smul.f32 3.0, %s5689_s29 }
 0x155   : > { %v1421_v55 = vmax.f32 %v1419_v26, %v1420_v48  ;;  %v1428_v50 = vsel %vm285_vm7, %v1375_v60, -inf  ;;  %v1429_v16 = vsel %vm285_vm7, %v1376_v38, -inf  ;;  %v1437_v31 = vsel %vm285_vm7, %v1377_v49, -inf  ;;  %s3343_s6 = scvt.f32.s32 %s5754_s4  ;;  %s6337_s13 = sceil.f32 %s2239_s12 }
 0x156   : > { %v1404_v41 = vrot.slane %v1403_v17, 4  ;;  %v1430_v2 = vmax.f32 %v1428_v50, %v1429_v16  ;;  %v1438_v47 = vsel %vm285_vm7, %v1378_v13, -inf  ;;  %v1413_v58 = vrot.slane %v1412_v5, 4  ;;  %s6571_s23 = sfloor.f32 %s2239_s12  ;;  %s6585_s25 = sceil.f32 %s2354_s19 }
 0x157   : > { %v1422_v30 = vrot.slane %v1421_v55, 4  ;;  %v1439_v3 = vmax.f32 %v1437_v31, %v1438_v47  ;;  %v1446_v34 = vsel %vm285_vm7, %v1379_v19, -inf  ;;  %v1447_v62 = vsel %vm285_vm7, %v1380_v54, -inf  ;;  %s5801_s10 = sadd.s32 %s3343_s6, %s5478_s24  ;;  %s3351_s27 = scvt.f32.s32 %s6571_s23 }
 0x158   : > { %v1405_v36 = vmax.f32 %v1403_v17, %v1404_v41  ;;  %v1431_v44 = vrot.slane %v1430_v2, 4  ;;  %v1455_v48 = vsel %vm285_vm7, %v1381_v24, -inf  ;;  %v1414_v26 = vmax.f32 %v1412_v5, %v1413_v58  ;;  %v8149_v24 = vld [vmem:[#allocation63_spill] sm:$0xff]  ;;  %p1792_p0 = scmp.gt.s32.totalorder %s5801_s10, 0  ;;  %p3174_p2 = scmp.lt.s32.totalorder %s5801_s10, 16 }
 0x159   : > { %v1423_v20 = vmax.f32 %v1421_v55, %v1422_v30  ;;  %v1440_v60 = vrot.slane %v1439_v3, 4  ;;  %v1448_v46 = vmax.f32 %v1446_v34, %v1447_v62  ;;  %v1456_v49 = vsel %vm285_vm7, %v1382_v40, -inf  ;;  %v8150_v34 = vld [vmem:[#allocation64_spill] sm:$0xff]  ;;  %s3353_s28 = scvt.f32.s32 %s6585_s25  ;;  %s6628_s9 = sadd.s32 %s3351_s27, %s5478_s24 }
 0x15a   : > { %v1406_v50 = vrot.slane %v1405_v36, 2  ;;  %v1432_v16 = vmax.f32 %v1430_v2, %v1431_v44  ;;  %v1464_v38 = vsel %vm285_vm7, %v1383_v43, -inf  ;;  %v1415_v13 = vrot.slane %v1414_v26, 2  ;;  %s1793_s11 = scalar_select %p1792_p0, %s5801_s10, 0 }
 0x15b   : > { %v1424_v31 = vrot.slane %v1423_v20, 2  ;;  %v1441_v47 = vmax.f32 %v1439_v3, %v1440_v60  ;;  %v1449_v19 = vrot.slane %v1448_v46, 4  ;;  %v1457_v15 = vmax.f32 %v1455_v48, %v1456_v49  ;;  %v8152_v60 = vld [vmem:[#allocation66_spill] sm:$0xff]  ;;  %p2350_p9 = scmp.gt.s32.totalorder %s6628_s9, 0  ;;  %p3194_p11 = scmp.lt.s32.totalorder %s6628_s9, 16 }
 0x15c   : > { %v1407_v17 = vmax.f32 %v1405_v36, %v1406_v50  ;;  %v1433_v41 = vrot.slane %v1432_v16, 2  ;;  %v1465_v54 = vsel %vm285_vm7, %v1384_v12, -inf  ;;  %v1393_v55 = vsel %vm5168_vm0, %v8149_v24, -inf  ;;  %v8151_v36 = vld [vmem:[#allocation65_spill] sm:$0xff]  ;;  %s8610_s11 = smov (!%p3174_p2, %s1793_s11), 16  ;;  %s6762_s10 = sfloor.f32 %s2354_s19 }
 0x15d   : > { %v1416_v5 = vmax.f32 %v1414_v26, %v1415_v13  ;;  %v1425_v2 = vmax.f32 %v1423_v20, %v1424_v31  ;;  %v1442_v44 = vrot.slane %v1441_v47, 2  ;;  %v1450_v58 = vmax.f32 %v1448_v46, %v1449_v19  ;;  %v8153_v20 = vld [vmem:[#allocation67_spill] sm:$0xff]  ;;  %v8155_v31 = vld [vmem:[#allocation69_spill] sm:$0xff]  ;;  %s2584_s14 = smul.f32 5.0, %s5689_s29 }
 0x15e   : > { %v1408_v40 = vrot.slane %v1407_v17, 1  ;;  %v1458_v43 = vrot.slane %v1457_v15, 4  ;;  %v1466_v30 = vmax.f32 %v1464_v38, %v1465_v54  ;;  %v1394_v3 = vsel %vm5184_vm2, %v8150_v34, -inf  ;;  %v8154_v38 = vld [vmem:[#allocation68_spill] sm:$0xff] }
 0x15f   : > { %v1395_v12 = vsel %vm5168_vm0, %v8151_v36, -inf  ;;  %v1417_v62 = vrot.slane %v1416_v5, 1  ;;  %v1434_v48 = vmax.f32 %v1432_v16, %v1433_v41  ;;  %v1396_v26 = vsel %vm5184_vm2, %v8152_v60, -inf }
 0x160   : > { %v1397_v46 = vsel %vm5168_vm0, %v8153_v20, -inf  ;;  %v1426_v50 = vrot.slane %v1425_v2, 1  ;;  %v1467_v49 = vrot.slane %v1466_v30, 4  ;;  %v1398_v13 = vsel %vm5184_vm2, %v8154_v38, -inf }
 0x161   : > { %v1399_v16 = vsel %vm5168_vm0, %v8155_v31, -inf  ;;  %v1400_v19 = vsel %vm5184_vm2, %v4727_v56, -inf  ;;  %v1443_v41 = vmax.f32 %v1441_v47, %v1442_v44  ;;  %v5316_v54 = vmax.f32 %v1407_v17, %v1408_v40 }
 0x162   : > { %v1451_v24 = vrot.slane %v1450_v58, 2  ;;  %v1459_v34 = vmax.f32 %v1457_v15, %v1458_v43  ;;  %v1473_v36 = vsel %vm285_vm7, %v1385_v53, -inf  ;;  %v5324_v60 = vmax.f32 %v1416_v5, %v1417_v62 }
 0x163   : > { %8156 = vst [vmem:[#allocation58_spill] sm:$0xff] %v5316_v54  ;;  %v1435_v20 = vrot.slane %v1434_v48, 1  ;;  %v1474_v47 = vsel %vm285_vm7, %v1386_v32, -inf  ;;  %v1482_v15 = vsel %vm285_vm7, %v1387_v10, -inf  ;;  %v5340_v59 = vmax.f32 %v1425_v2, %v1426_v50 }
 0x164   : > { %v1468_v53 = vmax.f32 %v1466_v30, %v1467_v49  ;;  %v1475_v17 = vmax.f32 %v1473_v36, %v1474_v47  ;;  %v8157_v33 = vsel %vm5184_vm2, %v8125_v52, -inf  ;;  %v1444_v28 = vrot.slane %v1443_v41, 1 }
 0x165   : > { %v1483_v32 = vsel %vm285_vm7, %v8157_v33, -inf  ;;  %v8158_v5 = vsel %vm5168_vm0, %v8126_v6, -inf  ;;  %v8159_v44 = vsel %vm5184_vm2, %v8127_v21, -inf  ;;  %v5362_v40 = vmax.f32 %v1450_v58, %v1451_v24 }
 0x166   : > { %v1484_v10 = vmax.f32 %v1482_v15, %v1483_v32  ;;  %v1491_v2 = vsel %vm285_vm7, %v8158_v5, -inf  ;;  %v1492_v52 = vsel %vm285_vm7, %v8159_v44, -inf  ;;  %v1460_v43 = vrot.slane %v1459_v34, 2 }
 0x167   : > { %v1476_v30 = vrot.slane %v1475_v17, 4  ;;  %v1493_v62 = vmax.f32 %v1491_v2, %v1492_v52  ;;  %v8160_v6 = vsel %vm5168_vm0, %v8147_v35, -inf  ;;  %v8161_v21 = vsel %vm5184_vm2, %v8148_v45, -inf }
 0x168   : > { %v1485_v50 = vrot.slane %v1484_v10, 4  ;;  %v1500_v49 = vsel %vm285_vm7, %v8160_v6, -inf  ;;  %v1501_v38 = vsel %vm285_vm7, %v8161_v21, -inf  ;;  %v1509_v58 = vsel %vm285_vm7, %v1393_v55, -inf }
 0x169   : > { %v5379_v24 = vmax.f32 %v1434_v48, %v1435_v20  ;;  %v1469_v36 = vrot.slane %v1468_v53, 2  ;;  %v1477_v35 = vmax.f32 %v1475_v17, %v1476_v30  ;;  %v1494_v47 = vrot.slane %v1493_v62, 4 }
 0x16a   : > { %v1486_v15 = vmax.f32 %v1484_v10, %v1485_v50  ;;  %v1502_v33 = vmax.f32 %v1500_v49, %v1501_v38  ;;  %v1510_v45 = vsel %vm285_vm7, %v1394_v3, -inf  ;;  %v1518_v32 = vsel %vm285_vm7, %v1395_v12, -inf }
 0x16b   : > { %8162 = vst [vmem:[#allocation59_spill] sm:$0xff] %v5379_v24  ;;  %v5383_v5 = vmax.f32 %v1443_v41, %v1444_v28  ;;  %v1478_v55 = vrot.slane %v1477_v35, 2  ;;  %v1495_v2 = vmax.f32 %v1493_v62, %v1494_v47  ;;  %v1511_v44 = vmax.f32 %v1509_v58, %v1510_v45 }
 0x16c   : > { %v1461_v48 = vmax.f32 %v1459_v34, %v1460_v43  ;;  %v1487_v20 = vrot.slane %v1486_v15, 2  ;;  %v1503_v17 = vrot.slane %v1502_v33, 4  ;;  %v1519_v52 = vsel %vm285_vm7, %v1396_v26, -inf }
 0x16d   : > { %8163 = vst [vmem:[#allocation60_spill] sm:$0xff] %v5383_v5  ;;  %v1496_v3 = vrot.slane %v1495_v2, 2  ;;  %v1512_v12 = vrot.slane %v1511_v44, 4  ;;  %v1520_v41 = vmax.f32 %v1518_v32, %v1519_v52  ;;  %v1527_v28 = vsel %vm285_vm7, %v1397_v46, -inf }
 0x16e   : > { %v1470_v10 = vmax.f32 %v1468_v53, %v1469_v36  ;;  %v1479_v30 = vmax.f32 %v1477_v35, %v1478_v55  ;;  %v1504_v62 = vmax.f32 %v1502_v33, %v1503_v17  ;;  %v1528_v34 = vsel %vm285_vm7, %v1398_v13, -inf }
 0x16f   : > { %v1488_v26 = vmax.f32 %v1486_v15, %v1487_v20  ;;  %v1513_v43 = vmax.f32 %v1511_v44, %v1512_v12  ;;  %v1521_v50 = vrot.slane %v1520_v41, 4  ;;  %v1536_v6 = vsel %vm285_vm7, %v1399_v16, -inf }
 0x170   : > { %v1497_v46 = vmax.f32 %v1495_v2, %v1496_v3  ;;  %v1505_v53 = vrot.slane %v1504_v62, 2  ;;  %v1529_v49 = vmax.f32 %v1527_v28, %v1528_v34  ;;  %v1537_v13 = vsel %vm285_vm7, %v1400_v19, -inf }
 0x171   : > { %v1453_v22 = vrot.slane %v5362_v40, 1  ;;  %v1462_v31 = vrot.slane %v1461_v48, 1  ;;  %v1514_v16 = vrot.slane %v1513_v43, 2  ;;  %v1522_v21 = vmax.f32 %v1520_v41, %v1521_v50  ;;  %v5614_v50 = vld [vmem:[%s3552_s22 + $0xa0] sm:$0xff] }
 0x172   : > { %v1471_v38 = vrot.slane %v1470_v10, 1  ;;  %v1506_v58 = vmax.f32 %v1504_v62, %v1505_v53  ;;  %v1530_v51 = vrot.slane %v1529_v49, 4  ;;  %v1538_v36 = vmax.f32 %v1536_v6, %v1537_v13  ;;  %v5633_v6 = vld [vmem:[%s3552_s22 + $0xb8] sm:$0xff]  ;;  %v5645_v13 = vld [vmem:[%s3552_s22 + $0xc8] sm:$0xff] }
 0x173   : > { %v1480_v56 = vrot.slane %v1479_v30, 1  ;;  %v1489_v19 = vrot.slane %v1488_v26, 1  ;;  %v1515_v35 = vmax.f32 %v1513_v43, %v1514_v16  ;;  %v1523_v47 = vrot.slane %v1522_v21, 2 }
 0x174   : > { %v1498_v15 = vrot.slane %v1497_v46, 1  ;;  %v1531_v33 = vmax.f32 %v1529_v49, %v1530_v51  ;;  %v1539_v45 = vrot.slane %v1538_v36, 4  ;;  %v1547_v32 = vstv %s5412_s30  ;;  %v5584_v51 = vld [vmem:[%s3552_s22 + $0x78] sm:$0xff]  ;;  %s3349_s30 = scvt.f32.s32 %s6337_s13 }
 0x175   : > { %v5429_v55 = vmax.f32 %v5362_v40, %v1453_v22  ;;  %v1507_v2 = vrot.slane %v1506_v58, 1  ;;  %v1516_v44 = vrot.slane %v1515_v35, 1  ;;  %v1524_v20 = vmax.f32 %v1522_v21, %v1523_v47  ;;  %v3427_v47 = vld [vmem:[%s3552_s22 + $0x60] sm:$0xff]  ;;  %v5608_v49 = vld [vmem:[%s3552_s22 + $0x98] sm:$0xff] }
 0x176   : > { %v5432_v17 = vmax.f32 %v1461_v48, %v1462_v31  ;;  %v5434_v52 = vmax.f32 %v1470_v10, %v1471_v38  ;;  %v1532_v3 = vrot.slane %v1531_v33, 2  ;;  %v1540_v12 = vmax.f32 %v1538_v36, %v1539_v45  ;;  %v3424_v45 = vld [vmem:[%s3552_s22 + $0x48] sm:$0xff] }
 0x177   : > { %8164 = vst [vmem:[#allocation61_spill] sm:$0xff] %v5429_v55  ;;  %v5438_v41 = vmax.f32 %v1479_v30, %v1480_v56  ;;  %v5440_v28 = vmax.f32 %v1488_v26, %v1489_v19  ;;  %v1525_v40 = vrot.slane %v1524_v20, 1  ;;  %vm5442_vm3 = vcmp.eq.s32.totalorder %v1547_v32, 1  ;;  %v3423_v32 = vld [vmem:[%s3552_s22 + $0x40] sm:$0xff]  ;;  %v3425_v19 = vld [vmem:[%s3552_s22 + $0x50] sm:$0xff]  ;;  %v5620_v31 = vld [vmem:[%s3552_s22 + $0xa8] sm:$0xff] }
 0x178   : > { %8165 = vst [vmem:[#allocation62_spill] sm:$0xff] %v5432_v17  ;;  %v5448_v34 = vmax.f32 %v1497_v46, %v1498_v15  ;;  %v1533_v48 = vmax.f32 %v1531_v33, %v1532_v3  ;;  %v1541_v10 = vrot.slane %v1540_v12, 2  ;;  %v5455_v26 = vmax.f32 %v1506_v58, %v1507_v2  ;;  %v3426_v33 = vld [vmem:[%s3552_s22 + $0x58] sm:$0xff]  ;;  %v5602_v30 = vld [vmem:[%s3552_s22 + $0x90] sm:$0xff] }
 0x179   : > { %8166 = vst [vmem:[#allocation63_spill] sm:$0xff] %v5434_v52  ;;  %v5457_v43 = vmax.f32 %v1515_v35, %v1516_v44  ;;  %v5471_v22 = vmax.f32 %v1524_v20, %v1525_v40  ;;  %v1580_v16 = vstv %s8602_s16  ;;  %v1583_v21 = vstv %s8604_s17  ;;  %v3415_v20 = vld [vmem:[%s3552_s22] sm:$0xff]  ;;  %v5575_v35 = vld [vmem:[%s3552_s22 + $0x68] sm:$0xff]  ;;  %s6444_s16 = sadd.s32 %s3349_s30, %s5478_s24  ;;  %s6483_s17 = sadd.s32 %s3347_s15, %s5478_s24 }
 0x17a   : > { %8167 = vst [vmem:[#allocation64_spill] sm:$0xff] %v5438_v41  ;;  %v1534_v46 = vrot.slane %v1533_v48, 1  ;;  %v1542_v53 = vmax.f32 %v1540_v12, %v1541_v10  ;;  %vm1581_vm4 = vcmp.ge.s32.totalorder %v3538_v8, %v1580_v16  ;;  %vm1582_vm5 = vcmp.ge.s32.totalorder %v3545_v9, %v1580_v16  ;;  %v3416_v12 = vld [vmem:[%s3552_s22 + $0x10] sm:$0xff]  ;;  %v5657_v41 = vld [vmem:[%s3552_s22 + $0xd8] sm:$0xff]  ;;  %p2243_p4 = scmp.gt.s32.totalorder %s6444_s16, 0  ;;  %p2235_p5 = scmp.gt.s32.totalorder %s6483_s17, 0 }
 0x17b   : > { %8168 = vst [vmem:[#allocation65_spill] sm:$0xff] %v5440_v28  ;;  %vm1584_vm8 = vcmp.lt.s32.totalorder %v3538_v8, %v1583_v21  ;;  %vm1585_vm11 = vcmp.lt.s32.totalorder %v3545_v9, %v1583_v21  ;;  %v3419_v21 = vld [vmem:[%s3552_s22 + $0x8] sm:$0xff]  ;;  %vm1928_vm0 = vcmask 1041409   ;;  %vm1931_vm2 = vcmask 1042434   ;;  %p3189_p6 = scmp.lt.s32.totalorder %s6444_s16, 16  ;;  %p3184_p7 = scmp.lt.s32.totalorder %s6483_s17, 16 }
 0x17c   : > { %8171 = vst [vmem:[#allocation66_spill] sm:$0xff] %v5448_v34  ;;  %v5482_v38 = vmax.f32 %v1533_v48, %v1534_v46  ;;  %v1543_v58 = vrot.slane %v1542_v53, 1  ;;  %vm5505_vm12 = vmand %vm1581_vm4, %vm1584_vm8  ;;  %v3417_v48 = vld [vmem:[%s3552_s22 + $0x20] sm:$0xff]  ;;  %v5537_v46 = vld [vmem:[%s3552_s22 + $0x30] sm:$0xff]  ;;  %vm1934_vm4 = vcmask 1043459   ;;  %vm7956_vm8 = vcmask 1045509  }
 0x17d   : > { %8172 = vst [vmem:[#allocation67_spill] sm:$0xff] %v5455_v26  ;;  %vm5521_vm13 = vmand %vm1582_vm5, %vm1585_vm11  ;;  %v1592_v3 = vsel %vm5505_vm12, %v3415_v20, -inf  ;;  %v1594_v40 = vsel %vm5505_vm12, %v3416_v12, -inf  ;;  %v1596_v10 = vsel %vm5505_vm12, %v3417_v48, -inf  ;;  %v3420_v20 = vld [vmem:[%s3552_s22 + $0x18] sm:$0xff]  ;;  %v3421_v48 = vld [vmem:[%s3552_s22 + $0x28] sm:$0xff] }
 0x17e   : > { %8173 = vst [vmem:[#allocation68_spill] sm:$0xff] %v5457_v43  ;;  %v5494_v56 = vmax.f32 %v1542_v53, %v1543_v58  ;;  %v1598_v53 = vsel %vm5505_vm12, %v5537_v46, -inf  ;;  %v1593_v58 = vsel %vm5521_vm13, %v3419_v21, -inf  ;;  %v1595_v12 = vsel %vm5521_vm13, %v3420_v20, -inf  ;;  %v3422_v46 = vld [vmem:[%s3552_s22 + $0x38] sm:$0xff]  ;;  %s6557_s21 = scalar_select %p2243_p4, %s6444_s16, 0 }
 0x17f   : > { %8174 = vst [vmem:[#allocation69_spill] sm:$0xff] %v5471_v22  ;;  %v1597_v2 = vsel %vm5521_vm13, %v3421_v48, -inf  ;;  %v1599_v16 = vsel %vm5521_vm13, %v3422_v46, -inf  ;;  %v1600_v21 = vsel %vm5505_vm12, %v3423_v32, -inf  ;;  %v1601_v20 = vsel %vm5521_vm13, %v3424_v45, -inf  ;;  %v3429_v45 = vld [vmem:[%s3552_s22 + $0x70] sm:$0xff] }
 0x180   : > { %8175 = vst [vmem:[#allocation87_spill] sm:$0xff] %v5482_v38  ;;  %v1602_v48 = vsel %vm5505_vm12, %v3425_v19, -inf  ;;  %v1603_v46 = vsel %vm5521_vm13, %v3426_v33, -inf  ;;  %v1604_v32 = vsel %vm5505_vm12, %v3427_v47, -inf  ;;  %v1605_v19 = vsel %vm5521_vm13, %v5575_v35, -inf  ;;  %v5590_v47 = vld [vmem:[%s3552_s22 + $0x80] sm:$0xff] }
 0x181   : > { %8176 = vst [vmem:[#allocation88_spill] sm:$0xff] %v5494_v56  ;;  %v1606_v36 = vsel %vm5505_vm12, %v3429_v45, -inf  ;;  %v5596_v35 = vld [vmem:[%s3552_s22 + $0x88] sm:$0xff]  ;;  %v5626_v33 = vld [vmem:[%s3552_s22 + $0xb0] sm:$0xff]  ;;  %v5639_v45 = vld [vmem:[%s3552_s22 + $0xc0] sm:$0xff]  ;;  %v1624_v26 = vsel %vm285_vm7, %v1592_v3, -inf }
 0x182   : > { %v5651_v56 = vld [vmem:[%s3552_s22 + $0xd0] sm:$0xff]  ;;  %v1625_v34 = vsel %vm285_vm7, %v1593_v58, -inf  ;;  %v1633_v43 = vsel %vm285_vm7, %v1594_v40, -inf  ;;  %v1634_v52 = vsel %vm285_vm7, %v1595_v12, -inf  ;;  %v1642_v17 = vsel %vm285_vm7, %v1596_v10, -inf  ;;  %s2236_s26 = scalar_select %p2235_p5, %s6483_s17, 0 }
 0x183   : > { %v1626_v28 = vmax.f32 %v1624_v26, %v1625_v34  ;;  %v1643_v55 = vsel %vm285_vm7, %v1597_v2, -inf  ;;  %v1635_v38 = vmax.f32 %v1633_v43, %v1634_v52  ;;  %v1651_v9 = vsel %vm285_vm7, %v1598_v53, -inf  ;;  %s8612_s21 = smov (!%p3189_p6, %s6557_s21), 16  ;;  %s6907_s17 = sceil.f32 %s2584_s14 }
 0x184   : > { %v1644_v54 = vmax.f32 %v1642_v17, %v1643_v55  ;;  %v1652_v5 = vsel %vm285_vm7, %v1599_v16, -inf  ;;  %v1660_v34 = vsel %vm285_vm7, %v1600_v21, -inf  ;;  %v1661_v26 = vsel %vm285_vm7, %v1601_v20, -inf  ;;  %s8614_s26 = smov (!%p3184_p7, %s2236_s26), 16  ;;  %s3361_s19 = scvt.f32.s32 %s6907_s17 }
 0x185   : > { %v1627_v3 = vrot.slane %v1626_v28, 4  ;;  %v1653_v58 = vmax.f32 %v1651_v9, %v1652_v5  ;;  %v1636_v40 = vrot.slane %v1635_v38, 4  ;;  %v1662_v12 = vmax.f32 %v1660_v34, %v1661_v26  ;;  %p2336_p8 = scmp.le.s32.totalorder %s8612_s21, %s8614_s26 }
 0x186   : > { %v1645_v10 = vrot.slane %v1644_v54, 4  ;;  %v1669_v52 = vsel %vm285_vm7, %v1602_v48, -inf  ;;  %v1670_v43 = vsel %vm285_vm7, %v1603_v46, -inf  ;;  %v1678_v2 = vsel %vm285_vm7, %v1604_v32, -inf  ;;  %s6956_s25 = sadd.s32 %s3361_s19, %s5478_s24 }
 0x187   : > { %v1628_v55 = vmax.f32 %v1626_v28, %v1627_v3  ;;  %v1654_v17 = vrot.slane %v1653_v58, 4  ;;  %v1637_v53 = vmax.f32 %v1635_v38, %v1636_v40  ;;  %v1663_v22 = vrot.slane %v1662_v12, 4  ;;  %s6643_s4 = scalar_select %p2336_p8, 1, 0 }
 0x188   : > { %v1646_v16 = vmax.f32 %v1644_v54, %v1645_v10  ;;  %v1671_v24 = vmax.f32 %v1669_v52, %v1670_v43  ;;  %v1679_v21 = vsel %vm285_vm7, %v1605_v19, -inf  ;;  %v1687_v20 = vsel %vm285_vm7, %v1606_v36, -inf  ;;  %p2588_p6 = scmp.gt.s32.totalorder %s6956_s25, 0  ;;  %p3219_p8 = scmp.lt.s32.totalorder %s6956_s25, 16 }
 0x189   : > { %v1629_v9 = vrot.slane %v1628_v55, 2  ;;  %v1655_v5 = vmax.f32 %v1653_v58, %v1654_v17  ;;  %v1638_v34 = vrot.slane %v1637_v53, 2  ;;  %v1664_v28 = vmax.f32 %v1662_v12, %v1663_v22 }
 0x18a   : > { %v1647_v48 = vrot.slane %v1646_v16, 2  ;;  %v1672_v3 = vrot.slane %v1671_v24, 4  ;;  %v1680_v32 = vmax.f32 %v1678_v2, %v1679_v21  ;;  %v8181_v54 = vsel %vm5521_vm13, %v5584_v51, -inf  ;;  %v3443_v51 = vld [vmem:[%s3552_s22 + $0xe0] sm:$0xff] }
 0x18b   : > { %v1630_v26 = vmax.f32 %v1628_v55, %v1629_v9  ;;  %v1656_v46 = vrot.slane %v1655_v5, 2  ;;  %v1688_v38 = vsel %vm285_vm7, %v8181_v54, -inf  ;;  %v1639_v58 = vmax.f32 %v1637_v53, %v1638_v34  ;;  %v5707_v34 = vld [vmem:[%s3552_s22 + $0xf8] sm:$0xff] }
 0x18c   : > { %v1648_v40 = vmax.f32 %v1646_v16, %v1647_v48  ;;  %v1665_v19 = vrot.slane %v1664_v28, 2  ;;  %v1673_v10 = vmax.f32 %v1671_v24, %v1672_v3  ;;  %v1681_v12 = vrot.slane %v1680_v32, 4  ;;  %v5695_v16 = vld [vmem:[%s3552_s22 + $0xe8] sm:$0xff] }
 0x18d   : > { %v1631_v22 = vrot.slane %v1630_v26, 1  ;;  %v1657_v36 = vmax.f32 %v1655_v5, %v1656_v46  ;;  %v1689_v52 = vmax.f32 %v1687_v20, %v1688_v38  ;;  %v1640_v55 = vrot.slane %v1639_v58, 1  ;;  %v5701_v5 = vld [vmem:[%s3552_s22 + $0xf0] sm:$0xff]  ;;  %s1796_s22 = sceil.f32 %s5689_s29 }
 0x18e   : > { %v1649_v17 = vrot.slane %v1648_v40, 1  ;;  %v1666_v43 = vmax.f32 %v1664_v28, %v1665_v19  ;;  %v1674_v2 = vrot.slane %v1673_v10, 2  ;;  %v1620_v53 = vsel %vm5505_vm12, %v3443_v51, -inf  ;;  %s3345_s5 = scvt.f32.s32 %s1796_s22  ;;  %s6631_s22 = sadd.s32 %s3353_s28, %s5478_s24 }
 0x18f   : > { %v1621_v24 = vsel %vm5521_vm13, %v5695_v16, -inf  ;;  %v1682_v9 = vmax.f32 %v1680_v32, %v1681_v12  ;;  %v1690_v21 = vrot.slane %v1689_v52, 4  ;;  %v1622_v20 = vsel %vm5505_vm12, %v5701_v5, -inf  ;;  %p2358_p10 = scmp.gt.s32.totalorder %s6631_s22, 0  ;;  %p3199_p12 = scmp.lt.s32.totalorder %s6631_s22, 16 }
 0x190   : > { %v1623_v48 = vsel %vm5521_vm13, %v5707_v34, -inf  ;;  %v1658_v28 = vrot.slane %v1657_v36, 1  ;;  %v1675_v3 = vmax.f32 %v1673_v10, %v1674_v2  ;;  %v5712_v46 = vmax.f32 %v1630_v26, %v1631_v22  ;;  %s5793_s7 = sadd.s32 %s3345_s5, %s5478_s24 }
 0x191   : > { %v1667_v54 = vrot.slane %v1666_v43, 1  ;;  %v1691_v32 = vmax.f32 %v1689_v52, %v1690_v21  ;;  %v8182_v38 = vsel %vm5505_vm12, %v5590_v47, -inf  ;;  %v5720_v12 = vmax.f32 %v1639_v58, %v1640_v55  ;;  %p1799_p13 = scmp.gt.s32.totalorder %s5793_s7, 0  ;;  %p3179_p1 = scmp.lt.s32.totalorder %s5793_s7, 16 }
 0x192   : > { %v1696_v19 = vsel %vm285_vm7, %v8182_v38, -inf  ;;  %v5722_v51 = vmax.f32 %v1648_v40, %v1649_v17  ;;  %v8183_v10 = vsel %vm5521_vm13, %v5596_v35, -inf  ;;  %v8184_v22 = vsel %vm5505_vm12, %v5602_v30, -inf  ;;  %s2351_s5 = scalar_select %p2350_p9, %s6628_s9, 0 }
 0x193   : > { %v1697_v26 = vsel %vm285_vm7, %v8183_v10, -inf  ;;  %v1705_v52 = vsel %vm285_vm7, %v8184_v22, -inf  ;;  %v1676_v47 = vrot.slane %v1675_v3, 1  ;;  %v1683_v2 = vrot.slane %v1682_v9, 2  ;;  %s1800_s8 = scalar_select %p1799_p13, %s5793_s7, 0 }
 0x194   : > { %v1698_v21 = vmax.f32 %v1696_v19, %v1697_v26  ;;  %v8185_v58 = vsel %vm5521_vm13, %v5608_v49, -inf  ;;  %v5739_v55 = vmax.f32 %v1657_v36, %v1658_v28  ;;  %v8186_v17 = vsel %vm5505_vm12, %v5614_v50, -inf  ;;  %s2359_s6 = scalar_select %p2358_p10, %s6631_s22, 0 }
 0x195   : > { %v1706_v40 = vsel %vm285_vm7, %v8185_v58, -inf  ;;  %v1714_v30 = vsel %vm285_vm7, %v8186_v17, -inf  ;;  %v8187_v38 = vsel %vm5521_vm13, %v5620_v31, -inf  ;;  %v5752_v10 = vmax.f32 %v1666_v43, %v1667_v54  ;;  %s8608_s8 = smov (!%p3179_p1, %s1800_s8), 16  ;;  %s8616_s5 = smov (!%p3194_p11, %s2351_s5), 16 }
 0x196   : > { %v1707_v35 = vmax.f32 %v1705_v52, %v1706_v40  ;;  %v1715_v19 = vsel %vm285_vm7, %v8187_v38, -inf  ;;  %v1692_v49 = vrot.slane %v1691_v32, 2  ;;  %v1699_v26 = vrot.slane %v1698_v21, 4  ;;  %p2221_p3 = scmp.le.s32.totalorder %s8608_s8, %s8610_s11  ;;  %s8618_s6 = smov (!%p3199_p12, %s2359_s6), 16 }
 0x197   : > { %v1716_v36 = vmax.f32 %v1714_v30, %v1715_v19  ;;  %v8188_v50 = vsel %vm5505_vm12, %v5626_v33, -inf  ;;  %v8189_v31 = vsel %vm5521_vm13, %v5633_v6, -inf  ;;  %v8190_v54 = vsel %vm5505_vm12, %v5639_v45, -inf  ;;  %s2469_s7 = smul.f32 4.0, %s5689_s29  ;;  %p2451_p2 = scmp.le.s32.totalorder %s8618_s6, %s8616_s5 }
 0x198   : > { %v1708_v28 = vrot.slane %v1707_v35, 4  ;;  %v1723_v22 = vsel %vm285_vm7, %v8188_v50, -inf  ;;  %v1724_v43 = vsel %vm285_vm7, %v8189_v31, -inf  ;;  %v1732_v52 = vsel %vm285_vm7, %v8190_v54, -inf  ;;  %s6510_s18 = scalar_select %p2221_p3, 1, 0 }
 0x199   : > { %v5771_v58 = vmax.f32 %v1675_v3, %v1676_v47  ;;  %v1684_v40 = vmax.f32 %v1682_v9, %v1683_v2  ;;  %v1700_v33 = vmax.f32 %v1698_v21, %v1699_v26  ;;  %v1717_v17 = vrot.slane %v1716_v36, 4  ;;  %s6889_s16 = sfloor.f32 %s2469_s7  ;;  %s2699_s9 = smul.f32 6.0, %s5689_s29 }
 0x19a   : > { %v1709_v30 = vmax.f32 %v1707_v35, %v1708_v28  ;;  %v1725_v38 = vmax.f32 %v1723_v22, %v1724_v43  ;;  %v8191_v6 = vsel %vm5521_vm13, %v5645_v13, -inf  ;;  %v8192_v45 = vsel %vm5505_vm12, %v5651_v56, -inf  ;;  %s2589_s28 = scalar_select %p2588_p6, %s6956_s25, 0 }
 0x19b   : > { %v1733_v19 = vsel %vm285_vm7, %v8191_v6, -inf  ;;  %v1741_v3 = vsel %vm285_vm7, %v8192_v45, -inf  ;;  %v1693_v9 = vmax.f32 %v1691_v32, %v1692_v49  ;;  %v1701_v47 = vrot.slane %v1700_v33, 2  ;;  %s7093_s22 = sfloor.f32 %s2584_s14  ;;  %p134_p6 = scmp.lt.s32.totalorder %s3516_s0, 7 }
 0x19c   : > { %v1718_v2 = vmax.f32 %v1716_v36, %v1717_v17  ;;  %v1734_v21 = vmax.f32 %v1732_v52, %v1733_v19  ;;  %v1710_v35 = vrot.slane %v1709_v30, 2  ;;  %v1726_v26 = vrot.slane %v1725_v38, 4  ;;  %s8626_s28 = smov (!%p3219_p8, %s2589_s28), 16 }
 0x19d   : > { %v8193_v13 = vsel %vm5521_vm13, %v5657_v41, -inf  ;;  %v1750_v56 = vsel %vm285_vm7, %v1620_v53, -inf  ;;  %v1702_v50 = vmax.f32 %v1700_v33, %v1701_v47  ;;  %v1685_v36 = vrot.slane %v1684_v40, 1  ;;  %s8636_s0 = smov (!%p134_p6, %s3516_s0), 7 }
 0x19e   : > { %v1742_v28 = vsel %vm285_vm7, %v8193_v13, -inf  ;;  %v1719_v22 = vrot.slane %v1718_v2, 2  ;;  %v1735_v32 = vrot.slane %v1734_v21, 4  ;;  %v1711_v31 = vmax.f32 %v1709_v30, %v1710_v35 }
 0x19f   : > { %v1743_v49 = vmax.f32 %v1741_v3, %v1742_v28  ;;  %v1727_v43 = vmax.f32 %v1725_v38, %v1726_v26  ;;  %v1751_v41 = vsel %vm285_vm7, %v1621_v24, -inf  ;;  %v1759_v33 = vsel %vm285_vm7, %v1622_v20, -inf }
 0x1a0   : > { %v1720_v53 = vmax.f32 %v1718_v2, %v1719_v22  ;;  %v1736_v54 = vmax.f32 %v1734_v21, %v1735_v32  ;;  %v1694_v17 = vrot.slane %v1693_v9, 1  ;;  %v1752_v16 = vmax.f32 %v1750_v56, %v1751_v41 }
 0x1a1   : > { %v1744_v52 = vrot.slane %v1743_v49, 4  ;;  %v1728_v30 = vrot.slane %v1727_v43, 2  ;;  %v1760_v24 = vsel %vm285_vm7, %v1623_v48, -inf  ;;  %v1703_v38 = vrot.slane %v1702_v50, 1 }
 0x1a2   : > { %v1712_v15 = vrot.slane %v1711_v31, 1  ;;  %v1737_v5 = vrot.slane %v1736_v54, 2  ;;  %v1721_v6 = vrot.slane %v1720_v53, 1  ;;  %v1753_v45 = vrot.slane %v1752_v16, 4 }
 0x1a3   : > { %v1745_v20 = vmax.f32 %v1743_v49, %v1744_v52  ;;  %v1729_v19 = vmax.f32 %v1727_v43, %v1728_v30  ;;  %v1761_v3 = vmax.f32 %v1759_v33, %v1760_v24  ;;  %v5820_v47 = vmax.f32 %v1684_v40, %v1685_v36 }
 0x1a4   : > { %v1738_v44 = vmax.f32 %v1736_v54, %v1737_v5  ;;  %v1770_v48 = vstv %s5811_s1  ;;  %v5823_v2 = vmax.f32 %v1693_v9, %v1694_v17  ;;  %v1754_v35 = vmax.f32 %v1752_v16, %v1753_v45  ;;  %s6767_s1 = sceil.f32 %s2469_s7 }
 0x1a5   : > { %v1746_v34 = vrot.slane %v1745_v20, 2  ;;  %v1730_v21 = vrot.slane %v1729_v19, 1  ;;  %v1762_v26 = vrot.slane %v1761_v3, 4  ;;  %v5828_v13 = vmax.f32 %v1702_v50, %v1703_v38 }
 0x1a6   : > { %v5830_v28 = vmax.f32 %v1711_v31, %v1712_v15  ;;  %v1739_v56 = vrot.slane %v1738_v44, 1  ;;  %v5835_v40 = vmax.f32 %v1720_v53, %v1721_v6  ;;  %v1755_v32 = vrot.slane %v1754_v35, 2 }
 0x1a7   : > { %v1747_v22 = vmax.f32 %v1745_v20, %v1746_v34  ;;  %v1763_v49 = vmax.f32 %v1761_v3, %v1762_v26  ;;  %vm5837_vm14 = vcmp.eq.s32.totalorder %v1770_v48, 1  ;;  %v5842_v36 = vmax.f32 %v1729_v19, %v1730_v21  ;;  %v8201_v20 = vld [vmem:[#allocation19_spill] sm:$0xff] }
 0x1a8   : > { %v5851_v41 = vmax.f32 %v1738_v44, %v1739_v56  ;;  %v1756_v53 = vmax.f32 %v1754_v35, %v1755_v32  ;;  %v8197_v56 = vld [vmem:[#allocation20_spill] sm:$0xff]  ;;  %v8202_v48 = vsel %vm3868_vm9, 0.0, %v8201_v20  ;;  %vm7970_vm5 = vcmask 1044484  }
 0x1a9   : > { %v1748_v43 = vrot.slane %v1747_v22, 1  ;;  %v1764_v54 = vrot.slane %v1763_v49, 2  ;;  %v8207_v20 = vld [vmem:[#allocation24_spill] sm:$0xff]  ;;  %vm7955_vm11 = vcmask 1046534   ;;  %vm7945_vm12 = vcmask 1047559  }
 0x1aa   : > { %v1757_v24 = vrot.slane %v1756_v53, 1  ;;  %v8391_v62 = vsel %vm5837_vm14, 0.0, %v5739_v55  ;;  %v8394_v55 = vsel %vm5837_vm14, 0.0, %v5771_v58 }
 0x1ab   : > { %v5858_v33 = vmax.f32 %v1747_v22, %v1748_v43  ;;  %v1765_v38 = vmax.f32 %v1763_v49, %v1764_v54  ;;  %v8198_v22 = vsel %vm3868_vm9, 0.0, %v8197_v56  ;;  %v8205_v43 = vld [vmem:[#allocation23_spill] sm:$0xff] }
 0x1ac   : > { %v5889_v3 = vmax.f32 %v1756_v53, %v1757_v24  ;;  %v1927_v32 = vrot.slane %v8198_v22, 7  ;;  %v8199_v53 = vld [vmem:[#allocation21_spill] sm:$0xff]  ;;  %v8206_v34 = vsel %vm3868_vm9, 0.0, %v8205_v43 }
 0x1ad   : > { %v1766_v44 = vrot.slane %v1765_v38, 1  ;;  %v8200_v54 = vsel %vm3868_vm9, 0.0, %v8199_v53  ;;  %v1936_v45 = vrot.slane %v8206_v34, 4  ;;  %v8403_v27 = vsel %vm5837_vm14, 0.0, %v5858_v33 }
 0x1ae   : > { %v1930_v24 = vrot.slane %v8200_v54, 6  ;;  %v1929_v56 = vsel %vm1928_vm0, %v1927_v32, %v8202_v48  ;;  %v8208_v48 = vsel %vm3868_vm9, 0.0, %v8207_v20  ;;  %v8213_v20 = vld [vmem:[#allocation28_spill] sm:$0xff]  ;;  %v8406_v33 = vsel %vm5837_vm14, 0.0, %v5828_v13 }
 0x1af   : > { %v5903_v49 = vmax.f32 %v1765_v38, %v1766_v44  ;;  %v8203_v38 = vld [vmem:[#allocation22_spill] sm:$0xff]  ;;  %v1939_v32 = vrot.slane %v8208_v48, 3  ;;  %v8214_v48 = vsel %vm3868_vm9, 0.0, %v8213_v20 }
 0x1b0   : > { %v8204_v44 = vsel %vm3868_vm9, 0.0, %v8203_v38  ;;  %v1932_v54 = vsel %vm1931_vm2, %v1930_v24, %v1929_v56  ;;  %v8211_v24 = vld [vmem:[#allocation26_spill] sm:$0xff] }
 0x1b1   : > { %v1933_v22 = vrot.slane %v8204_v44, 5  ;;  %v8209_v44 = vld [vmem:[#allocation25_spill] sm:$0xff]  ;;  %v8212_v56 = vsel %vm3868_vm9, 0.0, %v8211_v24  ;;  %v8219_v24 = vld [vmem:[#allocation32_spill] sm:$0xff] }
 0x1b2   : > { %v8210_v43 = vsel %vm3868_vm9, 0.0, %v8209_v44  ;;  %v1945_v53 = vrot.slane %v8212_v56, 1  ;;  %v8215_v44 = vld [vmem:[#allocation29_spill] sm:$0xff]  ;;  %v8220_v56 = vsel %vm3868_vm9, 0.0, %v8219_v24 }
 0x1b3   : > { %v1935_v38 = vsel %vm1934_vm4, %v1933_v22, %v1932_v54  ;;  %v1942_v34 = vrot.slane %v8210_v43, 2  ;;  %v1948_v22 = vrot.slane %v8214_v48, 7  ;;  %v8216_v43 = vsel %vm3868_vm9, 0.0, %v8215_v44  ;;  %v8223_v44 = vld [vmem:[#allocation33_spill] sm:$0xff] }
 0x1b4   : > { %v1938_v19 = vsel %vm7970_vm5, %v1936_v45, %v1935_v38  ;;  %v1950_v6 = vrot.slane %v8216_v43, 6  ;;  %v8217_v45 = vld [vmem:[#allocation31_spill] sm:$0xff]  ;;  %v1954_v15 = vrot.slane %v8220_v56, 4  ;;  %v8224_v43 = vsel %vm3868_vm9, 0.0, %v8223_v44 }
 0x1b5   : > { %v1941_v54 = vsel %vm7956_vm8, %v1939_v32, %v1938_v19  ;;  %v8218_v38 = vsel %vm3868_vm9, 0.0, %v8217_v45  ;;  %v8221_v19 = vld [vmem:[#allocation27_spill] sm:$0xff]  ;;  %v1956_v16 = vrot.slane %v8224_v43, 3  ;;  %v8225_v45 = vld [vmem:[#allocation34_spill] sm:$0xff] }
 0x1b6   : > { %v1952_v5 = vrot.slane %v8218_v38, 5  ;;  %v1944_v20 = vsel %vm7955_vm11, %v1942_v34, %v1941_v54  ;;  %v8222_v32 = vsel %vm3868_vm9, 0.0, %v8221_v19  ;;  %v8226_v38 = vsel %vm3868_vm9, 0.0, %v8225_v45  ;;  %v8227_v54 = vld [vmem:[#allocation35_spill] sm:$0xff]  ;;  %v8232_v45 = vld [vmem:[#allocation37_spill] sm:$0xff] }
 0x1b7   : > { %v1949_v48 = vsel %vm1928_vm0, %v1948_v22, %v8222_v32  ;;  %v1958_v30 = vrot.slane %v8226_v38, 2  ;;  %v5975_v24 = vsel %vm7945_vm12, %v1945_v53, %v1944_v20  ;;  %v8228_v56 = vsel %vm3868_vm9, 0.0, %v8227_v54  ;;  %v8230_v32 = vld [vmem:[#allocation36_spill] sm:$0xff]  ;;  %v8267_v19 = vld [vmem:[#allocation11_spill] sm:$0xff] }
 0x1b8   : > { %v1951_v34 = vsel %vm1931_vm2, %v1950_v6, %v1949_v48  ;;  %v1960_v22 = vrot.slane %v8228_v56, 1  ;;  %v8231_v44 = vsel %vm4150_vm1, 0.0, %v8230_v32  ;;  %v8233_v38 = vsel %vm4150_vm1, 0.0, %v8232_v45  ;;  %v8234_v6 = vld [vmem:[#allocation38_spill] sm:$0xff]  ;;  %v8236_v48 = vld [vmem:[#allocation39_spill] sm:$0xff]  ;;  %v8240_v45 = vld [vmem:[#allocation40_spill] sm:$0xff] }
 0x1b9   : > { %v1962_v43 = vrot.slane %v8231_v44, 7  ;;  %v1953_v50 = vsel %vm1934_vm4, %v1952_v5, %v1951_v34  ;;  %v1964_v53 = vrot.slane %v8233_v38, 6  ;;  %v8235_v20 = vsel %vm4150_vm1, 0.0, %v8234_v6  ;;  %v8238_v5 = vld [vmem:[#allocation7_spill] sm:$0xff]  ;;  %v8242_v6 = vld [vmem:[#allocation41_spill] sm:$0xff] }
 0x1ba   : > { %v1966_v26 = vrot.slane %v8235_v20, 5  ;;  %v8237_v54 = vsel %vm4150_vm1, 0.0, %v8236_v48  ;;  %v1955_v32 = vsel %vm7970_vm5, %v1954_v15, %v1953_v50  ;;  %v8239_v34 = vsel %vm4150_vm1, 0.0, %v8238_v5  ;;  %v8244_v15 = vld [vmem:[#allocation42_spill] sm:$0xff] }
 0x1bb   : > { %v1968_v56 = vrot.slane %v8237_v54, 4  ;;  %v1963_v44 = vsel %vm1928_vm0, %v1962_v43, %v8239_v34  ;;  %v8241_v38 = vsel %vm4150_vm1, 0.0, %v8240_v45  ;;  %v8243_v20 = vsel %vm4150_vm1, 0.0, %v8242_v6  ;;  %v8246_v43 = vld [vmem:[#allocation44_spill] sm:$0xff]  ;;  %v8248_v6 = vld [vmem:[#allocation45_spill] sm:$0xff] }
 0x1bc   : > { %v1970_v17 = vrot.slane %v8241_v38, 3  ;;  %v1972_v52 = vrot.slane %v8243_v20, 2  ;;  %v1957_v48 = vsel %vm7956_vm8, %v1956_v16, %v1955_v32  ;;  %v1965_v50 = vsel %vm1931_vm2, %v1964_v53, %v1963_v44  ;;  %v8250_v53 = vld [vmem:[#allocation47_spill] sm:$0xff] }
 0x1bd   : > { %v8245_v54 = vsel %vm4150_vm1, 0.0, %v8244_v15  ;;  %v8247_v34 = vsel %vm4150_vm1, 0.0, %v8246_v43  ;;  %v1959_v38 = vsel %vm7955_vm11, %v1958_v30, %v1957_v48  ;;  %v1967_v31 = vsel %vm1934_vm4, %v1966_v26, %v1965_v50  ;;  %v8252_v30 = vld [vmem:[#allocation43_spill] sm:$0xff]  ;;  %v8254_v50 = vld [vmem:[#allocation48_spill] sm:$0xff] }
 0x1be   : > { %v1974_v5 = vrot.slane %v8245_v54, 1  ;;  %v1976_v45 = vrot.slane %v8247_v34, 7  ;;  %v8249_v16 = vsel %vm4150_vm1, 0.0, %v8248_v6  ;;  %v8251_v44 = vsel %vm4150_vm1, 0.0, %v8250_v53 }
 0x1bf   : > { %v1978_v32 = vrot.slane %v8249_v16, 6  ;;  %v1980_v20 = vrot.slane %v8251_v44, 5  ;;  %v6034_v15 = vsel %vm7945_vm12, %v1960_v22, %v1959_v38  ;;  %v1969_v54 = vsel %vm7970_vm5, %v1968_v56, %v1967_v31  ;;  %v8256_v22 = vld [vmem:[#allocation49_spill] sm:$0xff]  ;;  %v8258_v56 = vld [vmem:[#allocation50_spill] sm:$0xff] }
 0x1c0   : > { %v8253_v48 = vsel %vm4150_vm1, 0.0, %v8252_v30  ;;  %v8255_v43 = vsel %vm4150_vm1, 0.0, %v8254_v50  ;;  %v1971_v6 = vsel %vm7956_vm8, %v1970_v17, %v1969_v54  ;;  %v8257_v38 = vsel %vm4150_vm1, 0.0, %v8256_v22 }
 0x1c1   : > { %v1977_v26 = vsel %vm1928_vm0, %v1976_v45, %v8253_v48  ;;  %v1982_v34 = vrot.slane %v8255_v43, 4  ;;  %v1984_v31 = vrot.slane %v8257_v38, 3  ;;  %v8259_v53 = vsel %vm4150_vm1, 0.0, %v8258_v56  ;;  %v8260_v48 = vld [vmem:[#allocation51_spill] sm:$0xff] }
 0x1c2   : > { %v1979_v16 = vsel %vm1931_vm2, %v1978_v32, %v1977_v26  ;;  %v1986_v44 = vrot.slane %v8259_v53, 2  ;;  %v1973_v45 = vsel %vm7955_vm11, %v1972_v52, %v1971_v6  ;;  %v8261_v17 = vsel %vm4150_vm1, 0.0, %v8260_v48  ;;  %v8263_v26 = vld [vmem:[#allocation9_spill] sm:$0xff]  ;;  %v8265_v52 = vld [vmem:[#allocation10_spill] sm:$0xff]  ;;  %v8269_v48 = vld [vmem:[#allocation8_spill] sm:$0xff] }
 0x1c3   : > { %v1981_v30 = vsel %vm1934_vm4, %v1980_v20, %v1979_v16  ;;  %v1988_v54 = vrot.slane %v8261_v17, 1  ;;  %v8264_v50 = vsel %vm4441_vm6, 0.0, %v8263_v26  ;;  %v6067_v22 = vsel %vm7945_vm12, %v1974_v5, %v1973_v45  ;;  %v8273_v26 = vld [vmem:[#allocation13_spill] sm:$0xff] }
 0x1c4   : > { %v1990_v43 = vrot.slane %v8264_v50, 7  ;;  %v1983_v38 = vsel %vm7970_vm5, %v1982_v34, %v1981_v30  ;;  %v8266_v6 = vsel %vm4441_vm6, 0.0, %v8265_v52  ;;  %v8268_v16 = vsel %vm4441_vm6, 0.0, %v8267_v19  ;;  %v8271_v34 = vld [vmem:[#allocation12_spill] sm:$0xff] }
 0x1c5   : > { %v1992_v20 = vrot.slane %v8266_v6, 6  ;;  %v1994_v56 = vrot.slane %v8268_v16, 5  ;;  %v1985_v53 = vsel %vm7956_vm8, %v1984_v31, %v1983_v38  ;;  %v8270_v17 = vsel %vm4441_vm6, 0.0, %v8269_v48  ;;  %v8275_v38 = vld [vmem:[#allocation14_spill] sm:$0xff] }
 0x1c6   : > { %v1991_v5 = vsel %vm1928_vm0, %v1990_v43, %v8270_v17  ;;  %v8272_v45 = vsel %vm4441_vm6, 0.0, %v8271_v34  ;;  %v8274_v50 = vsel %vm4441_vm6, 0.0, %v8273_v26  ;;  %v1987_v6 = vsel %vm7955_vm11, %v1986_v44, %v1985_v53  ;;  %v8277_v43 = vld [vmem:[#allocation15_spill] sm:$0xff]  ;;  %v8280_v44 = vld [vmem:[#allocation17_spill] sm:$0xff] }
 0x1c7   : > { %v1996_v30 = vrot.slane %v8272_v45, 4  ;;  %v1998_v52 = vrot.slane %v8274_v50, 3  ;;  %v1993_v31 = vsel %vm1931_vm2, %v1992_v20, %v1991_v5  ;;  %v8276_v19 = vsel %vm4441_vm6, 0.0, %v8275_v38  ;;  %v8282_v5 = vld [vmem:[#allocation18_spill] sm:$0xff] }
 0x1c8   : > { %v2000_v16 = vrot.slane %v8276_v19, 2  ;;  %v8278_v48 = vsel %vm4441_vm6, 0.0, %v8277_v43  ;;  %v6103_v34 = vsel %vm7945_vm12, %v1988_v54, %v1987_v6  ;;  %v1995_v45 = vsel %vm1934_vm4, %v1994_v56, %v1993_v31  ;;  %v8284_v19 = vld [vmem:[#allocation53_spill] sm:$0xff]  ;;  %v8286_v56 = vld [vmem:[#allocation54_spill] sm:$0xff] }
 0x1c9   : > { %v2002_v17 = vrot.slane %v8278_v48, 1  ;;  %8279 = vst [vmem:[#allocation30_spill] sm:$0xff] %v6103_v34  ;;  %v8281_v53 = vsel %vm4441_vm6, 0.0, %v8280_v44  ;;  %v8283_v26 = vsel %vm4441_vm6, 0.0, %v8282_v5  ;;  %v1997_v38 = vsel %vm7970_vm5, %v1996_v30, %v1995_v45  ;;  %v8288_v48 = vld [vmem:[#allocation55_spill] sm:$0xff]  ;;  %v8290_v30 = vld [vmem:[#allocation16_spill] sm:$0xff] }
 0x1ca   : > { %v2004_v20 = vrot.slane %v8281_v53, 7  ;;  %v2006_v50 = vrot.slane %v8283_v26, 6  ;;  %v8285_v43 = vsel %vm4441_vm6, 0.0, %v8284_v19  ;;  %v8287_v6 = vsel %vm4441_vm6, 0.0, %v8286_v56  ;;  %v8292_v19 = vld [vmem:[#allocation56_spill] sm:$0xff]  ;;  %v8294_v56 = vld [vmem:[#allocation57_spill] sm:$0xff] }
 0x1cb   : > { %v2008_v54 = vrot.slane %v8285_v43, 5  ;;  %v2010_v31 = vrot.slane %v8287_v6, 4  ;;  %v8289_v44 = vsel %vm4441_vm6, 0.0, %v8288_v48  ;;  %v1999_v5 = vsel %vm7956_vm8, %v1998_v52, %v1997_v38 }
 0x1cc   : > { %v2012_v53 = vrot.slane %v8289_v44, 3  ;;  %v8291_v45 = vsel %vm4441_vm6, 0.0, %v8290_v30  ;;  %v8293_v43 = vsel %vm4441_vm6, 0.0, %v8292_v19  ;;  %v8295_v6 = vsel %vm4441_vm6, 0.0, %v8294_v56  ;;  %v8297_v44 = vld [vmem:[#allocation71_spill] sm:$0xff] }
 0x1cd   : > { %v2005_v26 = vsel %vm1928_vm0, %v2004_v20, %v8291_v45  ;;  %v2014_v35 = vrot.slane %v8293_v43, 2  ;;  %v2016_v21 = vrot.slane %v8295_v6, 1  ;;  %v2001_v48 = vsel %vm7955_vm11, %v2000_v16, %v1999_v5  ;;  %v8299_v20 = vld [vmem:[#allocation72_spill] sm:$0xff]  ;;  %v8302_v16 = vld [vmem:[#allocation73_spill] sm:$0xff] }
 0x1ce   : > { %v2007_v52 = vsel %vm1931_vm2, %v2006_v50, %v2005_v26  ;;  %v8298_v30 = vsel %vm4830_vm15, 0.0, %v8297_v44  ;;  %v8300_v45 = vsel %vm4830_vm15, 0.0, %v8299_v20  ;;  %v6152_v43 = vsel %vm7945_vm12, %v2002_v17, %v2001_v48  ;;  %v8304_v26 = vld [vmem:[#allocation74_spill] sm:$0xff] }
 0x1cf   : > { %v2018_v34 = vrot.slane %v8298_v30, 7  ;;  %v2020_v19 = vrot.slane %v8300_v45, 6  ;;  %8301 = vst [vmem:[#allocation20_spill] sm:$0xff] %v6152_v43  ;;  %v2009_v32 = vsel %vm1934_vm4, %v2008_v54, %v2007_v52  ;;  %v8303_v5 = vsel %vm4830_vm15, 0.0, %v8302_v16  ;;  %v8306_v30 = vld [vmem:[#allocation70_spill] sm:$0xff]  ;;  %v8308_v54 = vld [vmem:[#allocation75_spill] sm:$0xff] }
 0x1d0   : > { %v2022_v50 = vrot.slane %v8303_v5, 5  ;;  %v8305_v56 = vsel %vm4830_vm15, 0.0, %v8304_v26  ;;  %v2011_v44 = vsel %vm7970_vm5, %v2010_v31, %v2009_v32  ;;  %v8307_v20 = vsel %vm4830_vm15, 0.0, %v8306_v30  ;;  %v8310_v45 = vld [vmem:[#allocation76_spill] sm:$0xff]  ;;  %v8312_v32 = vld [vmem:[#allocation77_spill] sm:$0xff] }
 0x1d1   : > { %v2024_v6 = vrot.slane %v8305_v56, 4  ;;  %v2019_v17 = vsel %vm1928_vm0, %v2018_v34, %v8307_v20  ;;  %v8309_v48 = vsel %vm4830_vm15, 0.0, %v8308_v54  ;;  %v8311_v16 = vsel %vm4830_vm15, 0.0, %v8310_v45  ;;  %v8314_v34 = vld [vmem:[#allocation79_spill] sm:$0xff]  ;;  %v8316_v45 = vld [vmem:[#allocation80_spill] sm:$0xff] }
 0x1d2   : > { %v2026_v52 = vrot.slane %v8309_v48, 3  ;;  %v2028_v5 = vrot.slane %v8311_v16, 2  ;;  %v2013_v26 = vsel %vm7956_vm8, %v2012_v53, %v2011_v44  ;;  %v2021_v31 = vsel %vm1931_vm2, %v2020_v19, %v2019_v17  ;;  %v8318_v19 = vld [vmem:[#allocation81_spill] sm:$0xff] }
 0x1d3   : > { %v8313_v56 = vsel %vm4830_vm15, 0.0, %v8312_v32  ;;  %v8315_v20 = vsel %vm4830_vm15, 0.0, %v8314_v34  ;;  %v2015_v48 = vsel %vm7955_vm11, %v2014_v35, %v2013_v26  ;;  %v2023_v43 = vsel %vm1934_vm4, %v2022_v50, %v2021_v31  ;;  %v8320_v35 = vld [vmem:[#allocation78_spill] sm:$0xff]  ;;  %v8322_v31 = vld [vmem:[#allocation83_spill] sm:$0xff] }
 0x1d4   : > { %v2030_v30 = vrot.slane %v8313_v56, 1  ;;  %v2032_v54 = vrot.slane %v8315_v20, 7  ;;  %v8317_v53 = vsel %vm4830_vm15, 0.0, %v8316_v45  ;;  %v8319_v17 = vsel %vm4830_vm15, 0.0, %v8318_v19 }
 0x1d5   : > { %v2034_v44 = vrot.slane %v8317_v53, 6  ;;  %v2036_v16 = vrot.slane %v8319_v17, 5  ;;  %v6198_v32 = vsel %vm7945_vm12, %v2016_v21, %v2015_v48  ;;  %v2025_v56 = vsel %vm7970_vm5, %v2024_v6, %v2023_v43  ;;  %v8324_v21 = vld [vmem:[#allocation84_spill] sm:$0xff]  ;;  %v8326_v6 = vld [vmem:[#allocation85_spill] sm:$0xff] }
 0x1d6   : > { %v8321_v26 = vsel %vm4830_vm15, 0.0, %v8320_v35  ;;  %v8323_v34 = vsel %vm4830_vm15, 0.0, %v8322_v31  ;;  %v2027_v45 = vsel %vm7956_vm8, %v2026_v52, %v2025_v56  ;;  %v8325_v48 = vsel %vm4830_vm15, 0.0, %v8324_v21 }
 0x1d7   : > { %v2033_v50 = vsel %vm1928_vm0, %v2032_v54, %v8321_v26  ;;  %v2038_v20 = vrot.slane %v8323_v34, 4  ;;  %v2040_v43 = vrot.slane %v8325_v48, 3  ;;  %v8327_v19 = vsel %vm4830_vm15, 0.0, %v8326_v6  ;;  %v8328_v26 = vld [vmem:[#allocation86_spill] sm:$0xff] }
 0x1d8   : > { %v2035_v53 = vsel %vm1931_vm2, %v2034_v44, %v2033_v50  ;;  %v2042_v17 = vrot.slane %v8327_v19, 2  ;;  %v2029_v54 = vsel %vm7955_vm11, %v2028_v5, %v2027_v45  ;;  %v8329_v52 = vsel %vm4830_vm15, 0.0, %v8328_v26 }
 0x1d9   : > { %v2037_v35 = vsel %vm1934_vm4, %v2036_v16, %v2035_v53  ;;  %v2044_v56 = vrot.slane %v8329_v52, 1  ;;  %v8330_v44 = vsel %vm5121_vm10, 0.0, %v5060_v57  ;;  %v6231_v31 = vsel %vm7945_vm12, %v2030_v30, %v2029_v54 }
 0x1da   : > { %v2046_v50 = vrot.slane %v8330_v44, 7  ;;  %v2039_v34 = vsel %vm7970_vm5, %v2038_v20, %v2037_v35  ;;  %v8331_v5 = vsel %vm5121_vm10, 0.0, %v5067_v1  ;;  %v8332_v38 = vsel %vm5121_vm10, 0.0, %v5097_v23 }
 0x1db   : > { %v2048_v16 = vrot.slane %v8331_v5, 6  ;;  %v2050_v45 = vrot.slane %v8332_v38, 5  ;;  %v2041_v53 = vsel %vm7956_vm8, %v2040_v43, %v2039_v34  ;;  %v8333_v57 = vsel %vm5121_vm10, 0.0, %v5046_v18 }
 0x1dc   : > { %v2047_v30 = vsel %vm1928_vm0, %v2046_v50, %v8333_v57  ;;  %v8334_v20 = vsel %vm5121_vm10, 0.0, %v5109_v14  ;;  %v8335_v1 = vsel %vm5121_vm10, 0.0, %v5113_v11  ;;  %v2043_v23 = vsel %vm7955_vm11, %v2042_v17, %v2041_v53 }
 0x1dd   : > { %v2052_v21 = vrot.slane %v8334_v20, 4  ;;  %v2054_v48 = vrot.slane %v8335_v1, 3  ;;  %v2049_v43 = vsel %vm1931_vm2, %v2048_v16, %v2047_v30  ;;  %v8336_v18 = vsel %vm5121_vm10, 0.0, %v5115_v0 }
 0x1de   : > { %v2056_v6 = vrot.slane %v8336_v18, 2  ;;  %v8337_v19 = vsel %vm5121_vm10, 0.0, %v5119_v61  ;;  %v6267_v54 = vsel %vm7945_vm12, %v2044_v56, %v2043_v23  ;;  %v2051_v11 = vsel %vm1934_vm4, %v2050_v45, %v2049_v43 }
 0x1df   : > { %v2058_v14 = vrot.slane %v8337_v19, 1  ;;  %v8338_v17 = vsel %vm5121_vm10, 0.0, %v5127_v25  ;;  %v8339_v0 = vsel %vm5121_vm10, 0.0, %v5129_v37  ;;  %v2053_v61 = vsel %vm7970_vm5, %v2052_v21, %v2051_v11  ;;  %v8359_v11 = vld [vmem:[#allocation58_spill] sm:$0xff] }
 0x1e0   : > { %v2060_v35 = vrot.slane %v8338_v17, 7  ;;  %v2062_v26 = vrot.slane %v8339_v0, 6  ;;  %v8340_v52 = vsel %vm5121_vm10, 0.0, %v5134_v42  ;;  %v8341_v44 = vsel %vm5121_vm10, 0.0, %v5139_v7  ;;  %v8361_v0 = vld [vmem:[#allocation61_spill] sm:$0xff] }
 0x1e1   : > { %v2064_v56 = vrot.slane %v8340_v52, 5  ;;  %v2066_v25 = vrot.slane %v8341_v44, 4  ;;  %v8342_v50 = vsel %vm5121_vm10, 0.0, %v5141_v4  ;;  %v2055_v34 = vsel %vm7956_vm8, %v2054_v48, %v2053_v61  ;;  %v8363_v52 = vld [vmem:[#allocation62_spill] sm:$0xff] }
 0x1e2   : > { %v2068_v37 = vrot.slane %v8342_v50, 3  ;;  %v8343_v5 = vsel %vm5121_vm10, 0.0, %v5125_v39  ;;  %v8344_v7 = vsel %vm5121_vm10, 0.0, %v5145_v63  ;;  %v8345_v38 = vsel %vm5121_vm10, 0.0, %v5157_v29 }
 0x1e3   : > { %v2061_v42 = vsel %vm1928_vm0, %v2060_v35, %v8343_v5  ;;  %v2070_v16 = vrot.slane %v8344_v7, 2  ;;  %v2072_v4 = vrot.slane %v8345_v38, 1  ;;  %v2057_v45 = vsel %vm7955_vm11, %v2056_v6, %v2055_v34  ;;  %v8356_v6 = vld [vmem:[#allocation6_spill] sm:$0xff] }
 0x1e4   : > { %v2063_v53 = vsel %vm1931_vm2, %v2062_v26, %v2061_v42  ;;  %v8346_v39 = vsel %vm5442_vm3, 0.0, %v5324_v60  ;;  %v8347_v63 = vsel %vm5442_vm3, 0.0, %v5340_v59  ;;  %v8348_v20 = vstv %s8610_s11  ;;  %v8351_v60 = vld [vmem:[#allocation59_spill] sm:$0xff]  ;;  %v8353_v59 = vld [vmem:[#allocation60_spill] sm:$0xff]  ;;  %s3357_s11 = scvt.f32.s32 %s6767_s1  ;;  %s2814_s1 = smul.f32 7.0, %s5689_s29 }
 0x1e5   : > { %v2074_v57 = vrot.slane %v8346_v39, 7  ;;  %v2076_v30 = vrot.slane %v8347_v63, 6  ;;  %vm6319_vm9 = vcmp.ge.s32.totalorder %v3538_v8, %v8348_v20  ;;  %v6324_v29 = vsel %vm7945_vm12, %v2058_v14, %v2057_v45  ;;  %v8368_v42 = vld [vmem:[#allocation63_spill] sm:$0xff]  ;;  %v8370_v45 = vld [vmem:[#allocation65_spill] sm:$0xff] }
 0x1e6   : > { %v2065_v21 = vsel %vm1934_vm4, %v2064_v56, %v2063_v53  ;;  %v8352_v1 = vsel %vm5442_vm3, 0.0, %v8351_v60  ;;  %v8354_v23 = vsel %vm5442_vm3, 0.0, %v8353_v59  ;;  %v8355_v18 = vmov %v8348_v20  ;;  %v8375_v20 = vld [vmem:[#allocation66_spill] sm:$0xff]  ;;  %s6795_s13 = sadd.s32 %s3357_s11, %s5478_s24  ;;  %s7236_s29 = sceil.f32 %s2814_s1 }
 0x1e7   : > { %v2078_v48 = vrot.slane %v8352_v1, 5  ;;  %v2080_v43 = vrot.slane %v8354_v23, 4  ;;  %vm6342_vm1 = vcmp.ge.s32.totalorder %v8356_v6, %v8355_v18  ;;  %v2067_v14 = vsel %vm7970_vm5, %v2066_v25, %v2065_v21  ;;  %v8377_v1 = vld [vmem:[#allocation67_spill] sm:$0xff]  ;;  %p2473_p0 = scmp.gt.s32.totalorder %s6795_s13, 0  ;;  %p3209_p3 = scmp.lt.s32.totalorder %s6795_s13, 16 }
 0x1e8   : > { %v8360_v17 = vsel %vm5442_vm3, 0.0, %v8359_v11  ;;  %v8362_v26 = vsel %vm5442_vm3, 0.0, %v8361_v0  ;;  %v8364_v56 = vsel %vm5442_vm3, 0.0, %v8363_v52  ;;  %v8365_v50 = vstv %s8608_s8  ;;  %s3355_s8 = scvt.f32.s32 %s6762_s10  ;;  %s3369_s14 = scvt.f32.s32 %s7236_s29 }
 0x1e9   : > { %v2075_v35 = vsel %vm1928_vm0, %v2074_v57, %v8360_v17  ;;  %v2082_v61 = vrot.slane %v8362_v26, 3  ;;  %v2084_v44 = vrot.slane %v8364_v56, 2  ;;  %vm6363_vm6 = vcmp.lt.s32.totalorder %v3538_v8, %v8365_v50  ;;  %v8381_v17 = vld [vmem:[#allocation68_spill] sm:$0xff]  ;;  %s6874_s15 = scalar_select %p2473_p0, %s6795_s13, 0 }
 0x1ea   : > { %v2069_v34 = vsel %vm7956_vm8, %v2068_v37, %v2067_v14  ;;  %v2077_v5 = vsel %vm1931_vm2, %v2076_v30, %v2075_v35  ;;  %v8369_v7 = vsel %vm5442_vm3, 0.0, %v8368_v42  ;;  %v8371_v53 = vsel %vm5442_vm3, 0.0, %v8370_v45  ;;  %v8387_v45 = vld [vmem:[#allocation88_spill] sm:$0xff]  ;;  %vm6490_vm10 = vmand %vm6319_vm9, %vm6363_vm6  ;;  %s6785_s12 = sadd.s32 %s3355_s8, %s5478_s24 }
 0x1eb   : > { %v2086_v38 = vrot.slane %v8369_v7, 1  ;;  %v2088_v39 = vrot.slane %v8371_v53, 7  ;;  %v8372_v57 = vmov %v8365_v50  ;;  %v2071_v37 = vsel %vm7955_vm11, %v2070_v16, %v2069_v34  ;;  %v8379_v16 = vld [vmem:[#allocation64_spill] sm:$0xff]  ;;  %v8385_v50 = vld [vmem:[#allocation87_spill] sm:$0xff]  ;;  %p2465_p13 = scmp.gt.s32.totalorder %s6785_s12, 0  ;;  %p3204_p1 = scmp.lt.s32.totalorder %s6785_s12, 16 }
 0x1ec   : > { %vm6380_vm15 = vcmp.lt.s32.totalorder %v8356_v6, %v8372_v57  ;;  %v2079_v30 = vsel %vm1934_vm4, %v2078_v48, %v2077_v5  ;;  %v8376_v21 = vsel %vm5442_vm3, 0.0, %v8375_v20  ;;  %v8378_v59 = vsel %vm5442_vm3, 0.0, %v8377_v1  ;;  %s8622_s15 = smov (!%p3209_p3, %s6874_s15), 16 }
 0x1ed   : > { %v2090_v60 = vrot.slane %v8376_v21, 6  ;;  %v2092_v23 = vrot.slane %v8378_v59, 5  ;;  %v6397_v18 = vsel %vm7945_vm12, %v2072_v4, %v2071_v37  ;;  %v2081_v14 = vsel %vm7970_vm5, %v2080_v43, %v2079_v30  ;;  %v8383_v43 = vld [vmem:[#allocation69_spill] sm:$0xff]  ;;  %s2466_s30 = scalar_select %p2465_p13, %s6785_s12, 0 }
 0x1ee   : > { %v8380_v48 = vsel %vm5442_vm3, 0.0, %v8379_v16  ;;  %v8382_v35 = vsel %vm5442_vm3, 0.0, %v8381_v17  ;;  %v2083_v26 = vsel %vm7956_vm8, %v2082_v61, %v2081_v14  ;;  %v8384_v52 = vsel %vm5442_vm3, 0.0, %v8383_v43  ;;  %s7220_s12 = sfloor.f32 %s2699_s9 }
 0x1ef   : > { %v2089_v11 = vsel %vm1928_vm0, %v2088_v39, %v8380_v48  ;;  %v2094_v0 = vrot.slane %v8382_v35, 4  ;;  %v2096_v56 = vrot.slane %v8384_v52, 3  ;;  %v8386_v34 = vsel %vm5442_vm3, 0.0, %v8385_v50  ;;  %s8620_s30 = smov (!%p3204_p1, %s2466_s30), 16  ;;  %s3367_s13 = scvt.f32.s32 %s7220_s12 }
 0x1f0   : > { %v2091_v4 = vsel %vm1931_vm2, %v2090_v60, %v2089_v11  ;;  %v2098_v5 = vrot.slane %v8386_v34, 2  ;;  %v2085_v42 = vsel %vm7955_vm11, %v2084_v44, %v2083_v26  ;;  %v8388_v61 = vsel %vm5442_vm3, 0.0, %v8387_v45  ;;  %vm6516_vm3 = vmand %vm6342_vm1, %vm6380_vm15  ;;  %p2566_p4 = scmp.le.s32.totalorder %s8622_s15, %s8620_s30 }
 0x1f1   : > { %v2093_v7 = vsel %vm1934_vm4, %v2092_v23, %v2091_v4  ;;  %v2100_v53 = vrot.slane %v8388_v61, 1  ;;  %v8389_v39 = vsel %vm5837_vm14, 0.0, %v5720_v12  ;;  %v6430_v37 = vsel %vm7945_vm12, %v2086_v38, %v2085_v42 }
 0x1f2   : > { %v2102_v57 = vrot.slane %v8389_v39, 7  ;;  %v2095_v30 = vsel %vm7970_vm5, %v2094_v0, %v2093_v7  ;;  %v8390_v44 = vsel %vm5837_vm14, 0.0, %v5722_v51  ;;  %v2106_v21 = vrot.slane %v8391_v62, 5  ;;  %v8409_v7 = vld [vmem:[#allocation30_spill] sm:$0xff] }
 0x1f3   : > { %v2104_v20 = vrot.slane %v8390_v44, 6  ;;  %v2097_v12 = vsel %vm7956_vm8, %v2096_v56, %v2095_v30  ;;  %v8392_v38 = vsel %vm5837_vm14, 0.0, %v5712_v46  ;;  %v8393_v51 = vsel %vm5837_vm14, 0.0, %v5752_v10 }
 0x1f4   : > { %v2103_v60 = vsel %vm1928_vm0, %v2102_v57, %v8392_v38  ;;  %v2108_v1 = vrot.slane %v8393_v51, 4  ;;  %v2110_v59 = vrot.slane %v8394_v55, 3  ;;  %v2099_v23 = vsel %vm7955_vm11, %v2098_v5, %v2097_v12 }
 0x1f5   : > { %v2105_v14 = vsel %vm1931_vm2, %v2104_v20, %v2103_v60  ;;  %v8395_v46 = vsel %vm5837_vm14, 0.0, %v5820_v47  ;;  %v8396_v10 = vsel %vm5837_vm14, 0.0, %v5823_v2  ;;  %v6471_v11 = vsel %vm7945_vm12, %v2100_v53, %v2099_v23  ;;  %v8410_v53 = vld [vmem:[#allocation20_spill] sm:$0xff] }
 0x1f6   : > { %v2112_v16 = vrot.slane %v8395_v46, 2  ;;  %v2114_v48 = vrot.slane %v8396_v10, 1  ;;  %v2107_v58 = vsel %vm1934_vm4, %v2106_v21, %v2105_v14  ;;  %v8397_v17 = vsel %vm5837_vm14, 0.0, %v5830_v28 }
 0x1f7   : > { %v2116_v35 = vrot.slane %v8397_v17, 7  ;;  %v8398_v47 = vsel %vm5837_vm14, 0.0, %v5835_v40  ;;  %v2109_v28 = vsel %vm7970_vm5, %v2108_v1, %v2107_v58  ;;  %v8401_v26 = vsel %vm5837_vm14, 0.0, %v5842_v36 }
 0x1f8   : > { %v2118_v0 = vrot.slane %v8398_v47, 6  ;;  %v2120_v40 = vrot.slane %v8401_v26, 5  ;;  %v8402_v4 = vsel %vm5837_vm14, 0.0, %v5851_v41  ;;  %v2124_v25 = vrot.slane %v8403_v27, 3 }
 0x1f9   : > { %v2122_v43 = vrot.slane %v8402_v4, 4  ;;  %v2111_v41 = vsel %vm7956_vm8, %v2110_v59, %v2109_v28  ;;  %v2117_v52 = vsel %vm1928_vm0, %v2116_v35, %v8406_v33  ;;  %v8407_v63 = vsel %vm5837_vm14, 0.0, %v5889_v3 }
 0x1fa   : > { %v2126_v56 = vrot.slane %v8407_v63, 2  ;;  %v8408_v19 = vsel %vm5837_vm14, 0.0, %v5903_v49  ;;  %v2113_v34 = vsel %vm7955_vm11, %v2112_v16, %v2111_v41  ;;  %v2119_v5 = vsel %vm1931_vm2, %v2118_v0, %v2117_v52 }
 0x1fb   : > { %v2128_v50 = vrot.slane %v8408_v19, 1  ;;  %v2144_v13 = vsel %vm6490_vm10, %v5975_v24, -inf  ;;  %v2145_v3 = vsel %vm6516_vm3, %v6034_v15, -inf  ;;  %v6545_v9 = vsel %vm7945_vm12, %v2114_v48, %v2113_v34 }
 0x1fc   : > { %v2121_v49 = vsel %vm1934_vm4, %v2120_v40, %v2119_v5  ;;  %v2146_v42 = vsel %vm6490_vm10, %v6067_v22, -inf  ;;  %v2147_v45 = vsel %vm6516_vm3, %v8409_v7, -inf  ;;  %v2148_v39 = vsel %vm6490_vm10, %v8410_v53, -inf }
 0x1fd   : > { %v2123_v61 = vsel %vm7970_vm5, %v2122_v43, %v2121_v49  ;;  %v2149_v57 = vsel %vm6516_vm3, %v6198_v32, -inf  ;;  %v2150_v30 = vsel %vm6490_vm10, %v6231_v31, -inf  ;;  %v2151_v20 = vsel %vm6516_vm3, %v6267_v54, -inf }
 0x1fe   : > { %v2125_v44 = vsel %vm7956_vm8, %v2124_v25, %v2123_v61  ;;  %v2152_v62 = vsel %vm6490_vm10, %v6324_v29, -inf  ;;  %v2153_v21 = vsel %vm6516_vm3, %v6397_v18, -inf  ;;  %v2154_v38 = vsel %vm6490_vm10, %v6430_v37, -inf }
 0x1ff   : > { %v2127_v12 = vsel %vm7955_vm11, %v2126_v56, %v2125_v44  ;;  %v2155_v60 = vsel %vm6516_vm3, %v6471_v11, -inf  ;;  %v2156_v51 = vsel %vm6490_vm10, %v6545_v9, -inf  ;;  %v2158_v55 = vsel %vm285_vm7, %v2144_v13, -inf }
 0x200   : > { %v6601_v1 = vsel %vm7945_vm12, %v2128_v50, %v2127_v12  ;;  %v2159_v59 = vsel %vm285_vm7, %v2145_v3, -inf  ;;  %v2167_v23 = vsel %vm285_vm7, %v2146_v42, -inf  ;;  %v2168_v16 = vsel %vm285_vm7, %v2147_v45, -inf }
 0x201   : > { %v2157_v14 = vsel %vm6516_vm3, %v6601_v1, -inf  ;;  %v2160_v46 = vmax.f32 %v2158_v55, %v2159_v59  ;;  %v2176_v10 = vsel %vm285_vm7, %v2148_v39, -inf  ;;  %v2169_v48 = vmax.f32 %v2167_v23, %v2168_v16 }
 0x202   : > { %v2177_v58 = vsel %vm285_vm7, %v2149_v57, -inf  ;;  %v2185_v17 = vsel %vm285_vm7, %v2150_v30, -inf  ;;  %v2186_v35 = vsel %vm285_vm7, %v2151_v20, -inf  ;;  %v2194_v28 = vsel %vm285_vm7, %v2152_v62, -inf }
 0x203   : > { %v2161_v47 = vrot.slane %v2160_v46, 4  ;;  %v2178_v0 = vmax.f32 %v2176_v10, %v2177_v58  ;;  %v2187_v2 = vmax.f32 %v2185_v17, %v2186_v35  ;;  %v2170_v26 = vrot.slane %v2169_v48, 4 }
 0x204   : > { %v2195_v40 = vsel %vm285_vm7, %v2153_v21, -inf  ;;  %v2203_v4 = vsel %vm285_vm7, %v2154_v38, -inf  ;;  %v2204_v43 = vsel %vm285_vm7, %v2155_v60, -inf  ;;  %v2212_v63 = vsel %vm285_vm7, %v2156_v51, -inf }
 0x205   : > { %v2162_v27 = vmax.f32 %v2160_v46, %v2161_v47  ;;  %v2179_v25 = vrot.slane %v2178_v0, 4  ;;  %v2188_v36 = vrot.slane %v2187_v2, 4  ;;  %v2196_v41 = vmax.f32 %v2194_v28, %v2195_v40 }
 0x206   : > { %v2171_v33 = vmax.f32 %v2169_v48, %v2170_v26  ;;  %v2205_v52 = vmax.f32 %v2203_v4, %v2204_v43  ;;  %v2213_v56 = vsel %vm285_vm7, %v2157_v14, -inf  ;;  %v2223_v20 = vstv %s6510_s18  ;;  %s3359_s18 = scvt.f32.s32 %s6889_s16  ;;  %s7285_s16 = sadd.s32 %s3369_s14, %s5478_s24 }
 0x207   : > { %v2163_v19 = vrot.slane %v2162_v27, 2  ;;  %v2180_v50 = vmax.f32 %v2178_v0, %v2179_v25  ;;  %v2189_v34 = vmax.f32 %v2187_v2, %v2188_v36  ;;  %v2197_v5 = vrot.slane %v2196_v41, 4 }
 0x208   : > { %v2172_v13 = vrot.slane %v2171_v33, 2  ;;  %v2206_v3 = vrot.slane %v2205_v52, 4  ;;  %v2214_v49 = vmax.f32 %v2212_v63, %v2213_v56  ;;  %v2247_v59 = vstv %s8614_s26  ;;  %s6953_s23 = sadd.s32 %s3359_s18, %s5478_s24 }
 0x209   : > { %v2164_v42 = vmax.f32 %v2162_v27, %v2163_v19  ;;  %v2181_v45 = vrot.slane %v2180_v50, 2  ;;  %v2190_v61 = vrot.slane %v2189_v34, 2  ;;  %v2198_v39 = vmax.f32 %v2196_v41, %v2197_v5  ;;  %p2580_p5 = scmp.gt.s32.totalorder %s6953_s23, 0  ;;  %p3214_p7 = scmp.lt.s32.totalorder %s6953_s23, 16 }
 0x20a   : > { %v2173_v57 = vmax.f32 %v2171_v33, %v2172_v13  ;;  %v2207_v30 = vmax.f32 %v2205_v52, %v2206_v3  ;;  %v2215_v44 = vrot.slane %v2214_v49, 4  ;;  %vm6662_vm13 = vcmp.eq.s32.totalorder %v2223_v20, 1  ;;  %s6971_s26 = scalar_select %p2566_p4, 1, 0 }
 0x20b   : > { %v2165_v62 = vrot.slane %v2164_v42, 1  ;;  %v2182_v21 = vmax.f32 %v2180_v50, %v2181_v45  ;;  %v2191_v12 = vmax.f32 %v2189_v34, %v2190_v61  ;;  %v2199_v38 = vrot.slane %v2198_v39, 2  ;;  %s2581_s27 = scalar_select %p2580_p5, %s6953_s23, 0 }
 0x20c   : > { %v2174_v60 = vrot.slane %v2173_v57, 1  ;;  %v2208_v51 = vrot.slane %v2207_v30, 2  ;;  %v2216_v55 = vmax.f32 %v2214_v49, %v2215_v44  ;;  %vm2248_vm14 = vcmp.ge.s32.totalorder %v3538_v8, %v2247_v59  ;;  %p3239_p4 = scmp.lt.s32.totalorder %s7285_s16, 16 }
 0x20d   : > { %v6652_v23 = vmax.f32 %v2164_v42, %v2165_v62  ;;  %v2183_v14 = vrot.slane %v2182_v21, 1  ;;  %v2192_v46 = vrot.slane %v2191_v12, 1  ;;  %v2200_v16 = vmax.f32 %v2198_v39, %v2199_v38  ;;  %s8624_s27 = smov (!%p3214_p7, %s2581_s27), 16 }
 0x20e   : > { %v6655_v10 = vmax.f32 %v2173_v57, %v2174_v60  ;;  %v2209_v48 = vmax.f32 %v2207_v30, %v2208_v51  ;;  %v2217_v58 = vrot.slane %v2216_v55, 2  ;;  %vm2249_vm9 = vcmp.ge.s32.totalorder %v8356_v6, %v2247_v59  ;;  %p2681_p12 = scmp.le.s32.totalorder %s8626_s28, %s8624_s27 }
 0x20f   : > { %v6658_v17 = vmax.f32 %v2182_v21, %v2183_v14  ;;  %v6660_v35 = vmax.f32 %v2191_v12, %v2192_v46  ;;  %v2201_v47 = vrot.slane %v2200_v16, 1  ;;  %v2250_v43 = vstv %s8612_s21  ;;  %s6947_s21 = scalar_select %p2451_p2, 1, 0 }
 0x210   : > { %v2210_v2 = vrot.slane %v2209_v48, 1  ;;  %v2218_v28 = vmax.f32 %v2216_v55, %v2217_v58  ;;  %vm2251_vm1 = vcmp.lt.s32.totalorder %v3538_v8, %v2250_v43  ;;  %vm2252_vm6 = vcmp.lt.s32.totalorder %v8356_v6, %v2250_v43  ;;  %p2818_p2 = scmp.gt.s32.totalorder %s7285_s16, 0 }
 0x211   : > { %v6674_v40 = vmax.f32 %v2200_v16, %v2201_v47  ;;  %vm6694_vm15 = vmand %vm2248_vm14, %vm2251_vm1  ;;  %v2338_v63 = vstv %s6643_s4  ;;  %v2362_v34 = vstv %s8616_s5  ;;  %v2365_v5 = vstv %s8618_s6  ;;  %s7098_s4 = sceil.f32 %s2699_s9  ;;  %s3363_s5 = scvt.f32.s32 %s7093_s22 }
 0x212   : > { %v2219_v27 = vrot.slane %v2218_v28, 1  ;;  %v6686_v36 = vmax.f32 %v2209_v48, %v2210_v2  ;;  %vm6701_vm10 = vmand %vm2249_vm9, %vm2252_vm6  ;;  %v2259_v50 = vsel %vm6694_vm15, %v5975_v24, -inf  ;;  %v2261_v3 = vsel %vm6694_vm15, %v6067_v22, -inf  ;;  %s3365_s6 = scvt.f32.s32 %s7098_s4 }
 0x213   : > { %v2260_v13 = vsel %vm6701_vm10, %v6034_v15, -inf  ;;  %v2262_v49 = vsel %vm6701_vm10, %v8409_v7, -inf  ;;  %v2263_v42 = vsel %vm6694_vm15, %v8410_v53, -inf  ;;  %v2264_v45 = vsel %vm6701_vm10, %v6198_v32, -inf  ;;  %s7116_s7 = sadd.s32 %s3363_s5, %s5478_s24 }
 0x214   : > { %v6699_v56 = vmax.f32 %v2218_v28, %v2219_v27  ;;  %v2265_v61 = vsel %vm6694_vm15, %v6231_v31, -inf  ;;  %v2266_v39 = vsel %vm6701_vm10, %v6267_v54, -inf  ;;  %v2267_v57 = vsel %vm6694_vm15, %v6324_v29, -inf  ;;  %s7126_s10 = sadd.s32 %s3365_s6, %s5478_s24  ;;  %p2695_p9 = scmp.gt.s32.totalorder %s7116_s7, 0 }
 0x215   : > { %v2268_v30 = vsel %vm6701_vm10, %v6397_v18, -inf  ;;  %v2269_v44 = vsel %vm6694_vm15, %v6430_v37, -inf  ;;  %v2270_v20 = vsel %vm6701_vm10, %v6471_v11, -inf  ;;  %v2271_v62 = vsel %vm6694_vm15, %v6545_v9, -inf  ;;  %p2703_p10 = scmp.gt.s32.totalorder %s7126_s10, 0  ;;  %p3224_p11 = scmp.lt.s32.totalorder %s7116_s7, 16 }
 0x216   : > { %v2272_v21 = vsel %vm6701_vm10, %v6601_v1, -inf  ;;  %v2273_v12 = vsel %vm285_vm7, %v2259_v50, -inf  ;;  %v2274_v38 = vsel %vm285_vm7, %v2260_v13, -inf  ;;  %v2282_v60 = vsel %vm285_vm7, %v2261_v3, -inf  ;;  %s2696_s8 = scalar_select %p2695_p9, %s7116_s7, 0 }
 0x217   : > { %v2275_v51 = vmax.f32 %v2273_v12, %v2274_v38  ;;  %v2283_v55 = vsel %vm285_vm7, %v2262_v49, -inf  ;;  %v2291_v59 = vsel %vm285_vm7, %v2263_v42, -inf  ;;  %v2292_v14 = vsel %vm285_vm7, %v2264_v45, -inf  ;;  %s7205_s11 = scalar_select %p2703_p10, %s7126_s10, 0 }
 0x218   : > { %v2284_v46 = vmax.f32 %v2282_v60, %v2283_v55  ;;  %v2293_v16 = vmax.f32 %v2291_v59, %v2292_v14  ;;  %v2300_v48 = vsel %vm285_vm7, %v2265_v61, -inf  ;;  %v2301_v58 = vsel %vm285_vm7, %v2266_v39, -inf  ;;  %s8628_s8 = smov (!%p3224_p11, %s2696_s8), 16  ;;  %p3229_p13 = scmp.lt.s32.totalorder %s7126_s10, 16 }
 0x219   : > { %v2276_v47 = vrot.slane %v2275_v51, 4  ;;  %v2302_v2 = vmax.f32 %v2300_v48, %v2301_v58  ;;  %v2309_v28 = vsel %vm285_vm7, %v2267_v57, -inf  ;;  %v2310_v43 = vsel %vm285_vm7, %v2268_v30, -inf  ;;  %s2819_s18 = scalar_select %p2818_p2, %s7285_s16, 0 }
 0x21a   : > { %v2285_v27 = vrot.slane %v2284_v46, 4  ;;  %v2294_v52 = vrot.slane %v2293_v16, 4  ;;  %v2311_v19 = vmax.f32 %v2309_v28, %v2310_v43  ;;  %v2318_v50 = vsel %vm285_vm7, %v2269_v44, -inf  ;;  %s8630_s11 = smov (!%p3229_p13, %s7205_s11), 16 }
 0x21b   : > { %v2277_v13 = vmax.f32 %v2275_v51, %v2276_v47  ;;  %v2303_v3 = vrot.slane %v2302_v2, 4  ;;  %v2319_v49 = vsel %vm285_vm7, %v2270_v20, -inf  ;;  %v2327_v42 = vsel %vm285_vm7, %v2271_v62, -inf  ;;  %p2796_p0 = scmp.le.s32.totalorder %s8630_s11, %s8628_s8  ;;  %s8634_s18 = smov (!%p3239_p4, %s2819_s18), 16 }
 0x21c   : > { %v2286_v45 = vmax.f32 %v2284_v46, %v2285_v27  ;;  %v2295_v61 = vmax.f32 %v2293_v16, %v2294_v52  ;;  %v2312_v39 = vrot.slane %v2311_v19, 4  ;;  %v2320_v57 = vmax.f32 %v2318_v50, %v2319_v49 }
 0x21d   : > { %v2278_v44 = vrot.slane %v2277_v13, 2  ;;  %v2304_v12 = vmax.f32 %v2302_v2, %v2303_v3  ;;  %v2328_v38 = vsel %vm285_vm7, %v2272_v21, -inf  ;;  %vm6780_vm3 = vcmp.ge.s32.totalorder %v3538_v8, %v2362_v34 }
 0x21e   : > { %v2287_v60 = vrot.slane %v2286_v45, 2  ;;  %v2296_v20 = vrot.slane %v2295_v61, 2  ;;  %v2313_v62 = vmax.f32 %v2311_v19, %v2312_v39  ;;  %v2321_v51 = vrot.slane %v2320_v57, 4 }
 0x21f   : > { %v2279_v55 = vmax.f32 %v2277_v13, %v2278_v44  ;;  %v2305_v59 = vrot.slane %v2304_v12, 2  ;;  %v2329_v14 = vmax.f32 %v2327_v42, %v2328_v38  ;;  %vm6790_vm14 = vcmp.ge.s32.totalorder %v8356_v6, %v2362_v34 }
 0x220   : > { %v2288_v16 = vmax.f32 %v2286_v45, %v2287_v60  ;;  %v2297_v48 = vmax.f32 %v2295_v61, %v2296_v20  ;;  %v2314_v21 = vrot.slane %v2313_v62, 2  ;;  %v2322_v58 = vmax.f32 %v2320_v57, %v2321_v51 }
 0x221   : > { %v2280_v47 = vrot.slane %v2279_v55, 1  ;;  %v2306_v2 = vmax.f32 %v2304_v12, %v2305_v59  ;;  %v2330_v28 = vrot.slane %v2329_v14, 4  ;;  %vm6802_vm9 = vcmp.lt.s32.totalorder %v3538_v8, %v2365_v5 }
 0x222   : > { %v2289_v27 = vrot.slane %v2288_v16, 1  ;;  %v2298_v52 = vrot.slane %v2297_v48, 1  ;;  %v2315_v19 = vmax.f32 %v2313_v62, %v2314_v21  ;;  %v2323_v50 = vrot.slane %v2322_v58, 2  ;;  %vm6835_vm15 = vmand %vm6780_vm3, %vm6802_vm9 }
 0x223   : > { %v6797_v13 = vmax.f32 %v2279_v55, %v2280_v47  ;;  %v2307_v3 = vrot.slane %v2306_v2, 1  ;;  %v2331_v49 = vmax.f32 %v2329_v14, %v2330_v28  ;;  %vm6816_vm1 = vcmp.eq.s32.totalorder %v2338_v63, 1 }
 0x224   : > { %v6807_v42 = vmax.f32 %v2288_v16, %v2289_v27  ;;  %v6809_v45 = vmax.f32 %v2297_v48, %v2298_v52  ;;  %v2316_v61 = vrot.slane %v2315_v19, 1  ;;  %v2324_v39 = vmax.f32 %v2322_v58, %v2323_v50 }
 0x225   : > { %8421 = vst [vmem:[#allocation21_spill] sm:$0xff] %v6797_v13  ;;  %v6812_v57 = vmax.f32 %v2306_v2, %v2307_v3  ;;  %v2332_v44 = vrot.slane %v2331_v49, 2  ;;  %vm2367_vm6 = vcmp.lt.s32.totalorder %v8356_v6, %v2365_v5  ;;  %v2374_v48 = vsel %vm6835_vm15, %v5975_v24, -inf }
 0x226   : > { %v6826_v60 = vmax.f32 %v2315_v19, %v2316_v61  ;;  %v2325_v20 = vrot.slane %v2324_v39, 1  ;;  %vm6853_vm10 = vmand %vm6790_vm14, %vm2367_vm6  ;;  %v2376_v47 = vsel %vm6835_vm15, %v6067_v22, -inf  ;;  %v2378_v28 = vsel %vm6835_vm15, %v8410_v53, -inf }
 0x227   : > { %v6840_v5 = vmax.f32 %v2331_v49, %v2332_v44  ;;  %v2375_v21 = vsel %vm6853_vm10, %v6034_v15, -inf  ;;  %v2377_v2 = vsel %vm6853_vm10, %v8409_v7, -inf  ;;  %v2379_v27 = vsel %vm6853_vm10, %v6198_v32, -inf }
 0x228   : > { %v6860_v46 = vmax.f32 %v2324_v39, %v2325_v20  ;;  %v2380_v52 = vsel %vm6835_vm15, %v6231_v31, -inf  ;;  %v2381_v19 = vsel %vm6853_vm10, %v6267_v54, -inf  ;;  %v2382_v50 = vsel %vm6835_vm15, %v6324_v29, -inf }
 0x229   : > { %v2334_v58 = vrot.slane %v6840_v5, 1  ;;  %v2383_v3 = vsel %vm6853_vm10, %v6397_v18, -inf  ;;  %v2384_v49 = vsel %vm6835_vm15, %v6430_v37, -inf  ;;  %v2385_v34 = vsel %vm6853_vm10, %v6471_v11, -inf }
 0x22a   : > { %8430 = vst [vmem:[#allocation19_spill] sm:$0xff] %v6860_v46  ;;  %v2386_v61 = vsel %vm6835_vm15, %v6545_v9, -inf  ;;  %v2388_v39 = vsel %vm285_vm7, %v2374_v48, -inf  ;;  %v2389_v44 = vsel %vm285_vm7, %v2375_v21, -inf  ;;  %v2397_v20 = vsel %vm285_vm7, %v2376_v47, -inf }
 0x22b   : > { %v2387_v62 = vsel %vm6853_vm10, %v6601_v1, -inf  ;;  %v2390_v43 = vmax.f32 %v2388_v39, %v2389_v44  ;;  %v2398_v16 = vsel %vm285_vm7, %v2377_v2, -inf  ;;  %v2406_v63 = vsel %vm285_vm7, %v2378_v28, -inf }
 0x22c   : > { %v2399_v48 = vmax.f32 %v2397_v20, %v2398_v16  ;;  %v2407_v21 = vsel %vm285_vm7, %v2379_v27, -inf  ;;  %v2415_v47 = vsel %vm285_vm7, %v2380_v52, -inf  ;;  %v2416_v38 = vsel %vm285_vm7, %v2381_v19, -inf }
 0x22d   : > { %v2391_v59 = vrot.slane %v2390_v43, 4  ;;  %v2408_v14 = vmax.f32 %v2406_v63, %v2407_v21  ;;  %v2417_v55 = vmax.f32 %v2415_v47, %v2416_v38  ;;  %v2424_v39 = vsel %vm285_vm7, %v2382_v50, -inf }
 0x22e   : > { %v2400_v16 = vrot.slane %v2399_v48, 4  ;;  %v2425_v2 = vsel %vm285_vm7, %v2383_v3, -inf  ;;  %v2433_v28 = vsel %vm285_vm7, %v2384_v49, -inf  ;;  %v2434_v27 = vsel %vm285_vm7, %v2385_v34, -inf }
 0x22f   : > { %v2392_v52 = vmax.f32 %v2390_v43, %v2391_v59  ;;  %v2409_v19 = vrot.slane %v2408_v14, 4  ;;  %v2418_v38 = vrot.slane %v2417_v55, 4  ;;  %v2426_v44 = vmax.f32 %v2424_v39, %v2425_v2 }
 0x230   : > { %v2401_v50 = vmax.f32 %v2399_v48, %v2400_v16  ;;  %v2435_v20 = vmax.f32 %v2433_v28, %v2434_v27  ;;  %v2442_v63 = vsel %vm285_vm7, %v2386_v61, -inf  ;;  %v2443_v3 = vsel %vm285_vm7, %v2387_v62, -inf }
 0x231   : > { %v2393_v49 = vrot.slane %v2392_v52, 2  ;;  %v2410_v21 = vmax.f32 %v2408_v14, %v2409_v19  ;;  %v2419_v34 = vmax.f32 %v2417_v55, %v2418_v38  ;;  %v2427_v59 = vrot.slane %v2426_v44, 4 }
 0x232   : > { %v6964_v43 = vmax.f32 %v6840_v5, %v2334_v58  ;;  %v2402_v47 = vrot.slane %v2401_v50, 2  ;;  %v2436_v39 = vrot.slane %v2435_v20, 4  ;;  %v2444_v48 = vmax.f32 %v2442_v63, %v2443_v3 }
 0x233   : > { %v2394_v61 = vmax.f32 %v2392_v52, %v2393_v49  ;;  %v2411_v62 = vrot.slane %v2410_v21, 2  ;;  %v2420_v16 = vrot.slane %v2419_v34, 2  ;;  %v2428_v55 = vmax.f32 %v2426_v44, %v2427_v59 }
 0x234   : > { %8431 = vst [vmem:[#allocation22_spill] sm:$0xff] %v6964_v43  ;;  %v2403_v14 = vmax.f32 %v2401_v50, %v2402_v47  ;;  %v2437_v2 = vmax.f32 %v2435_v20, %v2436_v39  ;;  %v2445_v28 = vrot.slane %v2444_v48, 4  ;;  %v2453_v27 = vstv %s6947_s21  ;;  %s3303_s21 = smul.u32 56, %s8636_s0 }
 0x235   : > { %v2395_v5 = vrot.slane %v2394_v61, 1  ;;  %v2412_v58 = vmax.f32 %v2410_v21, %v2411_v62  ;;  %v2421_v19 = vmax.f32 %v2419_v34, %v2420_v16  ;;  %v2429_v38 = vrot.slane %v2428_v55, 2 }
 0x236   : > { %v2404_v52 = vrot.slane %v2403_v14, 1  ;;  %v2438_v63 = vrot.slane %v2437_v2, 2  ;;  %v2446_v3 = vmax.f32 %v2444_v48, %v2445_v28  ;;  %v2477_v49 = vstv %s8620_s30  ;;  %s7276_s30 = scalar_select %p2681_p12, 1, 0 }
 0x237   : > { %v6980_v44 = vmax.f32 %v2394_v61, %v2395_v5  ;;  %v2413_v50 = vrot.slane %v2412_v58, 1  ;;  %v2422_v20 = vrot.slane %v2421_v19, 1  ;;  %v2430_v59 = vmax.f32 %v2428_v55, %v2429_v38  ;;  %s138_s25 = scalar_lea.vmem %s7805_s3, %s3303_s21 }
 0x238   : > { %v6986_v34 = vmax.f32 %v2403_v14, %v2404_v52  ;;  %v2439_v47 = vmax.f32 %v2437_v2, %v2438_v63  ;;  %v2447_v39 = vrot.slane %v2446_v3, 2  ;;  %vm6993_vm3 = vcmp.eq.s32.totalorder %v2453_v27, 1 }
 0x239   : > { %v6989_v48 = vmax.f32 %v2412_v58, %v2413_v50  ;;  %v6991_v62 = vmax.f32 %v2421_v19, %v2422_v20  ;;  %v2431_v61 = vrot.slane %v2430_v59, 1  ;;  %vm2478_vm14 = vcmp.ge.s32.totalorder %v3538_v8, %v2477_v49 }
 0x23a   : > { %v2440_v55 = vrot.slane %v2439_v47, 1  ;;  %v2448_v28 = vmax.f32 %v2446_v3, %v2447_v39  ;;  %vm2479_vm9 = vcmp.ge.s32.totalorder %v8356_v6, %v2477_v49  ;;  %v2480_v5 = vstv %s8622_s15  ;;  %s7282_s15 = sadd.s32 %s3367_s13, %s5478_s24 }
 0x23b   : > { %8432 = vst [vmem:[#allocation23_spill] sm:$0xff] %v6989_v48  ;;  %v7005_v2 = vmax.f32 %v2430_v59, %v2431_v61  ;;  %vm2481_vm6 = vcmp.lt.s32.totalorder %v3538_v8, %v2480_v5  ;;  %vm2482_vm15 = vcmp.lt.s32.totalorder %v8356_v6, %v2480_v5  ;;  %p2810_p1 = scmp.gt.s32.totalorder %s7282_s15, 0  ;;  %p3234_p3 = scmp.lt.s32.totalorder %s7282_s15, 16 }
 0x23c   : > { %8433 = vst [vmem:[#allocation24_spill] sm:$0xff] %v6991_v62  ;;  %v2449_v58 = vrot.slane %v2448_v28, 1  ;;  %v7017_v38 = vmax.f32 %v2439_v47, %v2440_v55  ;;  %vm7025_vm10 = vmand %vm2478_vm14, %vm2481_vm6  ;;  %s7300_s24 = scalar_select %p2796_p0, 1, 0 }
 0x23d   : > { %8436 = vst [vmem:[#allocation25_spill] sm:$0xff] %v7005_v2  ;;  %vm7032_vm12 = vmand %vm2479_vm9, %vm2482_vm15  ;;  %v2489_v59 = vsel %vm7025_vm10, %v5975_v24, -inf  ;;  %v2491_v55 = vsel %vm7025_vm10, %v6067_v22, -inf  ;;  %v2493_v5 = vsel %vm7025_vm10, %v8410_v53, -inf  ;;  %v2495_v21 = vsel %vm7025_vm10, %v6231_v31, -inf  ;;  %s2811_s17 = scalar_select %p2810_p1, %s7282_s15, 0 }
 0x23e   : > { %8437 = vst [vmem:[#allocation26_spill] sm:$0xff] %v7017_v38  ;;  %v7030_v50 = vmax.f32 %v2448_v28, %v2449_v58  ;;  %v2490_v61 = vsel %vm7032_vm12, %v6034_v15, -inf  ;;  %v2492_v28 = vsel %vm7032_vm12, %v8409_v7, -inf  ;;  %v2494_v58 = vsel %vm7032_vm12, %v6198_v32, -inf }
 0x23f   : > { %v2496_v63 = vsel %vm7032_vm12, %v6267_v54, -inf  ;;  %v2497_v52 = vsel %vm7025_vm10, %v6324_v29, -inf  ;;  %v2498_v19 = vsel %vm7032_vm12, %v6397_v18, -inf  ;;  %v2499_v27 = vsel %vm7025_vm10, %v6430_v37, -inf  ;;  %s8632_s17 = smov (!%p3234_p3, %s2811_s17), 16 }
 0x240   : > { %8440 = vst [vmem:[#allocation28_spill] sm:$0xff] %v7030_v50  ;;  %v2500_v14 = vsel %vm7032_vm12, %v6471_v11, -inf  ;;  %v2501_v51 = vsel %vm7025_vm10, %v6545_v9, -inf  ;;  %v2502_v30 = vsel %vm7032_vm12, %v6601_v1, -inf  ;;  %v2503_v33 = vsel %vm285_vm7, %v2489_v59, -inf  ;;  %p2911_p5 = scmp.le.s32.totalorder %s8634_s18, %s8632_s17 }
 0x241   : > { %v2504_v41 = vsel %vm285_vm7, %v2490_v61, -inf  ;;  %v2512_v25 = vsel %vm285_vm7, %v2491_v55, -inf  ;;  %v2513_v26 = vsel %vm285_vm7, %v2492_v28, -inf  ;;  %v2521_v49 = vsel %vm285_vm7, %v2493_v5, -inf }
 0x242   : > { %v2505_v4 = vmax.f32 %v2503_v33, %v2504_v41  ;;  %v2522_v3 = vsel %vm285_vm7, %v2494_v58, -inf  ;;  %v2514_v39 = vmax.f32 %v2512_v25, %v2513_v26  ;;  %v2530_v20 = vsel %vm285_vm7, %v2495_v21, -inf  ;;  %s7554_s19 = scalar_select %p2911_p5, 1, 0 }
 0x243   : > { %v2523_v47 = vmax.f32 %v2521_v49, %v2522_v3  ;;  %v2531_v59 = vsel %vm285_vm7, %v2496_v63, -inf  ;;  %v2539_v61 = vsel %vm285_vm7, %v2497_v52, -inf  ;;  %v2540_v55 = vsel %vm285_vm7, %v2498_v19, -inf }
 0x244   : > { %v2506_v13 = vrot.slane %v2505_v4, 4  ;;  %v2532_v43 = vmax.f32 %v2530_v20, %v2531_v59  ;;  %v2515_v41 = vrot.slane %v2514_v39, 4  ;;  %v2541_v28 = vmax.f32 %v2539_v61, %v2540_v55 }
 0x245   : > { %v2524_v33 = vrot.slane %v2523_v47, 4  ;;  %v2548_v26 = vsel %vm285_vm7, %v2499_v27, -inf  ;;  %v2549_v63 = vsel %vm285_vm7, %v2500_v14, -inf  ;;  %v2557_v52 = vsel %vm285_vm7, %v2501_v51, -inf }
 0x246   : > { %v2507_v25 = vmax.f32 %v2505_v4, %v2506_v13  ;;  %v2533_v21 = vrot.slane %v2532_v43, 4  ;;  %v2516_v19 = vmax.f32 %v2514_v39, %v2515_v41  ;;  %v2542_v5 = vrot.slane %v2541_v28, 4 }
 0x247   : > { %v2525_v49 = vmax.f32 %v2523_v47, %v2524_v33  ;;  %v2550_v58 = vmax.f32 %v2548_v26, %v2549_v63  ;;  %v2558_v4 = vsel %vm285_vm7, %v2502_v30, -inf  ;;  %v8443_v55 = vstv %s8624_s27 }
 0x248   : > { %v2508_v3 = vrot.slane %v2507_v25, 2  ;;  %v2534_v20 = vmax.f32 %v2532_v43, %v2533_v21  ;;  %v2517_v13 = vrot.slane %v2516_v19, 2  ;;  %v2543_v51 = vmax.f32 %v2541_v28, %v2542_v5 }
 0x249   : > { %v2526_v14 = vrot.slane %v2525_v49, 2  ;;  %v2551_v47 = vrot.slane %v2550_v58, 4  ;;  %v2559_v61 = vmax.f32 %v2557_v52, %v2558_v4  ;;  %vm7111_vm12 = vcmp.ge.s32.totalorder %v3538_v8, %v8443_v55 }
 0x24a   : > { %v2509_v39 = vmax.f32 %v2507_v25, %v2508_v3  ;;  %v2535_v59 = vrot.slane %v2534_v20, 2  ;;  %v2518_v33 = vmax.f32 %v2516_v19, %v2517_v13  ;;  %v2544_v30 = vrot.slane %v2543_v51, 2 }
 0x24b   : > { %v2527_v43 = vmax.f32 %v2525_v49, %v2526_v14  ;;  %v2552_v26 = vmax.f32 %v2550_v58, %v2551_v47  ;;  %v2560_v63 = vrot.slane %v2559_v61, 4  ;;  %v8446_v25 = vmov %v8443_v55 }
 0x24c   : > { %v2510_v21 = vrot.slane %v2509_v39, 1  ;;  %v2536_v28 = vmax.f32 %v2534_v20, %v2535_v59  ;;  %vm7121_vm14 = vcmp.ge.s32.totalorder %v8356_v6, %v8446_v25  ;;  %v2519_v19 = vrot.slane %v2518_v33, 1 }
 0x24d   : > { %v2528_v49 = vrot.slane %v2527_v43, 1  ;;  %v2545_v5 = vmax.f32 %v2543_v51, %v2544_v30  ;;  %v2553_v58 = vrot.slane %v2552_v26, 2  ;;  %v2561_v20 = vmax.f32 %v2559_v61, %v2560_v63 }
 0x24e   : > { %v7128_v3 = vmax.f32 %v2509_v39, %v2510_v21  ;;  %v2537_v4 = vrot.slane %v2536_v28, 1  ;;  %v8450_v13 = vstv %s8626_s28  ;;  %v7138_v47 = vmax.f32 %v2518_v33, %v2519_v19 }
 0x24f   : > { %vm7133_vm9 = vcmp.lt.s32.totalorder %v3538_v8, %v8450_v13  ;;  %v7140_v59 = vmax.f32 %v2527_v43, %v2528_v49  ;;  %v2546_v55 = vrot.slane %v2545_v5, 1  ;;  %v2554_v25 = vmax.f32 %v2552_v26, %v2553_v58 }
 0x250   : > { %8449 = vst [vmem:[#allocation29_spill] sm:$0xff] %v7128_v3  ;;  %v7143_v51 = vmax.f32 %v2536_v28, %v2537_v4  ;;  %v2562_v39 = vrot.slane %v2561_v20, 2  ;;  %v8456_v61 = vstv %s6971_s26  ;;  %v8457_v30 = vmov 0  ;;  %vm7166_vm10 = vmand %vm7111_vm12, %vm7133_vm9 }
 0x251   : > { %8453 = vst [vmem:[#allocation31_spill] sm:$0xff] %v7138_v47  ;;  %vm7147_vm6 = vcmp.eq.s32.totalorder %v8456_v61, 1  ;;  %v8460_v21 = vmov %v8450_v13  ;;  %v7157_v43 = vmax.f32 %v2545_v5, %v2546_v55  ;;  %v2555_v26 = vrot.slane %v2554_v25, 1 }
 0x252   : > { %8454 = vst [vmem:[#allocation32_spill] sm:$0xff] %v7140_v59  ;;  %v8458_v30 = vsel %vm7147_vm6, 4294967295, %v8457_v30  ;;  %vm2597_vm15 = vcmp.lt.s32.totalorder %v8356_v6, %v8460_v21  ;;  %v7171_v19 = vmax.f32 %v2561_v20, %v2562_v39  ;;  %v2604_v13 = vsel %vm7166_vm10, %v5975_v24, -inf }
 0x253   : > { %8455 = vst [vmem:[#allocation27_spill] sm:$0xff] %v7143_v51  ;;  %vm7184_vm12 = vmand %vm7121_vm14, %vm2597_vm15  ;;  %v7191_v4 = vmax.f32 %v2554_v25, %v2555_v26  ;;  %v2606_v55 = vsel %vm7166_vm10, %v6067_v22, -inf  ;;  %v2608_v39 = vsel %vm7166_vm10, %v8410_v53, -inf  ;;  %v2610_v26 = vsel %vm7166_vm10, %v6231_v31, -inf }
 0x254   : > { %8459 = vst [vmem:[#allocation33_spill] sm:$0xff] %v8458_v30  ;;  %v2605_v52 = vsel %vm7184_vm12, %v6034_v15, -inf  ;;  %v2564_v14 = vrot.slane %v7171_v19, 1  ;;  %v2607_v25 = vsel %vm7184_vm12, %v8409_v7, -inf  ;;  %v2609_v21 = vsel %vm7184_vm12, %v6198_v32, -inf }
 0x255   : > { %8461 = vst [vmem:[#allocation34_spill] sm:$0xff] %v7157_v43  ;;  %v2611_v33 = vsel %vm7184_vm12, %v6267_v54, -inf  ;;  %v2612_v61 = vsel %vm7166_vm10, %v6324_v29, -inf  ;;  %v2613_v5 = vsel %vm7184_vm12, %v6397_v18, -inf  ;;  %v2614_v27 = vsel %vm7166_vm10, %v6430_v37, -inf }
 0x256   : > { %8466 = vst [vmem:[#allocation35_spill] sm:$0xff] %v7191_v4  ;;  %v2615_v20 = vsel %vm7184_vm12, %v6471_v11, -inf  ;;  %v2616_v41 = vsel %vm7166_vm10, %v6545_v9, -inf  ;;  %v2618_v49 = vsel %vm285_vm7, %v2604_v13, -inf  ;;  %v2619_v28 = vsel %vm285_vm7, %v2605_v52, -inf }
 0x257   : > { %v2627_v50 = vsel %vm285_vm7, %v2606_v55, -inf  ;;  %v2617_v4 = vsel %vm7184_vm12, %v6601_v1, -inf  ;;  %v2620_v59 = vmax.f32 %v2618_v49, %v2619_v28  ;;  %v2628_v38 = vsel %vm285_vm7, %v2607_v25, -inf }
 0x258   : > { %v2636_v63 = vsel %vm285_vm7, %v2608_v39, -inf  ;;  %v2629_v13 = vmax.f32 %v2627_v50, %v2628_v38  ;;  %v2637_v52 = vsel %vm285_vm7, %v2609_v21, -inf  ;;  %v2645_v55 = vsel %vm285_vm7, %v2610_v26, -inf }
 0x259   : > { %v2646_v43 = vsel %vm285_vm7, %v2611_v33, -inf  ;;  %v2621_v51 = vrot.slane %v2620_v59, 4  ;;  %v2638_v58 = vmax.f32 %v2636_v63, %v2637_v52  ;;  %v2654_v28 = vsel %vm285_vm7, %v2612_v61, -inf }
 0x25a   : > { %v2647_v47 = vmax.f32 %v2645_v55, %v2646_v43  ;;  %v2630_v38 = vrot.slane %v2629_v13, 4  ;;  %v2655_v50 = vsel %vm285_vm7, %v2613_v5, -inf  ;;  %v2663_v49 = vsel %vm285_vm7, %v2614_v27, -inf }
 0x25b   : > { %v2664_v33 = vsel %vm285_vm7, %v2615_v20, -inf  ;;  %v2622_v25 = vmax.f32 %v2620_v59, %v2621_v51  ;;  %v2639_v39 = vrot.slane %v2638_v58, 4  ;;  %v2656_v21 = vmax.f32 %v2654_v28, %v2655_v50 }
 0x25c   : > { %v2648_v43 = vrot.slane %v2647_v47, 4  ;;  %v2631_v61 = vmax.f32 %v2629_v13, %v2630_v38  ;;  %v2665_v26 = vmax.f32 %v2663_v49, %v2664_v33  ;;  %v2672_v63 = vsel %vm285_vm7, %v2616_v41, -inf }
 0x25d   : > { %v2673_v5 = vsel %vm285_vm7, %v2617_v4, -inf  ;;  %v2623_v27 = vrot.slane %v2622_v25, 2  ;;  %v2640_v52 = vmax.f32 %v2638_v58, %v2639_v39  ;;  %v2657_v59 = vrot.slane %v2656_v21, 4 }
 0x25e   : > { %v2649_v20 = vmax.f32 %v2647_v47, %v2648_v43  ;;  %v7293_v51 = vmax.f32 %v7171_v19, %v2564_v14  ;;  %v2632_v55 = vrot.slane %v2631_v61, 2  ;;  %v2666_v28 = vrot.slane %v2665_v26, 4 }
 0x25f   : > { %v2674_v13 = vmax.f32 %v2672_v63, %v2673_v5  ;;  %v2624_v41 = vmax.f32 %v2622_v25, %v2623_v27  ;;  %v2641_v4 = vrot.slane %v2640_v52, 2  ;;  %v2658_v47 = vmax.f32 %v2656_v21, %v2657_v59 }
 0x260   : > { %8467 = vst [vmem:[#allocation46_spill] sm:$0xff] %v7293_v51  ;;  %v2650_v38 = vrot.slane %v2649_v20, 2  ;;  %v2633_v58 = vmax.f32 %v2631_v61, %v2632_v55  ;;  %v2667_v50 = vmax.f32 %v2665_v26, %v2666_v28  ;;  %v2683_v33 = vstv %s7276_s30 }
 0x261   : > { %v2675_v49 = vrot.slane %v2674_v13, 4  ;;  %v2625_v19 = vrot.slane %v2624_v41, 1  ;;  %v2642_v14 = vmax.f32 %v2640_v52, %v2641_v4  ;;  %v2659_v43 = vrot.slane %v2658_v47, 2 }
 0x262   : > { %v2651_v39 = vmax.f32 %v2649_v20, %v2650_v38  ;;  %v2634_v25 = vrot.slane %v2633_v58, 1  ;;  %v2668_v63 = vrot.slane %v2667_v50, 2  ;;  %v2707_v27 = vstv %s8628_s8 }
 0x263   : > { %v2676_v5 = vmax.f32 %v2674_v13, %v2675_v49  ;;  %v7309_v21 = vmax.f32 %v2624_v41, %v2625_v19  ;;  %v2643_v61 = vrot.slane %v2642_v14, 1  ;;  %v2660_v59 = vmax.f32 %v2658_v47, %v2659_v43 }
 0x264   : > { %v2652_v26 = vrot.slane %v2651_v39, 1  ;;  %v7315_v20 = vmax.f32 %v2633_v58, %v2634_v25  ;;  %v2669_v55 = vmax.f32 %v2667_v50, %v2668_v63  ;;  %vm7322_vm14 = vcmp.eq.s32.totalorder %v2683_v33, 1 }
 0x265   : > { %8468 = vst [vmem:[#allocation36_spill] sm:$0xff] %v7309_v21  ;;  %v2677_v28 = vrot.slane %v2676_v5, 2  ;;  %v7318_v13 = vmax.f32 %v2642_v14, %v2643_v61  ;;  %v2661_v41 = vrot.slane %v2660_v59, 1  ;;  %vm2708_vm9 = vcmp.ge.s32.totalorder %v3538_v8, %v2707_v27 }
 0x266   : > { %8469 = vst [vmem:[#allocation37_spill] sm:$0xff] %v7315_v20  ;;  %v7320_v4 = vmax.f32 %v2651_v39, %v2652_v26  ;;  %v2670_v47 = vrot.slane %v2669_v55, 1  ;;  %vm2709_vm15 = vcmp.ge.s32.totalorder %v8356_v6, %v2707_v27  ;;  %v2710_v19 = vstv %s8630_s11 }
 0x267   : > { %8470 = vst [vmem:[#allocation38_spill] sm:$0xff] %v7318_v13  ;;  %v2678_v49 = vmax.f32 %v2676_v5, %v2677_v28  ;;  %v7334_v50 = vmax.f32 %v2660_v59, %v2661_v41  ;;  %vm2711_vm10 = vcmp.lt.s32.totalorder %v3538_v8, %v2710_v19  ;;  %vm2712_vm12 = vcmp.lt.s32.totalorder %v8356_v6, %v2710_v19 }
 0x268   : > { %8471 = vst [vmem:[#allocation39_spill] sm:$0xff] %v7320_v4  ;;  %v7346_v43 = vmax.f32 %v2669_v55, %v2670_v47  ;;  %vm7354_vm11 = vmand %vm2708_vm9, %vm2711_vm10  ;;  %v2822_v55 = vstv %s8632_s17 }
 0x269   : > { %8474 = vst [vmem:[#allocation7_spill] sm:$0xff] %v7334_v50  ;;  %v2679_v14 = vrot.slane %v2678_v49, 1  ;;  %vm7361_vm8 = vmand %vm2709_vm15, %vm2712_vm12  ;;  %v2719_v59 = vsel %vm7354_vm11, %v5975_v24, -inf  ;;  %v2721_v47 = vsel %vm7354_vm11, %v6067_v22, -inf  ;;  %v2723_v19 = vsel %vm7354_vm11, %v8410_v53, -inf }
 0x26a   : > { %v2720_v41 = vsel %vm7361_vm8, %v6034_v15, -inf  ;;  %v2725_v25 = vsel %vm7354_vm11, %v6231_v31, -inf  ;;  %v2726_v39 = vsel %vm7361_vm8, %v6267_v54, -inf  ;;  %v2727_v52 = vsel %vm7354_vm11, %v6324_v29, -inf }
 0x26b   : > { %v7359_v61 = vmax.f32 %v2678_v49, %v2679_v14  ;;  %v2722_v49 = vsel %vm7361_vm8, %v8409_v7, -inf  ;;  %v2724_v14 = vsel %vm7361_vm8, %v6198_v32, -inf  ;;  %v2728_v63 = vsel %vm7361_vm8, %v6397_v18, -inf }
 0x26c   : > { %v2729_v33 = vsel %vm7354_vm11, %v6430_v37, -inf  ;;  %v2730_v58 = vsel %vm7361_vm8, %v6471_v11, -inf  ;;  %v2731_v27 = vsel %vm7354_vm11, %v6545_v9, -inf  ;;  %v2732_v28 = vsel %vm7361_vm8, %v6601_v1, -inf }
 0x26d   : > { %v2733_v4 = vsel %vm285_vm7, %v2719_v59, -inf  ;;  %v2734_v13 = vsel %vm285_vm7, %v2720_v41, -inf  ;;  %v2742_v51 = vsel %vm285_vm7, %v2721_v47, -inf  ;;  %v2743_v20 = vsel %vm285_vm7, %v2722_v49, -inf }
 0x26e   : > { %v2735_v50 = vmax.f32 %v2733_v4, %v2734_v13  ;;  %v2751_v21 = vsel %vm285_vm7, %v2723_v19, -inf  ;;  %v2752_v3 = vsel %vm285_vm7, %v2724_v14, -inf  ;;  %v2744_v30 = vmax.f32 %v2742_v51, %v2743_v20 }
 0x26f   : > { %v2753_v5 = vmax.f32 %v2751_v21, %v2752_v3  ;;  %v2760_v2 = vsel %vm285_vm7, %v2725_v25, -inf  ;;  %v2761_v26 = vsel %vm285_vm7, %v2726_v39, -inf  ;;  %v2769_v59 = vsel %vm285_vm7, %v2727_v52, -inf }
 0x270   : > { %v2736_v46 = vrot.slane %v2735_v50, 4  ;;  %v2762_v62 = vmax.f32 %v2760_v2, %v2761_v26  ;;  %v2770_v41 = vsel %vm285_vm7, %v2728_v63, -inf  ;;  %v2745_v47 = vrot.slane %v2744_v30, 4 }
 0x271   : > { %v2754_v13 = vrot.slane %v2753_v5, 4  ;;  %v2771_v4 = vmax.f32 %v2769_v59, %v2770_v41  ;;  %v2778_v49 = vsel %vm285_vm7, %v2729_v33, -inf  ;;  %v2779_v51 = vsel %vm285_vm7, %v2730_v58, -inf }
 0x272   : > { %v2737_v19 = vmax.f32 %v2735_v50, %v2736_v46  ;;  %v2763_v48 = vrot.slane %v2762_v62, 4  ;;  %v2787_v3 = vsel %vm285_vm7, %v2731_v27, -inf  ;;  %v2746_v21 = vmax.f32 %v2744_v30, %v2745_v47 }
 0x273   : > { %v2755_v20 = vmax.f32 %v2753_v5, %v2754_v13  ;;  %v2772_v39 = vrot.slane %v2771_v4, 4  ;;  %v2780_v25 = vmax.f32 %v2778_v49, %v2779_v51  ;;  %v2690_v2 = vsel %vm7322_vm14, 0.0, %v7346_v43 }
 0x274   : > { %v2738_v52 = vrot.slane %v2737_v19, 2  ;;  %v2764_v63 = vmax.f32 %v2762_v62, %v2763_v48  ;;  %v2788_v14 = vsel %vm285_vm7, %v2732_v28, -inf  ;;  %v2747_v26 = vrot.slane %v2746_v21, 2 }
 0x275   : > { %v2756_v33 = vrot.slane %v2755_v20, 2  ;;  %v2773_v46 = vmax.f32 %v2771_v4, %v2772_v39  ;;  %v2781_v50 = vrot.slane %v2780_v25, 4  ;;  %v2789_v41 = vmax.f32 %v2787_v3, %v2788_v14 }
 0x276   : > { %v2739_v59 = vmax.f32 %v2737_v19, %v2738_v52  ;;  %v2765_v58 = vrot.slane %v2764_v63, 2  ;;  %vm7427_vm8 = vcmp.ge.s32.totalorder %v3538_v8, %v2822_v55  ;;  %v2748_v27 = vmax.f32 %v2746_v21, %v2747_v26 }
 0x277   : > { %v2757_v5 = vmax.f32 %v2755_v20, %v2756_v33  ;;  %v2774_v47 = vrot.slane %v2773_v46, 2  ;;  %v2782_v13 = vmax.f32 %v2780_v25, %v2781_v50  ;;  %v2790_v28 = vrot.slane %v2789_v41, 4 }
 0x278   : > { %v2740_v48 = vrot.slane %v2739_v59, 1  ;;  %v2766_v62 = vmax.f32 %v2764_v63, %v2765_v58  ;;  %vm7432_vm11 = vcmp.ge.s32.totalorder %v8356_v6, %v2822_v55  ;;  %v2749_v49 = vrot.slane %v2748_v27, 1 }
 0x279   : > { %v2758_v19 = vrot.slane %v2757_v5, 1  ;;  %v2775_v51 = vmax.f32 %v2773_v46, %v2774_v47  ;;  %v2783_v3 = vrot.slane %v2782_v13, 2  ;;  %v2791_v20 = vmax.f32 %v2789_v41, %v2790_v28 }
 0x27a   : > { %v7436_v39 = vmax.f32 %v2739_v59, %v2740_v48  ;;  %v2767_v21 = vrot.slane %v2766_v62, 1  ;;  %v8483_v52 = vstv %s8634_s18  ;;  %v7441_v25 = vmax.f32 %v2748_v27, %v2749_v49 }
 0x27b   : > { %vm2826_vm9 = vcmp.lt.s32.totalorder %v3538_v8, %v8483_v52  ;;  %v7443_v63 = vmax.f32 %v2757_v5, %v2758_v19  ;;  %v2776_v55 = vrot.slane %v2775_v51, 1  ;;  %v2784_v14 = vmax.f32 %v2782_v13, %v2783_v3 }
 0x27c   : > { %v7445_v26 = vmax.f32 %v2766_v62, %v2767_v21  ;;  %v2792_v33 = vrot.slane %v2791_v20, 2  ;;  %v8484_v50 = vstv %s7300_s24  ;;  %v8487_v59 = vmov %v8483_v52  ;;  %vm7466_vm12 = vmand %vm7427_vm8, %vm2826_vm9 }
 0x27d   : > { %vm7449_vm15 = vcmp.eq.s32.totalorder %v8484_v50, 1  ;;  %vm2827_vm10 = vcmp.lt.s32.totalorder %v8356_v6, %v8487_v59  ;;  %v2691_v8 = vsel %vm7322_vm14, 0.0, %v7359_v61  ;;  %v7459_v58 = vmax.f32 %v2775_v51, %v2776_v55 }
 0x27e   : > { %v2785_v41 = vrot.slane %v2784_v14, 1  ;;  %v2800_v27 = vsel %vm7449_vm15, 0.0, %v7436_v39  ;;  %v2793_v47 = vmax.f32 %v2791_v20, %v2792_v33  ;;  %v2801_v6 = vsel %vm7449_vm15, 0.0, %v7441_v25  ;;  %vm7481_vm5 = vmand %vm7432_vm11, %vm2827_vm10 }
 0x27f   : > { %v2802_v13 = vsel %vm7449_vm15, 0.0, %v7443_v63  ;;  %v2803_v48 = vsel %vm7449_vm15, 0.0, %v7445_v26  ;;  %v2804_v28 = vsel %vm7449_vm15, 0.0, %v7459_v58  ;;  %v2834_v49 = vsel %vm7466_vm12, %v5975_v24, -inf  ;;  %v8564_v26 = vld [vmem:[#allocation21_spill] sm:$0xff] }
 0x280   : > { %v7485_v62 = vmax.f32 %v2784_v14, %v2785_v41  ;;  %v2835_v19 = vsel %vm7481_vm5, %v6034_v15, -inf  ;;  %v2794_v51 = vrot.slane %v2793_v47, 1  ;;  %v2836_v4 = vsel %vm7466_vm12, %v6067_v22, -inf }
 0x281   : > { %v2837_v3 = vsel %vm7481_vm5, %v8409_v7, -inf  ;;  %v2838_v21 = vsel %vm7466_vm12, %v8410_v53, -inf  ;;  %v2839_v15 = vsel %vm7481_vm5, %v6198_v32, -inf  ;;  %v2840_v22 = vsel %vm7466_vm12, %v6231_v31, -inf }
 0x282   : > { %v2841_v7 = vsel %vm7481_vm5, %v6267_v54, -inf  ;;  %v2842_v53 = vsel %vm7466_vm12, %v6324_v29, -inf  ;;  %v2843_v20 = vsel %vm7481_vm5, %v6397_v18, -inf  ;;  %v2844_v32 = vsel %vm7466_vm12, %v6430_v37, -inf }
 0x283   : > { %v2845_v31 = vsel %vm7481_vm5, %v6471_v11, -inf  ;;  %v2846_v54 = vsel %vm7466_vm12, %v6545_v9, -inf  ;;  %v2848_v29 = vsel %vm285_vm7, %v2834_v49, -inf  ;;  %v2849_v52 = vsel %vm285_vm7, %v2835_v19, -inf }
 0x284   : > { %v2857_v55 = vsel %vm285_vm7, %v2836_v4, -inf  ;;  %v2847_v18 = vsel %vm7481_vm5, %v6601_v1, -inf  ;;  %v2850_v14 = vmax.f32 %v2848_v29, %v2849_v52  ;;  %v2858_v37 = vsel %vm285_vm7, %v2837_v3, -inf }
 0x285   : > { %v2866_v33 = vsel %vm285_vm7, %v2838_v21, -inf  ;;  %v2859_v11 = vmax.f32 %v2857_v55, %v2858_v37  ;;  %v2867_v50 = vsel %vm285_vm7, %v2839_v15, -inf  ;;  %v2875_v9 = vsel %vm285_vm7, %v2840_v22, -inf }
 0x286   : > { %v2876_v59 = vsel %vm285_vm7, %v2841_v7, -inf  ;;  %v2851_v41 = vrot.slane %v2850_v14, 4  ;;  %v2868_v5 = vmax.f32 %v2866_v33, %v2867_v50  ;;  %v2884_v1 = vsel %vm285_vm7, %v2842_v53, -inf }
 0x287   : > { %v2877_v49 = vmax.f32 %v2875_v9, %v2876_v59  ;;  %v2860_v30 = vrot.slane %v2859_v11, 4  ;;  %v2885_v19 = vsel %vm285_vm7, %v2843_v20, -inf  ;;  %v2893_v4 = vsel %vm285_vm7, %v2844_v32, -inf }
 0x288   : > { %v2894_v3 = vsel %vm285_vm7, %v2845_v31, -inf  ;;  %v2852_v21 = vmax.f32 %v2850_v14, %v2851_v41  ;;  %v2869_v15 = vrot.slane %v2868_v5, 4  ;;  %v2886_v29 = vmax.f32 %v2884_v1, %v2885_v19 }
 0x289   : > { %v2878_v22 = vrot.slane %v2877_v49, 4  ;;  %v2861_v7 = vmax.f32 %v2859_v11, %v2860_v30  ;;  %v2895_v52 = vmax.f32 %v2893_v4, %v2894_v3  ;;  %v2902_v55 = vsel %vm285_vm7, %v2846_v54, -inf }
 0x28a   : > { %v2903_v37 = vsel %vm285_vm7, %v2847_v18, -inf  ;;  %v2853_v53 = vrot.slane %v2852_v21, 2  ;;  %v2870_v20 = vmax.f32 %v2868_v5, %v2869_v15  ;;  %v2887_v32 = vrot.slane %v2886_v29, 4 }
 0x28b   : > { %v2879_v33 = vmax.f32 %v2877_v49, %v2878_v22  ;;  %v7556_v50 = vmax.f32 %v2793_v47, %v2794_v51  ;;  %v2862_v31 = vrot.slane %v2861_v7, 2  ;;  %v2896_v14 = vrot.slane %v2895_v52, 4 }
 0x28c   : > { %v2904_v9 = vmax.f32 %v2902_v55, %v2903_v37  ;;  %v2854_v59 = vmax.f32 %v2852_v21, %v2853_v53  ;;  %v2871_v11 = vrot.slane %v2870_v20, 2  ;;  %v2888_v1 = vmax.f32 %v2886_v29, %v2887_v32 }
 0x28d   : > { %v2880_v41 = vrot.slane %v2879_v33, 2  ;;  %v2863_v54 = vmax.f32 %v2861_v7, %v2862_v31  ;;  %v2897_v30 = vmax.f32 %v2895_v52, %v2896_v14  ;;  %v2913_v19 = vstv %s7554_s19 }
 0x28e   : > { %v2905_v18 = vrot.slane %v2904_v9, 4  ;;  %v2855_v4 = vrot.slane %v2854_v59, 1  ;;  %v2872_v3 = vmax.f32 %v2870_v20, %v2871_v11  ;;  %v2889_v5 = vrot.slane %v2888_v1, 2 }
 0x28f   : > { %v2881_v24 = vmax.f32 %v2879_v33, %v2880_v41  ;;  %v2864_v49 = vrot.slane %v2863_v54, 1  ;;  %v2898_v15 = vrot.slane %v2897_v30, 2  ;;  %v8492_v51 = vsel %vm6662_vm13, 0.0, %v6652_v23 }
 0x290   : > { %v2906_v47 = vmax.f32 %v2904_v9, %v2905_v18  ;;  %v8493_v21 = vsel %vm6662_vm13, 0.0, %v6655_v10  ;;  %v2856_v29 = vmax.f32 %v2854_v59, %v2855_v4  ;;  %v2873_v7 = vrot.slane %v2872_v3, 1 }
 0x291   : > { %v2929_v22 = vsel %vm1928_vm0, %v8493_v21, %v8492_v51  ;;  %v2882_v52 = vrot.slane %v2881_v24, 1  ;;  %v2890_v55 = vmax.f32 %v2888_v1, %v2889_v5  ;;  %v2865_v37 = vmax.f32 %v2863_v54, %v2864_v49 }
 0x292   : > { %v2899_v53 = vmax.f32 %v2897_v30, %v2898_v15  ;;  %v2907_v20 = vrot.slane %v2906_v47, 2  ;;  %v8494_v33 = vsel %vm6662_vm13, 0.0, %v6658_v17  ;;  %v2806_v23 = vsel %vm7449_vm15, 0.0, %v7556_v50 }
 0x293   : > { %v2930_v32 = vsel %vm1931_vm2, %v8494_v33, %v2929_v22  ;;  %v2874_v10 = vmax.f32 %v2872_v3, %v2873_v7  ;;  %v2883_v31 = vmax.f32 %v2881_v24, %v2882_v52  ;;  %v2891_v14 = vrot.slane %v2890_v55, 1 }
 0x294   : > { %v2900_v9 = vrot.slane %v2899_v53, 1  ;;  %v2908_v59 = vmax.f32 %v2906_v47, %v2907_v20  ;;  %vm7577_vm5 = vcmp.eq.s32.totalorder %v2913_v19, 1  ;;  %v8497_v17 = vsel %vm6662_vm13, 0.0, %v6660_v35 }
 0x295   : > { %v2931_v41 = vsel %vm1934_vm4, %v8497_v17, %v2930_v32  ;;  %v2892_v1 = vmax.f32 %v2890_v55, %v2891_v14  ;;  %v2915_v54 = vsel %vm7577_vm5, 0.0, %v2856_v29  ;;  %v2916_v24 = vsel %vm7577_vm5, 0.0, %v2865_v37  ;;  %v8513_v55 = vld [vmem:[#allocation24_spill] sm:$0xff] }
 0x296   : > { %v8498_v30 = vsel %vm6662_vm13, 0.0, %v6674_v40  ;;  %vm8499_vm8 = vcmask 1044484   ;;  %v2901_v19 = vmax.f32 %v2899_v53, %v2900_v9  ;;  %v2909_v4 = vrot.slane %v2908_v59, 1  ;;  %v8515_v53 = vld [vmem:[#allocation19_spill] sm:$0xff] }
 0x297   : > { %v2932_v18 = vsel %vm8499_vm8, %v8498_v30, %v2931_v41  ;;  %v8500_v35 = vsel %vm6662_vm13, 0.0, %v6686_v36  ;;  %vm8501_vm11 = vcmask 1045509   ;;  %v8502_v5 = vsel %vm6816_vm1, 0.0, %v6807_v42  ;;  %v8523_v9 = vld [vmem:[#allocation31_spill] sm:$0xff] }
 0x298   : > { %v2933_v3 = vsel %vm8501_vm11, %v8500_v35, %v2932_v18  ;;  %v8503_v49 = vsel %vm6816_vm1, 0.0, %v6809_v45  ;;  %v2917_v15 = vsel %vm7577_vm5, 0.0, %v2874_v10  ;;  %v2918_v36 = vsel %vm7577_vm5, 0.0, %v2883_v31  ;;  %v8521_v31 = vld [vmem:[#allocation29_spill] sm:$0xff]  ;;  %v8528_v18 = vld [vmem:[#allocation34_spill] sm:$0xff] }
 0x299   : > { %v2943_v40 = vsel %vm1928_vm0, %v8503_v49, %v8502_v5  ;;  %v2919_v47 = vsel %vm7577_vm5, 0.0, %v2892_v1  ;;  %v8504_v42 = vsel %vm6816_vm1, 0.0, %v6812_v57  ;;  %v8505_v51 = vsel %vm6662_vm13, 0.0, %v6699_v56  ;;  %v8511_v56 = vld [vmem:[#allocation23_spill] sm:$0xff]  ;;  %vm8517_vm13 = vmmov %vm8499_vm8 }
 0x29a   : > { %v2944_v45 = vsel %vm1931_vm2, %v8504_v42, %v2943_v40  ;;  %vm8506_vm9 = vcmask 1046534   ;;  %v8507_v22 = vsel %vm6816_vm1, 0.0, %v6826_v60  ;;  %v8508_v7 = vsel %vm6993_vm3, 0.0, %v6980_v44  ;;  %v8526_v1 = vld [vmem:[#allocation27_spill] sm:$0xff]  ;;  %v8530_v40 = vld [vmem:[#allocation22_spill] sm:$0xff]  ;;  %vm8532_vm8 = vmmov %vm8501_vm11 }
 0x29b   : > { %v2934_v21 = vsel %vm8506_vm9, %v8505_v51, %v2933_v3  ;;  %v2945_v29 = vsel %vm1934_vm4, %v8507_v22, %v2944_v45  ;;  %v8509_v57 = vsel %vm6993_vm3, 0.0, %v6986_v34  ;;  %vm8510_vm10 = vcmask 1047559   ;;  %v8518_v34 = vld [vmem:[#allocation25_spill] sm:$0xff]  ;;  %vm8525_vm12 = vmmov %vm8506_vm9  ;;  %v8533_v51 = vld [vmem:[#allocation26_spill] sm:$0xff] }
 0x29c   : > { %v2957_v0 = vsel %vm8510_vm10, %v8509_v57, %v8508_v7  ;;  %v8512_v52 = vsel %vm6993_vm3, 0.0, %v8511_v56  ;;  %v8514_v60 = vsel %vm6993_vm3, 0.0, %v8513_v55  ;;  %v8516_v44 = vsel %vm6816_vm1, 0.0, %v8515_v53  ;;  %v8535_v7 = vld [vmem:[#allocation32_spill] sm:$0xff]  ;;  %vm8537_vm11 = vmmov %vm8510_vm10 }
 0x29d   : > { %v2958_v37 = vsel %vm1928_vm0, %v8514_v60, %v8512_v52  ;;  %v2946_v20 = vsel %vm8517_vm13, %v8516_v44, %v2945_v29  ;;  %v8519_v33 = vsel %vm6993_vm3, 0.0, %v8518_v34  ;;  %v8522_v14 = vsel %vm7147_vm6, 0.0, %v8521_v31  ;;  %v8540_v52 = vld [vmem:[#allocation36_spill] sm:$0xff]  ;;  %v8542_v60 = vld [vmem:[#allocation37_spill] sm:$0xff]  ;;  %vm8544_vm9 = vmmov %vm8532_vm8 }
 0x29e   : > { %v2959_v32 = vsel %vm1931_vm2, %v8519_v33, %v2958_v37  ;;  %v8524_v17 = vsel %vm7147_vm6, 0.0, %v8523_v9  ;;  %v8527_v30 = vsel %vm7147_vm6, 0.0, %v8526_v1  ;;  %v8529_v35 = vsel %vm7147_vm6, 0.0, %v8528_v18  ;;  %v8545_v44 = vld [vmem:[#allocation7_spill] sm:$0xff]  ;;  %v8547_v33 = vld [vmem:[#allocation28_spill] sm:$0xff]  ;;  %vm8549_vm10 = vmmov %vm8517_vm13 }
 0x29f   : > { %v2971_v41 = vsel %vm8525_vm12, %v8524_v17, %v8522_v14  ;;  %v2973_v3 = vsel %vm1928_vm0, %v8529_v35, %v8527_v30  ;;  %v2910_v5 = vmax.f32 %v2908_v59, %v2909_v4  ;;  %v2920_v49 = vsel %vm7577_vm5, 0.0, %v2901_v19  ;;  %v8538_v19 = vld [vmem:[#allocation35_spill] sm:$0xff]  ;;  %v8550_v14 = vld [vmem:[#allocation46_spill] sm:$0xff]  ;;  %vm8554_vm13 = vmmov %vm8525_vm12 }
 0x2a0   : > { %v8531_v42 = vsel %vm6816_vm1, 0.0, %v8530_v40  ;;  %v8534_v22 = vsel %vm6993_vm3, 0.0, %v8533_v51  ;;  %v8536_v59 = vsel %vm7147_vm6, 0.0, %v8535_v7  ;;  %v8539_v57 = vsel %vm7147_vm6, 0.0, %v8538_v19  ;;  %vm8559_vm12 = vmmov %vm8532_vm8 }
 0x2a1   : > { %v2947_v45 = vsel %vm8532_vm8, %v8531_v42, %v2946_v20  ;;  %v2960_v29 = vsel %vm1934_vm4, %v8534_v22, %v2959_v32  ;;  %v2972_v4 = vsel %vm8537_vm11, %v8536_v59, %v2971_v41  ;;  %v2974_v56 = vsel %vm1931_vm2, %v8539_v57, %v2973_v3  ;;  %v8552_v41 = vld [vmem:[#allocation38_spill] sm:$0xff]  ;;  %vm8560_vm8 = vmmov %vm8554_vm13 }
 0x2a2   : > { %v8541_v55 = vsel %vm7322_vm14, 0.0, %v8540_v52  ;;  %v8543_v37 = vsel %vm7322_vm14, 0.0, %v8542_v60  ;;  %v8546_v20 = vsel %vm7322_vm14, 0.0, %v8545_v44  ;;  %v8548_v32 = vsel %vm6993_vm3, 0.0, %v8547_v33  ;;  %vm8555_vm3 = vmmov %vm8549_vm10 }
 0x2a3   : > { %v2985_v53 = vsel %vm8544_vm9, %v8543_v37, %v8541_v55  ;;  %v2988_v34 = vsel %vm1928_vm0, %v2690_v2, %v8546_v20  ;;  %v2961_v31 = vsel %vm8549_vm10, %v8548_v32, %v2960_v29  ;;  %v8551_v9 = vsel %vm7147_vm6, 0.0, %v8550_v14  ;;  %v8556_v2 = vld [vmem:[#allocation39_spill] sm:$0xff]  ;;  %vm8558_vm6 = vmmov %vm8537_vm11 }
 0x2a4   : > { %v2975_v17 = vsel %vm1934_vm4, %v8551_v9, %v2974_v56  ;;  %v8553_v1 = vsel %vm7322_vm14, 0.0, %v8552_v41  ;;  %v2999_v16 = vsel %vm8555_vm3, %v2801_v6, %v2800_v27  ;;  %v8557_v10 = vsel %vm7322_vm14, 0.0, %v8556_v2  ;;  %vm8561_vm11 = vmmov %vm8555_vm3 }
 0x2a5   : > { %v2986_v43 = vsel %vm8554_vm13, %v8553_v1, %v2985_v53  ;;  %v2989_v18 = vsel %vm1931_vm2, %v2691_v8, %v2988_v34  ;;  %v3000_v39 = vsel %vm8559_vm12, %v2802_v13, %v2999_v16  ;;  %v3013_v25 = vsel %vm1934_vm4, %v2916_v24, %v2915_v54  ;;  %vm8562_vm2 = vmmov %vm8558_vm6 }
 0x2a6   : > { %v2987_v30 = vsel %vm8558_vm6, %v8557_v10, %v2986_v43  ;;  %v3001_v27 = vsel %vm8560_vm8, %v2803_v48, %v3000_v39  ;;  %v3014_v38 = vsel %vm8561_vm11, %v2917_v15, %v3013_v25  ;;  %vm3020_vm9 = vcmask 1046528   ;;  %vm8563_vm4 = vmmov %vm8559_vm12 }
 0x2a7   : > { %vm3022_vm14 = vcmask 1045504   ;;  %v3002_v61 = vsel %vm8562_vm2, %v2804_v28, %v3001_v27  ;;  %v3015_v63 = vsel %vm8563_vm4, %v2918_v36, %v3014_v38  ;;  %v8565_v8 = vsel %vm6816_vm1, 0.0, %v8564_v26  ;;  %vm8566_vm10 = vmmov %vm8560_vm8 }
 0x2a8   : > { %v3021_v6 = vsel %vm3020_vm9, %v2934_v21, %v8565_v8  ;;  %v3023_v13 = vsel %vm3022_vm14, %v2947_v45, %v2957_v0  ;;  %v3016_v48 = vsel %vm8566_vm10, %v2919_v47, %v3015_v63  ;;  %vm3024_vm13 = vcmask 1044480   ;;  %vm8567_vm12 = vmmov %vm8562_vm2 }
 0x2a9   : > { %vm3026_vm3 = vcmask 1043456   ;;  %vm3028_vm6 = vcmask 1042432   ;;  %3032 = vst.msk [vmem:[%s138_s25] sm:$0xff] %vm285_vm7, %v3021_v6  ;;  %v3017_v54 = vsel %vm8567_vm12, %v2920_v49, %v3016_v48  ;;  %v3025_v58 = vsel %vm3024_vm13, %v2961_v31, %v2972_v4 }
 0x2aa   : > { %v3027_v24 = vsel %vm3026_vm3, %v2975_v17, %v2987_v30  ;;  %v3029_v28 = vsel %vm3028_vm6, %v2989_v18, %v3002_v61  ;;  %3033 = vst.msk [vmem:[%s138_s25 + $0x8] sm:$0xff] %vm285_vm7, %v3023_v13  ;;  %v8568_v12 = vsel %vm7449_vm15, 0.0, %v7485_v62  ;;  %vm3030_vm1 = vcmask 1041408  }
 0x2ab   : > { %v3003_v15 = vsel %vm1928_vm0, %v2806_v23, %v8568_v12  ;;  %3034 = vst.msk [vmem:[%s138_s25 + $0x10] sm:$0xff] %vm285_vm7, %v3025_v58  ;;  %v2921_v36 = vsel %vm7577_vm5, 0.0, %v2910_v5  ;;  %vm3038_vm8 = vcmask 24576  }
 0x2ac   : > { %v3031_v47 = vsel %vm3030_vm1, %v3003_v15, %v3017_v54  ;;  %3035 = vst.msk [vmem:[%s138_s25 + $0x18] sm:$0xff] %vm285_vm7, %v3027_v24 }
 0x2ad   : > { %3036 = vst.msk [vmem:[%s138_s25 + $0x20] sm:$0xff] %vm285_vm7, %v3029_v28 }
 0x2ae   : > { %3037 = vst.msk [vmem:[%s138_s25 + $0x28] sm:$0xff] %vm285_vm7, %v3031_v47 }
 0x2af   : > { %3039 = vst.msk [vmem:[%s138_s25 + $0x30] sm:$0x1] %vm3038_vm8, %v2921_v36 }
 0x2b0 PF: > { %s26_s20 = sadd.s32 1, %s3479_s20  }
 0x2b1   : > { %p23_p7 = scmp.ge.s32.totalorder %s26_s20, 10  }
 0x2b3   :  { %25 = sbr.rel (!%p23_p7) target bundleno = 8 (0x8), region = 54 }

</bundles_post_ra>
